<compile_context>
chip_gen: v7x
topology: tpu7x:2x2x1
jax: 0.10.0
libtpu: 0.0.40
codegen_flags: <defaults>
</compile_context>

<pallas_src>
import functools

import jax
import jax.numpy as jnp
from jax.experimental import pallas as pl
from jax.experimental.pallas import tpu as pltpu


def _round_up(x, m):
    return ((x + m - 1) // m) * m


# ----------------------------------------------------------------------------
# Single fused forward kernel: one grid step processes one image end-to-end.
# Activation layout everywhere: rows = h * W + w (flat spatial), lanes = chan.
# ----------------------------------------------------------------------------
def _fused_forward_kernel(
    pat_ref,                        # (1, 4*blkA, 25) bf16 : 5x5 im2col patches
    w5_ref, sA_ref, bA_ref,         # (25,C1) bf16 ; (1,C1) f32 ; (1,C1) f32
    wB_ref, sB_ref, bB_ref,         # (9,C1,C2) bf16 ; (1,C2) f32 ; (1,C2) f32
    wC_ref, sC_ref, bC_ref,         # (9,C2,C3) bf16 ; (1,C3) f32 ; (1,C3) f32
    S2_ref, S3_ref,                 # (blkB,LB) f32 ; (SP,LC) f32 pool gathers
    fc1w_ref, fc1b_ref,             # (SP,C3,C4) bf16 ; (1,C4) f32
    fc2w_ref, fc2b_ref,             # (C4,1) bf16 ; (1,1) f32
    out_ref,                        # (1,1,1) f32
    bufB, bufC,                     # VMEM f32 scratch (flat activations)
    *, blkA, WP1, RB, LB, blkB, WP2, RC, LC, SP,
):
    f32 = jnp.float32
    bf16 = jnp.bfloat16

    # ---- stage 1: (blur . conv1) as one 5x5 conv + BN + ReLU + 2x2 maxpool --
    # Patch rows are ordered (dp, dq, p', q'): the four contiguous row blocks
    # are the four positions of every 2x2 pooling window, so the maxpool is an
    # elementwise max of four conv+BN+ReLU outputs.
    w5 = w5_ref[...]
    sA = sA_ref[...]
    bA = bA_ref[...]
    pooledA = None
    for i in range(4):
        p = pat_ref[0, i * blkA:(i + 1) * blkA, :]                # (blkA, 25)
        y = jnp.dot(p, w5, preferred_element_type=f32)            # bf16 MXU
        y = jnp.maximum(y * sA + bA, 0.0)                         # BN + ReLU
        pooledA = y if pooledA is None else jnp.maximum(pooledA, y)
    # pooledA: (blkA, C1), row = p' * WP1 + q'

    def conv3x3_bn_relu(buf, w_ref, s_ref, b_ref, w_in, r_out):
        """3x3 valid conv on a flat (h*w_in + w, Cin) VMEM activation buffer."""
        cout = w_ref.shape[-1]
        acc = jnp.zeros((r_out, cout), f32)
        t = 0
        for di in range(3):
            for dj in range(3):
                off = di * w_in + dj
                slab = buf[off:off + r_out, :].astype(bf16)
                acc = acc + jnp.dot(slab, w_ref[t],
                                    preferred_element_type=f32)
                t += 1
        return jnp.maximum(acc * s_ref[...] + b_ref[...], 0.0)

    # ---- stage 2: conv2 + BN + ReLU + 2x2 maxpool ---------------------------
    # Zero the pad rows so the junk conv rows they feed stay finite (the 0/1
    # pooling matmul contracts over every row; 0 * NaN would poison it).
    nb = bufB.shape[0]
    bufB[blkA:nb, :] = jnp.zeros((nb - blkA, bufB.shape[1]), f32)
    bufB[0:blkA, :] = pooledA
    zB = conv3x3_bn_relu(bufB, wB_ref, sB_ref, bB_ref, WP1, RB)   # (RB, C2)
    mB = jnp.maximum(jnp.maximum(zB[0:LB], zB[1:LB + 1]),
                     jnp.maximum(zB[WP1:WP1 + LB], zB[WP1 + 1:WP1 + 1 + LB]))
    pooledB = jnp.dot(S2_ref[...], mB, preferred_element_type=f32)  # (blkB,C2)

    # ---- stage 3: conv3 + BN + ReLU + 2x2 maxpool ---------------------------
    nc = bufC.shape[0]
    bufC[blkB:nc, :] = jnp.zeros((nc - blkB, bufC.shape[1]), f32)
    bufC[0:blkB, :] = pooledB
    zC = conv3x3_bn_relu(bufC, wC_ref, sC_ref, bC_ref, WP2, RC)   # (RC, C3)
    mC = jnp.maximum(jnp.maximum(zC[0:LC], zC[1:LC + 1]),
                     jnp.maximum(zC[WP2:WP2 + LC], zC[WP2 + 1:WP2 + 1 + LC]))
    pooledC = jnp.dot(S3_ref[...], mC, preferred_element_type=f32)  # (SP, C3)

    # ---- head: Flatten(NCHW order folded into fc1w) -> Linear -> Linear -----
    h = fc1b_ref[...]                                             # (1, C4) f32
    for s in range(SP):
        xs = pooledC[s:s + 1, :].astype(bf16)                     # (1, C3)
        h = h + jnp.dot(xs, fc1w_ref[s], preferred_element_type=f32)
    logit = jnp.dot(h.astype(bf16), fc2w_ref[...],
                    preferred_element_type=f32) + fc2b_ref[...]   # (1, 1)
    out_ref[0] = 1.0 / (1.0 + jnp.exp(-logit))                    # sigmoid


# ----------------------------------------------------------------------------
# Host-side parameter folding / data prep helpers (all tiny).
# ----------------------------------------------------------------------------
def _compose_blur_conv1(w1):
    """Fold blur (3x3 ones/9, pad=1, bias-free) into conv1: one 5x5 conv.

    Returns (25, C1); rows ordered (di*5 + dj) to match the im2col patches.
    """
    rows = []
    for di in range(5):
        a0, a1 = max(0, di - 2), min(2, di)
        for dj in range(5):
            b0, b1 = max(0, dj - 2), min(2, dj)
            rows.append(w1[:, 0, a0:a1 + 1, b0:b1 + 1].sum(axis=(1, 2)) / 9.0)
    return jnp.stack(rows, axis=0)


def _fold_bn(p, eps=1e-5):
    """Inference BatchNorm folded with the conv bias into scale/bias."""
    scale = p["gamma"] / jnp.sqrt(p["var"] + eps)
    bias = (p["b"] - p["mean"]) * scale + p["beta"]
    return scale, bias


def _pool_select(hp, wp, w_in, length):
    """0/1 gather matrix: row a*wp + b picks window-max row 2*a*w_in + 2*b."""
    rows = jnp.arange(hp * wp)
    src = 2 * (rows // wp) * w_in + 2 * (rows % wp)
    return jax.nn.one_hot(src, length, dtype=jnp.float32)


# ----------------------------------------------------------------------------
# Full forward pass (one pallas_call).
# ----------------------------------------------------------------------------
@jax.jit
def forward(x_nchw, params):
    N, _, H, W = x_nchw.shape
    x = x_nchw[:, 0].astype(jnp.float32)                 # (N, H, W), 1 channel

    # Static spatial bookkeeping (mirrors conv_output_shape + MaxPool2d(2)).
    HA, WA = H - 2, W - 2            # blur(pad=1) keeps size; conv1 is valid
    HP1, WP1 = HA // 2, WA // 2      # after pool1
    HB, WB = HP1 - 2, WP1 - 2        # after conv2
    HP2, WP2 = HB // 2, WB // 2      # after pool2
    HC, WC = HP2 - 2, WP2 - 2        # after conv3
    HP3, WP3 = HC // 2, WC // 2      # after pool3
    blkA, blkB, SP = HP1 * WP1, HP2 * WP2, HP3 * WP3
    RB, RC = HB * WP1, HC * WP2      # flat conv output rows (junk cols incl.)
    LB, LC = RB - WP1 - 1, RC - WP2 - 1
    BUF_B = _round_up(max(blkA, RB + 2 * WP1 + 2), 8)
    BUF_C = _round_up(max(blkB, RC + 2 * WP2 + 2), 8)

    C1 = params["block1"]["w"].shape[0]
    C2 = params["block2"]["w"].shape[0]
    C3 = params["block3"]["w"].shape[0]
    C4 = params["fc1_w"].shape[0]

    # ---- tiny XLA-side prep: 5x5 im2col of the padded input -----------------
    # Row order (dp, dq, p', q') => the first 2x2 maxpool is a 4-block max.
    xp = jnp.pad(x, ((0, 0), (1, 1), (1, 1)))
    taps = [xp[:, di:di + HA, dj:dj + WA]
            for di in range(5) for dj in range(5)]
    pat = jnp.stack(taps, axis=-1)[:, :2 * HP1, :2 * WP1, :]
    pat = pat.reshape(N, HP1, 2, WP1, 2, 25).transpose(0, 2, 4, 1, 3, 5)
    pat = pat.reshape(N, 4 * blkA, 25).astype(jnp.bfloat16)

    # ---- fold / reshape parameters for the kernel ----------------------------
    w5 = _compose_blur_conv1(params["block1"]["w"]).astype(jnp.bfloat16)
    wB = jnp.transpose(params["block2"]["w"], (2, 3, 1, 0)
                       ).reshape(9, C1, C2).astype(jnp.bfloat16)
    wC = jnp.transpose(params["block3"]["w"], (2, 3, 1, 0)
                       ).reshape(9, C2, C3).astype(jnp.bfloat16)
    sA, bA = _fold_bn(params["block1"])
    sB, bB = _fold_bn(params["block2"])
    sC, bC = _fold_bn(params["block3"])
    sA, bA = sA.reshape(1, C1), bA.reshape(1, C1)
    sB, bB = sB.reshape(1, C2), bB.reshape(1, C2)
    sC, bC = sC.reshape(1, C3), bC.reshape(1, C3)
    S2 = _pool_select(HP2, WP2, WP1, LB)
    S3 = _pool_select(HP3, WP3, WP2, LC)
    # fc1 consumes the NCHW flatten (index = c*SP + s); fold it into (SP,C3,C4)
    fc1w = jnp.transpose(params["fc1_w"].reshape(C4, C3, SP),
                         (2, 1, 0)).astype(jnp.bfloat16)
    fc1b = params["fc1_b"].reshape(1, C4).astype(jnp.float32)
    fc2w = jnp.transpose(params["fc2_w"].reshape(1, C4)).astype(jnp.bfloat16)
    fc2b = params["fc2_b"].reshape(1, 1).astype(jnp.float32)

    consts = (w5, sA, bA, wB, sB, bB, wC, sC, bC, S2, S3,
              fc1w, fc1b, fc2w, fc2b)

    def _const_spec(a):
        zero = (0,) * a.ndim
        return pl.BlockSpec(a.shape, lambda b: zero)

    kernel = functools.partial(
        _fused_forward_kernel,
        blkA=blkA, WP1=WP1, RB=RB, LB=LB,
        blkB=blkB, WP2=WP2, RC=RC, LC=LC, SP=SP)

    out = pl.pallas_call(
        kernel,
        out_shape=jax.ShapeDtypeStruct((N, 1, 1), jnp.float32),
        grid=(N,),
        in_specs=[pl.BlockSpec((1, 4 * blkA, 25), lambda b: (b, 0, 0))]
                 + [_const_spec(a) for a in consts],
        out_specs=pl.BlockSpec((1, 1, 1), lambda b: (b, 0, 0)),
        scratch_shapes=[pltpu.VMEM((BUF_B, C1), jnp.float32),
                        pltpu.VMEM((BUF_C, C2), jnp.float32)],
        compiler_params=pltpu.CompilerParams(
            dimension_semantics=("parallel",)),
    )(pat, *consts)

    # torch.squeeze: (N, 1) -> (N,)
    return jnp.squeeze(out)


# ----------------------------------------------------------------------------
# Deterministic parameter init (synthetic; shapes follow the module __init__)
# ----------------------------------------------------------------------------
def init_params(key, c1=8, c2=16, c3=32, c4=96, flat_spatial=4):
    ks = jax.random.split(key, 16)

    def conv_block(kw, kb, kg, kbt, km, kv, cin, cout):
        return {
            "w": 0.1 * jax.random.normal(kw, (cout, cin, 3, 3), jnp.float32),
            "b": 0.1 * jax.random.normal(kb, (cout,), jnp.float32),
            "gamma": 1.0 + 0.1 * jax.random.normal(kg, (cout,), jnp.float32),
            "beta": 0.1 * jax.random.normal(kbt, (cout,), jnp.float32),
            "mean": 0.1 * jax.random.normal(km, (cout,), jnp.float32),
            "var": 1.0 + 0.1 * jax.random.uniform(kv, (cout,), jnp.float32),
        }

    in_features = c3 * flat_spatial
    return {
        "block1": conv_block(*ks[0:6], 1, c1),
        "block2": conv_block(*ks[6:12], c1, c2),
        "block3": conv_block(*jax.random.split(ks[12], 6), c2, c3),
        "fc1_w": 0.05 * jax.random.normal(ks[13], (c4, in_features), jnp.float32),
        "fc1_b": 0.05 * jax.random.normal(ks[14], (c4,), jnp.float32),
        "fc2_w": 0.05 * jax.random.normal(ks[15], (1, c4), jnp.float32),
        "fc2_b": jnp.zeros((1,), jnp.float32),
    }


if __name__ == "__main__":
    key = jax.random.PRNGKey(0)
    k_x, k_p = jax.random.split(key)

    # config.IMAGE_SHAPE = (30, 30); trial picks: C1=8, C2=16, C3=32, C4=96.
    # 30 --blur(pad1)--> 30 --conv3--> 28 --pool--> 14 --conv3--> 12 --pool-->
    # 6 --conv3--> 4 --pool--> 2  => flatten = 32*2*2 = 128 features.
    x = jax.random.normal(k_x, (2, 1, 30, 30), jnp.float32)
    params = init_params(k_p, c1=8, c2=16, c3=32, c4=96, flat_spatial=4)

    out = forward(x, params)
    out = jax.block_until_ready(out)
    assert out.shape == (2,)
    assert bool(jnp.all((out >= 0.0) & (out <= 1.0)))
    print("KERNEL_OK")
</pallas_src>

<mosaic_0001>
module attributes {stable_mosaic.version = 11 : i64} {
  func.func @_fused_forward_kernel(%arg0: i32, %arg1: memref<1x784x25xbf16, #tpu.memory_space<vmem>>, %arg2: memref<25x8xbf16, #tpu.memory_space<vmem>>, %arg3: memref<1x8xf32, #tpu.memory_space<vmem>>, %arg4: memref<1x8xf32, #tpu.memory_space<vmem>>, %arg5: memref<9x8x16xbf16, #tpu.memory_space<vmem>>, %arg6: memref<1x16xf32, #tpu.memory_space<vmem>>, %arg7: memref<1x16xf32, #tpu.memory_space<vmem>>, %arg8: memref<9x16x32xbf16, #tpu.memory_space<vmem>>, %arg9: memref<1x32xf32, #tpu.memory_space<vmem>>, %arg10: memref<1x32xf32, #tpu.memory_space<vmem>>, %arg11: memref<36x153xf32, #tpu.memory_space<vmem>>, %arg12: memref<4x17xf32, #tpu.memory_space<vmem>>, %arg13: memref<4x32x96xbf16, #tpu.memory_space<vmem>>, %arg14: memref<1x96xf32, #tpu.memory_space<vmem>>, %arg15: memref<96x1xbf16, #tpu.memory_space<vmem>>, %arg16: memref<1x1xf32, #tpu.memory_space<vmem>>, %arg17: memref<1x1x1xf32, #tpu.memory_space<vmem>>, %arg18: memref<200x8xf32, #tpu.memory_space<vmem>>, %arg19: memref<40x16xf32, #tpu.memory_space<vmem>>) attributes {dimension_semantics = [#tpu.dimension_semantics<parallel>], iteration_bounds = array<i64: 2>, scalar_prefetch = 0 : i64, scratch_operands = 2 : i64, tpu.core_type = #tpu.core_type<tc>, window_params = [{transform_indices = @transform_0, window_bounds = array<i64: 1, 784, 25>}, {pipeline_mode = #tpu.pipeline_mode<synchronous>, transform_indices = @transform_1, window_bounds = array<i64: 25, 8>}, {pipeline_mode = #tpu.pipeline_mode<synchronous>, transform_indices = @transform_2, window_bounds = array<i64: 1, 8>}, {pipeline_mode = #tpu.pipeline_mode<synchronous>, transform_indices = @transform_3, window_bounds = array<i64: 1, 8>}, {pipeline_mode = #tpu.pipeline_mode<synchronous>, transform_indices = @transform_4, window_bounds = array<i64: 9, 8, 16>}, {pipeline_mode = #tpu.pipeline_mode<synchronous>, transform_indices = @transform_5, window_bounds = array<i64: 1, 16>}, {pipeline_mode = #tpu.pipeline_mode<synchronous>, transform_indices = @transform_6, window_bounds = array<i64: 1, 16>}, {pipeline_mode = #tpu.pipeline_mode<synchronous>, transform_indices = @transform_7, window_bounds = array<i64: 9, 16, 32>}, {pipeline_mode = #tpu.pipeline_mode<synchronous>, transform_indices = @transform_8, window_bounds = array<i64: 1, 32>}, {pipeline_mode = #tpu.pipeline_mode<synchronous>, transform_indices = @transform_9, window_bounds = array<i64: 1, 32>}, {pipeline_mode = #tpu.pipeline_mode<synchronous>, transform_indices = @transform_10, window_bounds = array<i64: 36, 153>}, {pipeline_mode = #tpu.pipeline_mode<synchronous>, transform_indices = @transform_11, window_bounds = array<i64: 4, 17>}, {pipeline_mode = #tpu.pipeline_mode<synchronous>, transform_indices = @transform_12, window_bounds = array<i64: 4, 32, 96>}, {pipeline_mode = #tpu.pipeline_mode<synchronous>, transform_indices = @transform_13, window_bounds = array<i64: 1, 96>}, {pipeline_mode = #tpu.pipeline_mode<synchronous>, transform_indices = @transform_14, window_bounds = array<i64: 96, 1>}, {pipeline_mode = #tpu.pipeline_mode<synchronous>, transform_indices = @transform_15, window_bounds = array<i64: 1, 1>}, {transform_indices = @transform_16, window_bounds = array<i64: 1, 1, 1>}]} {
    %c0 = arith.constant 0 : index
    %c0_0 = arith.constant 0 : index
    %0 = vector.load %arg2[%c0, %c0_0] : memref<25x8xbf16, #tpu.memory_space<vmem>>, vector<25x8xbf16>
    %c0_1 = arith.constant 0 : index
    %c0_2 = arith.constant 0 : index
    %1 = vector.load %arg3[%c0_1, %c0_2] : memref<1x8xf32, #tpu.memory_space<vmem>>, vector<1x8xf32>
    %c0_3 = arith.constant 0 : index
    %c0_4 = arith.constant 0 : index
    %2 = vector.load %arg4[%c0_3, %c0_4] : memref<1x8xf32, #tpu.memory_space<vmem>>, vector<1x8xf32>
    %c0_5 = arith.constant 0 : index
    %c0_6 = arith.constant 0 : index
    %c0_7 = arith.constant 0 : index
    %3 = vector.load %arg1[%c0_5, %c0_6, %c0_7] : memref<1x784x25xbf16, #tpu.memory_space<vmem>>, vector<1x196x25xbf16>
    %4 = vector.shape_cast %3 : vector<1x196x25xbf16> to vector<196x25xbf16>
    %cst = arith.constant dense<0.000000e+00> : vector<196x8xf32>
    %5 = tpu.matmul %4, %0, %cst {dimension_numbers = #tpu.dot_dimension_numbers<[1], [0], [0], [1], [0, 0, 1, 1], [], []>} : vector<196x25xbf16>, vector<25x8xbf16>, vector<196x8xf32> -> vector<196x8xf32>
    %6 = vector.broadcast %1 : vector<1x8xf32> to vector<196x8xf32>
    %7 = arith.mulf %5, %6 : vector<196x8xf32>
    %8 = vector.broadcast %2 : vector<1x8xf32> to vector<196x8xf32>
    %9 = arith.addf %7, %8 : vector<196x8xf32>
    %cst_8 = arith.constant 0.000000e+00 : f32
    %10 = vector.broadcast %cst_8 : f32 to vector<196x8xf32>
    %11 = arith.maximumf %9, %10 : vector<196x8xf32>
    %c0_9 = arith.constant 0 : index
    %c196 = arith.constant 196 : index
    %c0_10 = arith.constant 0 : index
    %12 = vector.load %arg1[%c0_9, %c196, %c0_10] : memref<1x784x25xbf16, #tpu.memory_space<vmem>>, vector<1x196x25xbf16>
    %13 = vector.shape_cast %12 : vector<1x196x25xbf16> to vector<196x25xbf16>
    %cst_11 = arith.constant dense<0.000000e+00> : vector<196x8xf32>
    %14 = tpu.matmul %13, %0, %cst_11 {dimension_numbers = #tpu.dot_dimension_numbers<[1], [0], [0], [1], [0, 0, 1, 1], [], []>} : vector<196x25xbf16>, vector<25x8xbf16>, vector<196x8xf32> -> vector<196x8xf32>
    %15 = vector.broadcast %1 : vector<1x8xf32> to vector<196x8xf32>
    %16 = arith.mulf %14, %15 : vector<196x8xf32>
    %17 = vector.broadcast %2 : vector<1x8xf32> to vector<196x8xf32>
    %18 = arith.addf %16, %17 : vector<196x8xf32>
    %cst_12 = arith.constant 0.000000e+00 : f32
    %19 = vector.broadcast %cst_12 : f32 to vector<196x8xf32>
    %20 = arith.maximumf %18, %19 : vector<196x8xf32>
    %21 = arith.maximumf %11, %20 : vector<196x8xf32>
    %c0_13 = arith.constant 0 : index
    %c392 = arith.constant 392 : index
    %c0_14 = arith.constant 0 : index
    %22 = vector.load %arg1[%c0_13, %c392, %c0_14] : memref<1x784x25xbf16, #tpu.memory_space<vmem>>, vector<1x196x25xbf16>
    %23 = vector.shape_cast %22 : vector<1x196x25xbf16> to vector<196x25xbf16>
    %cst_15 = arith.constant dense<0.000000e+00> : vector<196x8xf32>
    %24 = tpu.matmul %23, %0, %cst_15 {dimension_numbers = #tpu.dot_dimension_numbers<[1], [0], [0], [1], [0, 0, 1, 1], [], []>} : vector<196x25xbf16>, vector<25x8xbf16>, vector<196x8xf32> -> vector<196x8xf32>
    %25 = vector.broadcast %1 : vector<1x8xf32> to vector<196x8xf32>
    %26 = arith.mulf %24, %25 : vector<196x8xf32>
    %27 = vector.broadcast %2 : vector<1x8xf32> to vector<196x8xf32>
    %28 = arith.addf %26, %27 : vector<196x8xf32>
    %cst_16 = arith.constant 0.000000e+00 : f32
    %29 = vector.broadcast %cst_16 : f32 to vector<196x8xf32>
    %30 = arith.maximumf %28, %29 : vector<196x8xf32>
    %31 = arith.maximumf %21, %30 : vector<196x8xf32>
    %c0_17 = arith.constant 0 : index
    %c588 = arith.constant 588 : index
    %c0_18 = arith.constant 0 : index
    %32 = vector.load %arg1[%c0_17, %c588, %c0_18] : memref<1x784x25xbf16, #tpu.memory_space<vmem>>, vector<1x196x25xbf16>
    %33 = vector.shape_cast %32 : vector<1x196x25xbf16> to vector<196x25xbf16>
    %cst_19 = arith.constant dense<0.000000e+00> : vector<196x8xf32>
    %34 = tpu.matmul %33, %0, %cst_19 {dimension_numbers = #tpu.dot_dimension_numbers<[1], [0], [0], [1], [0, 0, 1, 1], [], []>} : vector<196x25xbf16>, vector<25x8xbf16>, vector<196x8xf32> -> vector<196x8xf32>
    %35 = vector.broadcast %1 : vector<1x8xf32> to vector<196x8xf32>
    %36 = arith.mulf %34, %35 : vector<196x8xf32>
    %37 = vector.broadcast %2 : vector<1x8xf32> to vector<196x8xf32>
    %38 = arith.addf %36, %37 : vector<196x8xf32>
    %cst_20 = arith.constant 0.000000e+00 : f32
    %39 = vector.broadcast %cst_20 : f32 to vector<196x8xf32>
    %40 = arith.maximumf %38, %39 : vector<196x8xf32>
    %41 = arith.maximumf %31, %40 : vector<196x8xf32>
    %cst_21 = arith.constant 0.000000e+00 : f32
    %42 = vector.broadcast %cst_21 : f32 to vector<4x8xf32>
    %c196_22 = arith.constant 196 : index
    %c0_23 = arith.constant 0 : index
    %43 = vector.load %arg18[%c196_22, %c0_23] : memref<200x8xf32, #tpu.memory_space<vmem>>, vector<4x8xf32>
    tpu.vector_store %arg18[%c196_22, %c0_23], %42 {strides = array<i32>} : memref<200x8xf32, #tpu.memory_space<vmem>>, vector<4x8xf32>,
    %c0_24 = arith.constant 0 : index
    %c0_25 = arith.constant 0 : index
    %44 = vector.load %arg18[%c0_24, %c0_25] : memref<200x8xf32, #tpu.memory_space<vmem>>, vector<196x8xf32>
    tpu.vector_store %arg18[%c0_24, %c0_25], %41 {strides = array<i32>} : memref<200x8xf32, #tpu.memory_space<vmem>>, vector<196x8xf32>,
    %cst_26 = arith.constant 0.000000e+00 : f32
    %45 = vector.broadcast %cst_26 : f32 to vector<168x16xf32>
    %c0_27 = arith.constant 0 : index
    %c0_28 = arith.constant 0 : index
    %46 = vector.load %arg18[%c0_27, %c0_28] : memref<200x8xf32, #tpu.memory_space<vmem>>, vector<168x8xf32>
    %47 = arith.truncf %46 : vector<168x8xf32> to vector<168x8xbf16>
    %c0_29 = arith.constant 0 : index
    %c0_30 = arith.constant 0 : index
    %c0_31 = arith.constant 0 : index
    %48 = vector.load %arg5[%c0_29, %c0_30, %c0_31] : memref<9x8x16xbf16, #tpu.memory_space<vmem>>, vector<1x8x16xbf16>
    %49 = vector.shape_cast %48 : vector<1x8x16xbf16> to vector<8x16xbf16>
    %cst_32 = arith.constant dense<0.000000e+00> : vector<168x16xf32>
    %50 = tpu.matmul %47, %49, %cst_32 {dimension_numbers = #tpu.dot_dimension_numbers<[1], [0], [0], [1], [0, 0, 1, 1], [], []>} : vector<168x8xbf16>, vector<8x16xbf16>, vector<168x16xf32> -> vector<168x16xf32>
    %51 = arith.addf %45, %50 : vector<168x16xf32>
    %c1 = arith.constant 1 : index
    %c0_33 = arith.constant 0 : index
    %52 = vector.load %arg18[%c1, %c0_33] : memref<200x8xf32, #tpu.memory_space<vmem>>, vector<168x8xf32>
    %53 = arith.truncf %52 : vector<168x8xf32> to vector<168x8xbf16>
    %c1_34 = arith.constant 1 : index
    %c0_35 = arith.constant 0 : index
    %c0_36 = arith.constant 0 : index
    %54 = vector.load %arg5[%c1_34, %c0_35, %c0_36] : memref<9x8x16xbf16, #tpu.memory_space<vmem>>, vector<1x8x16xbf16>
    %55 = vector.shape_cast %54 : vector<1x8x16xbf16> to vector<8x16xbf16>
    %cst_37 = arith.constant dense<0.000000e+00> : vector<168x16xf32>
    %56 = tpu.matmul %53, %55, %cst_37 {dimension_numbers = #tpu.dot_dimension_numbers<[1], [0], [0], [1], [0, 0, 1, 1], [], []>} : vector<168x8xbf16>, vector<8x16xbf16>, vector<168x16xf32> -> vector<168x16xf32>
    %57 = arith.addf %51, %56 : vector<168x16xf32>
    %c2 = arith.constant 2 : index
    %c0_38 = arith.constant 0 : index
    %58 = vector.load %arg18[%c2, %c0_38] : memref<200x8xf32, #tpu.memory_space<vmem>>, vector<168x8xf32>
    %59 = arith.truncf %58 : vector<168x8xf32> to vector<168x8xbf16>
    %c2_39 = arith.constant 2 : index
    %c0_40 = arith.constant 0 : index
    %c0_41 = arith.constant 0 : index
    %60 = vector.load %arg5[%c2_39, %c0_40, %c0_41] : memref<9x8x16xbf16, #tpu.memory_space<vmem>>, vector<1x8x16xbf16>
    %61 = vector.shape_cast %60 : vector<1x8x16xbf16> to vector<8x16xbf16>
    %cst_42 = arith.constant dense<0.000000e+00> : vector<168x16xf32>
    %62 = tpu.matmul %59, %61, %cst_42 {dimension_numbers = #tpu.dot_dimension_numbers<[1], [0], [0], [1], [0, 0, 1, 1], [], []>} : vector<168x8xbf16>, vector<8x16xbf16>, vector<168x16xf32> -> vector<168x16xf32>
    %63 = arith.addf %57, %62 : vector<168x16xf32>
    %c14 = arith.constant 14 : index
    %c0_43 = arith.constant 0 : index
    %64 = vector.load %arg18[%c14, %c0_43] : memref<200x8xf32, #tpu.memory_space<vmem>>, vector<168x8xf32>
    %65 = arith.truncf %64 : vector<168x8xf32> to vector<168x8xbf16>
    %c3 = arith.constant 3 : index
    %c0_44 = arith.constant 0 : index
    %c0_45 = arith.constant 0 : index
    %66 = vector.load %arg5[%c3, %c0_44, %c0_45] : memref<9x8x16xbf16, #tpu.memory_space<vmem>>, vector<1x8x16xbf16>
    %67 = vector.shape_cast %66 : vector<1x8x16xbf16> to vector<8x16xbf16>
    %cst_46 = arith.constant dense<0.000000e+00> : vector<168x16xf32>
    %68 = tpu.matmul %65, %67, %cst_46 {dimension_numbers = #tpu.dot_dimension_numbers<[1], [0], [0], [1], [0, 0, 1, 1], [], []>} : vector<168x8xbf16>, vector<8x16xbf16>, vector<168x16xf32> -> vector<168x16xf32>
    %69 = arith.addf %63, %68 : vector<168x16xf32>
    %c15 = arith.constant 15 : index
    %c0_47 = arith.constant 0 : index
    %70 = vector.load %arg18[%c15, %c0_47] : memref<200x8xf32, #tpu.memory_space<vmem>>, vector<168x8xf32>
    %71 = arith.truncf %70 : vector<168x8xf32> to vector<168x8xbf16>
    %c4 = arith.constant 4 : index
    %c0_48 = arith.constant 0 : index
    %c0_49 = arith.constant 0 : index
    %72 = vector.load %arg5[%c4, %c0_48, %c0_49] : memref<9x8x16xbf16, #tpu.memory_space<vmem>>, vector<1x8x16xbf16>
    %73 = vector.shape_cast %72 : vector<1x8x16xbf16> to vector<8x16xbf16>
    %cst_50 = arith.constant dense<0.000000e+00> : vector<168x16xf32>
    %74 = tpu.matmul %71, %73, %cst_50 {dimension_numbers = #tpu.dot_dimension_numbers<[1], [0], [0], [1], [0, 0, 1, 1], [], []>} : vector<168x8xbf16>, vector<8x16xbf16>, vector<168x16xf32> -> vector<168x16xf32>
    %75 = arith.addf %69, %74 : vector<168x16xf32>
    %c16 = arith.constant 16 : index
    %c0_51 = arith.constant 0 : index
    %76 = vector.load %arg18[%c16, %c0_51] : memref<200x8xf32, #tpu.memory_space<vmem>>, vector<168x8xf32>
    %77 = arith.truncf %76 : vector<168x8xf32> to vector<168x8xbf16>
    %c5 = arith.constant 5 : index
    %c0_52 = arith.constant 0 : index
    %c0_53 = arith.constant 0 : index
    %78 = vector.load %arg5[%c5, %c0_52, %c0_53] : memref<9x8x16xbf16, #tpu.memory_space<vmem>>, vector<1x8x16xbf16>
    %79 = vector.shape_cast %78 : vector<1x8x16xbf16> to vector<8x16xbf16>
    %cst_54 = arith.constant dense<0.000000e+00> : vector<168x16xf32>
    %80 = tpu.matmul %77, %79, %cst_54 {dimension_numbers = #tpu.dot_dimension_numbers<[1], [0], [0], [1], [0, 0, 1, 1], [], []>} : vector<168x8xbf16>, vector<8x16xbf16>, vector<168x16xf32> -> vector<168x16xf32>
    %81 = arith.addf %75, %80 : vector<168x16xf32>
    %c28 = arith.constant 28 : index
    %c0_55 = arith.constant 0 : index
    %82 = vector.load %arg18[%c28, %c0_55] : memref<200x8xf32, #tpu.memory_space<vmem>>, vector<168x8xf32>
    %83 = arith.truncf %82 : vector<168x8xf32> to vector<168x8xbf16>
    %c6 = arith.constant 6 : index
    %c0_56 = arith.constant 0 : index
    %c0_57 = arith.constant 0 : index
    %84 = vector.load %arg5[%c6, %c0_56, %c0_57] : memref<9x8x16xbf16, #tpu.memory_space<vmem>>, vector<1x8x16xbf16>
    %85 = vector.shape_cast %84 : vector<1x8x16xbf16> to vector<8x16xbf16>
    %cst_58 = arith.constant dense<0.000000e+00> : vector<168x16xf32>
    %86 = tpu.matmul %83, %85, %cst_58 {dimension_numbers = #tpu.dot_dimension_numbers<[1], [0], [0], [1], [0, 0, 1, 1], [], []>} : vector<168x8xbf16>, vector<8x16xbf16>, vector<168x16xf32> -> vector<168x16xf32>
    %87 = arith.addf %81, %86 : vector<168x16xf32>
    %c29 = arith.constant 29 : index
    %c0_59 = arith.constant 0 : index
    %88 = vector.load %arg18[%c29, %c0_59] : memref<200x8xf32, #tpu.memory_space<vmem>>, vector<168x8xf32>
    %89 = arith.truncf %88 : vector<168x8xf32> to vector<168x8xbf16>
    %c7 = arith.constant 7 : index
    %c0_60 = arith.constant 0 : index
    %c0_61 = arith.constant 0 : index
    %90 = vector.load %arg5[%c7, %c0_60, %c0_61] : memref<9x8x16xbf16, #tpu.memory_space<vmem>>, vector<1x8x16xbf16>
    %91 = vector.shape_cast %90 : vector<1x8x16xbf16> to vector<8x16xbf16>
    %cst_62 = arith.constant dense<0.000000e+00> : vector<168x16xf32>
    %92 = tpu.matmul %89, %91, %cst_62 {dimension_numbers = #tpu.dot_dimension_numbers<[1], [0], [0], [1], [0, 0, 1, 1], [], []>} : vector<168x8xbf16>, vector<8x16xbf16>, vector<168x16xf32> -> vector<168x16xf32>
    %93 = arith.addf %87, %92 : vector<168x16xf32>
    %c30 = arith.constant 30 : index
    %c0_63 = arith.constant 0 : index
    %94 = vector.load %arg18[%c30, %c0_63] : memref<200x8xf32, #tpu.memory_space<vmem>>, vector<168x8xf32>
    %95 = arith.truncf %94 : vector<168x8xf32> to vector<168x8xbf16>
    %c8 = arith.constant 8 : index
    %c0_64 = arith.constant 0 : index
    %c0_65 = arith.constant 0 : index
    %96 = vector.load %arg5[%c8, %c0_64, %c0_65] : memref<9x8x16xbf16, #tpu.memory_space<vmem>>, vector<1x8x16xbf16>
    %97 = vector.shape_cast %96 : vector<1x8x16xbf16> to vector<8x16xbf16>
    %cst_66 = arith.constant dense<0.000000e+00> : vector<168x16xf32>
    %98 = tpu.matmul %95, %97, %cst_66 {dimension_numbers = #tpu.dot_dimension_numbers<[1], [0], [0], [1], [0, 0, 1, 1], [], []>} : vector<168x8xbf16>, vector<8x16xbf16>, vector<168x16xf32> -> vector<168x16xf32>
    %99 = arith.addf %93, %98 : vector<168x16xf32>
    %c0_67 = arith.constant 0 : index
    %c0_68 = arith.constant 0 : index
    %100 = vector.load %arg6[%c0_67, %c0_68] : memref<1x16xf32, #tpu.memory_space<vmem>>, vector<1x16xf32>
    %101 = vector.broadcast %100 : vector<1x16xf32> to vector<168x16xf32>
    %102 = arith.mulf %99, %101 : vector<168x16xf32>
    %c0_69 = arith.constant 0 : index
    %c0_70 = arith.constant 0 : index
    %103 = vector.load %arg7[%c0_69, %c0_70] : memref<1x16xf32, #tpu.memory_space<vmem>>, vector<1x16xf32>
    %104 = vector.broadcast %103 : vector<1x16xf32> to vector<168x16xf32>
    %105 = arith.addf %102, %104 : vector<168x16xf32>
    %cst_71 = arith.constant 0.000000e+00 : f32
    %106 = vector.broadcast %cst_71 : f32 to vector<168x16xf32>
    %107 = arith.maximumf %105, %106 : vector<168x16xf32>
    %108 = vector.extract_strided_slice %107 {offsets = [0, 0], sizes = [153, 16], strides = [1, 1]} : vector<168x16xf32> to vector<153x16xf32>
    %109 = vector.extract_strided_slice %107 {offsets = [1, 0], sizes = [153, 16], strides = [1, 1]} : vector<168x16xf32> to vector<153x16xf32>
    %110 = arith.maximumf %108, %109 : vector<153x16xf32>
    %111 = vector.extract_strided_slice %107 {offsets = [14, 0], sizes = [153, 16], strides = [1, 1]} : vector<168x16xf32> to vector<153x16xf32>
    %112 = vector.extract_strided_slice %107 {offsets = [15, 0], sizes = [153, 16], strides = [1, 1]} : vector<168x16xf32> to vector<153x16xf32>
    %113 = arith.maximumf %111, %112 : vector<153x16xf32>
    %114 = arith.maximumf %110, %113 : vector<153x16xf32>
    %c0_72 = arith.constant 0 : index
    %c0_73 = arith.constant 0 : index
    %115 = vector.load %arg11[%c0_72, %c0_73] : memref<36x153xf32, #tpu.memory_space<vmem>>, vector<36x153xf32>
    %cst_74 = arith.constant dense<0.000000e+00> : vector<36x16xf32>
    %116 = tpu.matmul %115, %114, %cst_74 {dimension_numbers = #tpu.dot_dimension_numbers<[1], [0], [0], [1], [0, 0, 1, 1], [], []>} : vector<36x153xf32>, vector<153x16xf32>, vector<36x16xf32> -> vector<36x16xf32>
    %cst_75 = arith.constant 0.000000e+00 : f32
    %117 = vector.broadcast %cst_75 : f32 to vector<4x16xf32>
    %c36 = arith.constant 36 : index
    %c0_76 = arith.constant 0 : index
    %118 = vector.load %arg19[%c36, %c0_76] : memref<40x16xf32, #tpu.memory_space<vmem>>, vector<4x16xf32>
    tpu.vector_store %arg19[%c36, %c0_76], %117 {strides = array<i32>} : memref<40x16xf32, #tpu.memory_space<vmem>>, vector<4x16xf32>,
    %c0_77 = arith.constant 0 : index
    %c0_78 = arith.constant 0 : index
    %119 = vector.load %arg19[%c0_77, %c0_78] : memref<40x16xf32, #tpu.memory_space<vmem>>, vector<36x16xf32>
    tpu.vector_store %arg19[%c0_77, %c0_78], %116 {strides = array<i32>} : memref<40x16xf32, #tpu.memory_space<vmem>>, vector<36x16xf32>,
    %cst_79 = arith.constant 0.000000e+00 : f32
    %120 = vector.broadcast %cst_79 : f32 to vector<24x32xf32>
    %c0_80 = arith.constant 0 : index
    %c0_81 = arith.constant 0 : index
    %121 = vector.load %arg19[%c0_80, %c0_81] : memref<40x16xf32, #tpu.memory_space<vmem>>, vector<24x16xf32>
    %122 = arith.truncf %121 : vector<24x16xf32> to vector<24x16xbf16>
    %c0_82 = arith.constant 0 : index
    %c0_83 = arith.constant 0 : index
    %c0_84 = arith.constant 0 : index
    %123 = vector.load %arg8[%c0_82, %c0_83, %c0_84] : memref<9x16x32xbf16, #tpu.memory_space<vmem>>, vector<1x16x32xbf16>
    %124 = vector.shape_cast %123 : vector<1x16x32xbf16> to vector<16x32xbf16>
    %cst_85 = arith.constant dense<0.000000e+00> : vector<24x32xf32>
    %125 = tpu.matmul %122, %124, %cst_85 {dimension_numbers = #tpu.dot_dimension_numbers<[1], [0], [0], [1], [0, 0, 1, 1], [], []>} : vector<24x16xbf16>, vector<16x32xbf16>, vector<24x32xf32> -> vector<24x32xf32>
    %126 = arith.addf %120, %125 : vector<24x32xf32>
    %c1_86 = arith.constant 1 : index
    %c0_87 = arith.constant 0 : index
    %127 = vector.load %arg19[%c1_86, %c0_87] : memref<40x16xf32, #tpu.memory_space<vmem>>, vector<24x16xf32>
    %128 = arith.truncf %127 : vector<24x16xf32> to vector<24x16xbf16>
    %c1_88 = arith.constant 1 : index
    %c0_89 = arith.constant 0 : index
    %c0_90 = arith.constant 0 : index
    %129 = vector.load %arg8[%c1_88, %c0_89, %c0_90] : memref<9x16x32xbf16, #tpu.memory_space<vmem>>, vector<1x16x32xbf16>
    %130 = vector.shape_cast %129 : vector<1x16x32xbf16> to vector<16x32xbf16>
    %cst_91 = arith.constant dense<0.000000e+00> : vector<24x32xf32>
    %131 = tpu.matmul %128, %130, %cst_91 {dimension_numbers = #tpu.dot_dimension_numbers<[1], [0], [0], [1], [0, 0, 1, 1], [], []>} : vector<24x16xbf16>, vector<16x32xbf16>, vector<24x32xf32> -> vector<24x32xf32>
    %132 = arith.addf %126, %131 : vector<24x32xf32>
    %c2_92 = arith.constant 2 : index
    %c0_93 = arith.constant 0 : index
    %133 = vector.load %arg19[%c2_92, %c0_93] : memref<40x16xf32, #tpu.memory_space<vmem>>, vector<24x16xf32>
    %134 = arith.truncf %133 : vector<24x16xf32> to vector<24x16xbf16>
    %c2_94 = arith.constant 2 : index
    %c0_95 = arith.constant 0 : index
    %c0_96 = arith.constant 0 : index
    %135 = vector.load %arg8[%c2_94, %c0_95, %c0_96] : memref<9x16x32xbf16, #tpu.memory_space<vmem>>, vector<1x16x32xbf16>
    %136 = vector.shape_cast %135 : vector<1x16x32xbf16> to vector<16x32xbf16>
    %cst_97 = arith.constant dense<0.000000e+00> : vector<24x32xf32>
    %137 = tpu.matmul %134, %136, %cst_97 {dimension_numbers = #tpu.dot_dimension_numbers<[1], [0], [0], [1], [0, 0, 1, 1], [], []>} : vector<24x16xbf16>, vector<16x32xbf16>, vector<24x32xf32> -> vector<24x32xf32>
    %138 = arith.addf %132, %137 : vector<24x32xf32>
    %c6_98 = arith.constant 6 : index
    %c0_99 = arith.constant 0 : index
    %139 = vector.load %arg19[%c6_98, %c0_99] : memref<40x16xf32, #tpu.memory_space<vmem>>, vector<24x16xf32>
    %140 = arith.truncf %139 : vector<24x16xf32> to vector<24x16xbf16>
    %c3_100 = arith.constant 3 : index
    %c0_101 = arith.constant 0 : index
    %c0_102 = arith.constant 0 : index
    %141 = vector.load %arg8[%c3_100, %c0_101, %c0_102] : memref<9x16x32xbf16, #tpu.memory_space<vmem>>, vector<1x16x32xbf16>
    %142 = vector.shape_cast %141 : vector<1x16x32xbf16> to vector<16x32xbf16>
    %cst_103 = arith.constant dense<0.000000e+00> : vector<24x32xf32>
    %143 = tpu.matmul %140, %142, %cst_103 {dimension_numbers = #tpu.dot_dimension_numbers<[1], [0], [0], [1], [0, 0, 1, 1], [], []>} : vector<24x16xbf16>, vector<16x32xbf16>, vector<24x32xf32> -> vector<24x32xf32>
    %144 = arith.addf %138, %143 : vector<24x32xf32>
    %c7_104 = arith.constant 7 : index
    %c0_105 = arith.constant 0 : index
    %145 = vector.load %arg19[%c7_104, %c0_105] : memref<40x16xf32, #tpu.memory_space<vmem>>, vector<24x16xf32>
    %146 = arith.truncf %145 : vector<24x16xf32> to vector<24x16xbf16>
    %c4_106 = arith.constant 4 : index
    %c0_107 = arith.constant 0 : index
    %c0_108 = arith.constant 0 : index
    %147 = vector.load %arg8[%c4_106, %c0_107, %c0_108] : memref<9x16x32xbf16, #tpu.memory_space<vmem>>, vector<1x16x32xbf16>
    %148 = vector.shape_cast %147 : vector<1x16x32xbf16> to vector<16x32xbf16>
    %cst_109 = arith.constant dense<0.000000e+00> : vector<24x32xf32>
    %149 = tpu.matmul %146, %148, %cst_109 {dimension_numbers = #tpu.dot_dimension_numbers<[1], [0], [0], [1], [0, 0, 1, 1], [], []>} : vector<24x16xbf16>, vector<16x32xbf16>, vector<24x32xf32> -> vector<24x32xf32>
    %150 = arith.addf %144, %149 : vector<24x32xf32>
    %c8_110 = arith.constant 8 : index
    %c0_111 = arith.constant 0 : index
    %151 = vector.load %arg19[%c8_110, %c0_111] : memref<40x16xf32, #tpu.memory_space<vmem>>, vector<24x16xf32>
    %152 = arith.truncf %151 : vector<24x16xf32> to vector<24x16xbf16>
    %c5_112 = arith.constant 5 : index
    %c0_113 = arith.constant 0 : index
    %c0_114 = arith.constant 0 : index
    %153 = vector.load %arg8[%c5_112, %c0_113, %c0_114] : memref<9x16x32xbf16, #tpu.memory_space<vmem>>, vector<1x16x32xbf16>
    %154 = vector.shape_cast %153 : vector<1x16x32xbf16> to vector<16x32xbf16>
    %cst_115 = arith.constant dense<0.000000e+00> : vector<24x32xf32>
    %155 = tpu.matmul %152, %154, %cst_115 {dimension_numbers = #tpu.dot_dimension_numbers<[1], [0], [0], [1], [0, 0, 1, 1], [], []>} : vector<24x16xbf16>, vector<16x32xbf16>, vector<24x32xf32> -> vector<24x32xf32>
    %156 = arith.addf %150, %155 : vector<24x32xf32>
    %c12 = arith.constant 12 : index
    %c0_116 = arith.constant 0 : index
    %157 = vector.load %arg19[%c12, %c0_116] : memref<40x16xf32, #tpu.memory_space<vmem>>, vector<24x16xf32>
    %158 = arith.truncf %157 : vector<24x16xf32> to vector<24x16xbf16>
    %c6_117 = arith.constant 6 : index
    %c0_118 = arith.constant 0 : index
    %c0_119 = arith.constant 0 : index
    %159 = vector.load %arg8[%c6_117, %c0_118, %c0_119] : memref<9x16x32xbf16, #tpu.memory_space<vmem>>, vector<1x16x32xbf16>
    %160 = vector.shape_cast %159 : vector<1x16x32xbf16> to vector<16x32xbf16>
    %cst_120 = arith.constant dense<0.000000e+00> : vector<24x32xf32>
    %161 = tpu.matmul %158, %160, %cst_120 {dimension_numbers = #tpu.dot_dimension_numbers<[1], [0], [0], [1], [0, 0, 1, 1], [], []>} : vector<24x16xbf16>, vector<16x32xbf16>, vector<24x32xf32> -> vector<24x32xf32>
    %162 = arith.addf %156, %161 : vector<24x32xf32>
    %c13 = arith.constant 13 : index
    %c0_121 = arith.constant 0 : index
    %163 = vector.load %arg19[%c13, %c0_121] : memref<40x16xf32, #tpu.memory_space<vmem>>, vector<24x16xf32>
    %164 = arith.truncf %163 : vector<24x16xf32> to vector<24x16xbf16>
    %c7_122 = arith.constant 7 : index
    %c0_123 = arith.constant 0 : index
    %c0_124 = arith.constant 0 : index
    %165 = vector.load %arg8[%c7_122, %c0_123, %c0_124] : memref<9x16x32xbf16, #tpu.memory_space<vmem>>, vector<1x16x32xbf16>
    %166 = vector.shape_cast %165 : vector<1x16x32xbf16> to vector<16x32xbf16>
    %cst_125 = arith.constant dense<0.000000e+00> : vector<24x32xf32>
    %167 = tpu.matmul %164, %166, %cst_125 {dimension_numbers = #tpu.dot_dimension_numbers<[1], [0], [0], [1], [0, 0, 1, 1], [], []>} : vector<24x16xbf16>, vector<16x32xbf16>, vector<24x32xf32> -> vector<24x32xf32>
    %168 = arith.addf %162, %167 : vector<24x32xf32>
    %c14_126 = arith.constant 14 : index
    %c0_127 = arith.constant 0 : index
    %169 = vector.load %arg19[%c14_126, %c0_127] : memref<40x16xf32, #tpu.memory_space<vmem>>, vector<24x16xf32>
    %170 = arith.truncf %169 : vector<24x16xf32> to vector<24x16xbf16>
    %c8_128 = arith.constant 8 : index
    %c0_129 = arith.constant 0 : index
    %c0_130 = arith.constant 0 : index
    %171 = vector.load %arg8[%c8_128, %c0_129, %c0_130] : memref<9x16x32xbf16, #tpu.memory_space<vmem>>, vector<1x16x32xbf16>
    %172 = vector.shape_cast %171 : vector<1x16x32xbf16> to vector<16x32xbf16>
    %cst_131 = arith.constant dense<0.000000e+00> : vector<24x32xf32>
    %173 = tpu.matmul %170, %172, %cst_131 {dimension_numbers = #tpu.dot_dimension_numbers<[1], [0], [0], [1], [0, 0, 1, 1], [], []>} : vector<24x16xbf16>, vector<16x32xbf16>, vector<24x32xf32> -> vector<24x32xf32>
    %174 = arith.addf %168, %173 : vector<24x32xf32>
    %c0_132 = arith.constant 0 : index
    %c0_133 = arith.constant 0 : index
    %175 = vector.load %arg9[%c0_132, %c0_133] : memref<1x32xf32, #tpu.memory_space<vmem>>, vector<1x32xf32>
    %176 = vector.broadcast %175 : vector<1x32xf32> to vector<24x32xf32>
    %177 = arith.mulf %174, %176 : vector<24x32xf32>
    %c0_134 = arith.constant 0 : index
    %c0_135 = arith.constant 0 : index
    %178 = vector.load %arg10[%c0_134, %c0_135] : memref<1x32xf32, #tpu.memory_space<vmem>>, vector<1x32xf32>
    %179 = vector.broadcast %178 : vector<1x32xf32> to vector<24x32xf32>
    %180 = arith.addf %177, %179 : vector<24x32xf32>
    %cst_136 = arith.constant 0.000000e+00 : f32
    %181 = vector.broadcast %cst_136 : f32 to vector<24x32xf32>
    %182 = arith.maximumf %180, %181 : vector<24x32xf32>
    %183 = vector.extract_strided_slice %182 {offsets = [0, 0], sizes = [17, 32], strides = [1, 1]} : vector<24x32xf32> to vector<17x32xf32>
    %184 = vector.extract_strided_slice %182 {offsets = [1, 0], sizes = [17, 32], strides = [1, 1]} : vector<24x32xf32> to vector<17x32xf32>
    %185 = arith.maximumf %183, %184 : vector<17x32xf32>
    %186 = vector.extract_strided_slice %182 {offsets = [6, 0], sizes = [17, 32], strides = [1, 1]} : vector<24x32xf32> to vector<17x32xf32>
    %187 = vector.extract_strided_slice %182 {offsets = [7, 0], sizes = [17, 32], strides = [1, 1]} : vector<24x32xf32> to vector<17x32xf32>
    %188 = arith.maximumf %186, %187 : vector<17x32xf32>
    %189 = arith.maximumf %185, %188 : vector<17x32xf32>
    %c0_137 = arith.constant 0 : index
    %c0_138 = arith.constant 0 : index
    %190 = vector.load %arg12[%c0_137, %c0_138] : memref<4x17xf32, #tpu.memory_space<vmem>>, vector<4x17xf32>
    %cst_139 = arith.constant dense<0.000000e+00> : vector<4x32xf32>
    %191 = tpu.matmul %190, %189, %cst_139 {dimension_numbers = #tpu.dot_dimension_numbers<[1], [0], [0], [1], [0, 0, 1, 1], [], []>} : vector<4x17xf32>, vector<17x32xf32>, vector<4x32xf32> -> vector<4x32xf32>
    %c0_140 = arith.constant 0 : index
    %c0_141 = arith.constant 0 : index
    %192 = vector.load %arg14[%c0_140, %c0_141] : memref<1x96xf32, #tpu.memory_space<vmem>>, vector<1x96xf32>
    %193 = vector.extract_strided_slice %191 {offsets = [0, 0], sizes = [1, 32], strides = [1, 1]} : vector<4x32xf32> to vector<1x32xf32>
    %194 = arith.truncf %193 : vector<1x32xf32> to vector<1x32xbf16>
    %c0_142 = arith.constant 0 : index
    %c0_143 = arith.constant 0 : index
    %c0_144 = arith.constant 0 : index
    %195 = vector.load %arg13[%c0_142, %c0_143, %c0_144] : memref<4x32x96xbf16, #tpu.memory_space<vmem>>, vector<1x32x96xbf16>
    %196 = vector.shape_cast %195 : vector<1x32x96xbf16> to vector<32x96xbf16>
    %cst_145 = arith.constant dense<0.000000e+00> : vector<1x96xf32>
    %197 = tpu.matmul %194, %196, %cst_145 {dimension_numbers = #tpu.dot_dimension_numbers<[1], [0], [0], [1], [0, 0, 1, 1], [], []>} : vector<1x32xbf16>, vector<32x96xbf16>, vector<1x96xf32> -> vector<1x96xf32>
    %198 = arith.addf %192, %197 : vector<1x96xf32>
    %199 = vector.extract_strided_slice %191 {offsets = [1, 0], sizes = [1, 32], strides = [1, 1]} : vector<4x32xf32> to vector<1x32xf32>
    %200 = arith.truncf %199 : vector<1x32xf32> to vector<1x32xbf16>
    %c1_146 = arith.constant 1 : index
    %c0_147 = arith.constant 0 : index
    %c0_148 = arith.constant 0 : index
    %201 = vector.load %arg13[%c1_146, %c0_147, %c0_148] : memref<4x32x96xbf16, #tpu.memory_space<vmem>>, vector<1x32x96xbf16>
    %202 = vector.shape_cast %201 : vector<1x32x96xbf16> to vector<32x96xbf16>
    %cst_149 = arith.constant dense<0.000000e+00> : vector<1x96xf32>
    %203 = tpu.matmul %200, %202, %cst_149 {dimension_numbers = #tpu.dot_dimension_numbers<[1], [0], [0], [1], [0, 0, 1, 1], [], []>} : vector<1x32xbf16>, vector<32x96xbf16>, vector<1x96xf32> -> vector<1x96xf32>
    %204 = arith.addf %198, %203 : vector<1x96xf32>
    %205 = vector.extract_strided_slice %191 {offsets = [2, 0], sizes = [1, 32], strides = [1, 1]} : vector<4x32xf32> to vector<1x32xf32>
    %206 = arith.truncf %205 : vector<1x32xf32> to vector<1x32xbf16>
    %c2_150 = arith.constant 2 : index
    %c0_151 = arith.constant 0 : index
    %c0_152 = arith.constant 0 : index
    %207 = vector.load %arg13[%c2_150, %c0_151, %c0_152] : memref<4x32x96xbf16, #tpu.memory_space<vmem>>, vector<1x32x96xbf16>
    %208 = vector.shape_cast %207 : vector<1x32x96xbf16> to vector<32x96xbf16>
    %cst_153 = arith.constant dense<0.000000e+00> : vector<1x96xf32>
    %209 = tpu.matmul %206, %208, %cst_153 {dimension_numbers = #tpu.dot_dimension_numbers<[1], [0], [0], [1], [0, 0, 1, 1], [], []>} : vector<1x32xbf16>, vector<32x96xbf16>, vector<1x96xf32> -> vector<1x96xf32>
    %210 = arith.addf %204, %209 : vector<1x96xf32>
    %211 = vector.extract_strided_slice %191 {offsets = [3, 0], sizes = [1, 32], strides = [1, 1]} : vector<4x32xf32> to vector<1x32xf32>
    %212 = arith.truncf %211 : vector<1x32xf32> to vector<1x32xbf16>
    %c3_154 = arith.constant 3 : index
    %c0_155 = arith.constant 0 : index
    %c0_156 = arith.constant 0 : index
    %213 = vector.load %arg13[%c3_154, %c0_155, %c0_156] : memref<4x32x96xbf16, #tpu.memory_space<vmem>>, vector<1x32x96xbf16>
    %214 = vector.shape_cast %213 : vector<1x32x96xbf16> to vector<32x96xbf16>
    %cst_157 = arith.constant dense<0.000000e+00> : vector<1x96xf32>
    %215 = tpu.matmul %212, %214, %cst_157 {dimension_numbers = #tpu.dot_dimension_numbers<[1], [0], [0], [1], [0, 0, 1, 1], [], []>} : vector<1x32xbf16>, vector<32x96xbf16>, vector<1x96xf32> -> vector<1x96xf32>
    %216 = arith.addf %210, %215 : vector<1x96xf32>
    %217 = arith.truncf %216 : vector<1x96xf32> to vector<1x96xbf16>
    %c0_158 = arith.constant 0 : index
    %c0_159 = arith.constant 0 : index
    %218 = vector.load %arg15[%c0_158, %c0_159] : memref<96x1xbf16, #tpu.memory_space<vmem>>, vector<96x1xbf16>
    %cst_160 = arith.constant dense<0.000000e+00> : vector<1x1xf32>
    %219 = tpu.matmul %217, %218, %cst_160 {dimension_numbers = #tpu.dot_dimension_numbers<[1], [0], [0], [1], [0, 0, 1, 1], [], []>} : vector<1x96xbf16>, vector<96x1xbf16>, vector<1x1xf32> -> vector<1x1xf32>
    %c0_161 = arith.constant 0 : index
    %c0_162 = arith.constant 0 : index
    %220 = vector.load %arg16[%c0_161, %c0_162] : memref<1x1xf32, #tpu.memory_space<vmem>>, vector<1x1xf32>
    %221 = arith.addf %219, %220 : vector<1x1xf32>
    %cst_163 = arith.constant 0.000000e+00 : f32
    %222 = vector.broadcast %cst_163 : f32 to vector<1x1xf32>
    %223 = arith.subf %222, %221 : vector<1x1xf32>
    %224 = math.exp %223 : vector<1x1xf32>
    %cst_164 = arith.constant 1.000000e+00 : f32
    %225 = vector.broadcast %cst_164 : f32 to vector<1x1xf32>
    %226 = arith.addf %225, %224 : vector<1x1xf32>
    %cst_165 = arith.constant 1.000000e+00 : f32
    %227 = vector.broadcast %cst_165 : f32 to vector<1x1xf32>
    %228 = arith.divf %227, %226 : vector<1x1xf32>
    %c0_166 = arith.constant 0 : index
    %c0_167 = arith.constant 0 : index
    %c0_168 = arith.constant 0 : index
    %229 = vector.load %arg17[%c0_166, %c0_167, %c0_168] : memref<1x1x1xf32, #tpu.memory_space<vmem>>, vector<1x1x1xf32>
    %230 = vector.shape_cast %229 : vector<1x1x1xf32> to vector<1x1xf32>
    %231 = vector.shape_cast %228 : vector<1x1xf32> to vector<1x1x1xf32>
    tpu.vector_store %arg17[%c0_166, %c0_167, %c0_168], %231 {strides = array<i32>} : memref<1x1x1xf32, #tpu.memory_space<vmem>>, vector<1x1x1xf32>,
    return
  }
  func.func @transform_0(%arg0: i32) -> (i32, i32, i32) {
    %c0_i32 = arith.constant 0 : i32
    %c0_i32_0 = arith.constant 0 : i32
    %c0_i32_1 = arith.constant 0 : i32
    return %arg0, %c0_i32, %c0_i32_0 : i32, i32, i32
  }
  func.func @transform_1(%arg0: i32) -> (i32, i32) {
    %c0_i32 = arith.constant 0 : i32
    %c0_i32_0 = arith.constant 0 : i32
    %c0_i32_1 = arith.constant 0 : i32
    return %c0_i32, %c0_i32_0 : i32, i32
  }
  func.func @transform_2(%arg0: i32) -> (i32, i32) {
    %c0_i32 = arith.constant 0 : i32
    %c0_i32_0 = arith.constant 0 : i32
    %c0_i32_1 = arith.constant 0 : i32
    return %c0_i32, %c0_i32_0 : i32, i32
  }
  func.func @transform_3(%arg0: i32) -> (i32, i32) {
    %c0_i32 = arith.constant 0 : i32
    %c0_i32_0 = arith.constant 0 : i32
    %c0_i32_1 = arith.constant 0 : i32
    return %c0_i32, %c0_i32_0 : i32, i32
  }
  func.func @transform_4(%arg0: i32) -> (i32, i32, i32) {
    %c0_i32 = arith.constant 0 : i32
    %c0_i32_0 = arith.constant 0 : i32
    %c0_i32_1 = arith.constant 0 : i32
    %c0_i32_2 = arith.constant 0 : i32
    return %c0_i32, %c0_i32_0, %c0_i32_1 : i32, i32, i32
  }
  func.func @transform_5(%arg0: i32) -> (i32, i32) {
    %c0_i32 = arith.constant 0 : i32
    %c0_i32_0 = arith.constant 0 : i32
    %c0_i32_1 = arith.constant 0 : i32
    return %c0_i32, %c0_i32_0 : i32, i32
  }
  func.func @transform_6(%arg0: i32) -> (i32, i32) {
    %c0_i32 = arith.constant 0 : i32
    %c0_i32_0 = arith.constant 0 : i32
    %c0_i32_1 = arith.constant 0 : i32
    return %c0_i32, %c0_i32_0 : i32, i32
  }
  func.func @transform_7(%arg0: i32) -> (i32, i32, i32) {
    %c0_i32 = arith.constant 0 : i32
    %c0_i32_0 = arith.constant 0 : i32
    %c0_i32_1 = arith.constant 0 : i32
    %c0_i32_2 = arith.constant 0 : i32
    return %c0_i32, %c0_i32_0, %c0_i32_1 : i32, i32, i32
  }
  func.func @transform_8(%arg0: i32) -> (i32, i32) {
    %c0_i32 = arith.constant 0 : i32
    %c0_i32_0 = arith.constant 0 : i32
    %c0_i32_1 = arith.constant 0 : i32
    return %c0_i32, %c0_i32_0 : i32, i32
  }
  func.func @transform_9(%arg0: i32) -> (i32, i32) {
    %c0_i32 = arith.constant 0 : i32
    %c0_i32_0 = arith.constant 0 : i32
    %c0_i32_1 = arith.constant 0 : i32
    return %c0_i32, %c0_i32_0 : i32, i32
  }
  func.func @transform_10(%arg0: i32) -> (i32, i32) {
    %c0_i32 = arith.constant 0 : i32
    %c0_i32_0 = arith.constant 0 : i32
    %c0_i32_1 = arith.constant 0 : i32
    return %c0_i32, %c0_i32_0 : i32, i32
  }
  func.func @transform_11(%arg0: i32) -> (i32, i32) {
    %c0_i32 = arith.constant 0 : i32
    %c0_i32_0 = arith.constant 0 : i32
    %c0_i32_1 = arith.constant 0 : i32
    return %c0_i32, %c0_i32_0 : i32, i32
  }
  func.func @transform_12(%arg0: i32) -> (i32, i32, i32) {
    %c0_i32 = arith.constant 0 : i32
    %c0_i32_0 = arith.constant 0 : i32
    %c0_i32_1 = arith.constant 0 : i32
    %c0_i32_2 = arith.constant 0 : i32
    return %c0_i32, %c0_i32_0, %c0_i32_1 : i32, i32, i32
  }
  func.func @transform_13(%arg0: i32) -> (i32, i32) {
    %c0_i32 = arith.constant 0 : i32
    %c0_i32_0 = arith.constant 0 : i32
    %c0_i32_1 = arith.constant 0 : i32
    return %c0_i32, %c0_i32_0 : i32, i32
  }
  func.func @transform_14(%arg0: i32) -> (i32, i32) {
    %c0_i32 = arith.constant 0 : i32
    %c0_i32_0 = arith.constant 0 : i32
    %c0_i32_1 = arith.constant 0 : i32
    return %c0_i32, %c0_i32_0 : i32, i32
  }
  func.func @transform_15(%arg0: i32) -> (i32, i32) {
    %c0_i32 = arith.constant 0 : i32
    %c0_i32_0 = arith.constant 0 : i32
    %c0_i32_1 = arith.constant 0 : i32
    return %c0_i32, %c0_i32_0 : i32, i32
  }
  func.func @transform_16(%arg0: i32) -> (i32, i32, i32) {
    %c0_i32 = arith.constant 0 : i32
    %c0_i32_0 = arith.constant 0 : i32
    %c0_i32_1 = arith.constant 0 : i32
    return %arg0, %c0_i32, %c0_i32_0 : i32, i32, i32
  }
}

</mosaic_0001>

<bundles_post_ra>
// kernel: forward.1
= control target key start
LH: loop header
LB: loop body
LE: loop exit
PB: predicated region body
PF: predicated region fallthrough
CT: control target
= control target key end

     0   :  { %s7374_s23 = smov 0   ;;  %s8923_s0 = inlined_call_operand.vmem [shape: bf16[2,784,25], index: 0, kind: input, shape index: {}]   ;;  %s8924_s1 = inlined_call_operand.vmem [shape: bf16[25,8], index: 1, kind: input, shape index: {}]   ;;  %s8925_s2 = inlined_call_operand.vmem [shape: f32[1,8], index: 2, kind: input, shape index: {}]   ;;  %s8926_s3 = inlined_call_operand.vmem [shape: f32[1,8], index: 3, kind: input, shape index: {}]   ;;  %s8927_s4 = inlined_call_operand.vmem [shape: bf16[9,8,16], index: 4, kind: input, shape index: {}]   ;;  %s8928_s5 = inlined_call_operand.vmem [shape: f32[1,16], index: 5, kind: input, shape index: {}]   ;;  %s8929_s6 = inlined_call_operand.vmem [shape: f32[1,16], index: 6, kind: input, shape index: {}]   ;;  %s8930_s7 = inlined_call_operand.vmem [shape: bf16[9,16,32], index: 7, kind: input, shape index: {}]   ;;  %s8931_s8 = inlined_call_operand.vmem [shape: f32[1,32], index: 8, kind: input, shape index: {}]   ;;  %s8932_s9 = inlined_call_operand.vmem [shape: f32[1,32], index: 9, kind: input, shape index: {}]   ;;  %s8933_s10 = inlined_call_operand.vmem [shape: f32[36,153], index: 10, kind: input, shape index: {}]   ;;  %s8934_s11 = inlined_call_operand.vmem [shape: f32[4,17], index: 11, kind: input, shape index: {}]   ;;  %s8935_s12 = inlined_call_operand.vmem [shape: bf16[4,32,96], index: 12, kind: input, shape index: {}]   ;;  %s8936_s13 = inlined_call_operand.vmem [shape: f32[1,96], index: 13, kind: input, shape index: {}]   ;;  %s8937_s14 = inlined_call_operand.vmem [shape: bf16[96,1], index: 14, kind: input, shape index: {}]   ;;  %s8938_s15 = inlined_call_operand.<no memory space> [shape: f32[1,1], index: 15, kind: input, shape index: {}]   ;;  %s8939_s16 = inlined_call_operand.vmem [shape: f32[2,1,1], index: 16, kind: output, shape index: {}]  }
   0x1   :  { %8940 = sst [smem:[#allocation5_spill]] %s8923_s0  ;;  %v21_v0 = vstv %s8938_s15 }
   0x2   :  { %22 = vst [vmem:[#allocation4] sm:$0x1] %v21_v0 }
   0x3 LB: > { %s5492_s24 = sadd.s32 4294967295, %s7279_s23   ;;  %p5496_p0 = scmp.ge.s32.totalorder %s7279_s23, 1  ;;  %s7279_s23 = sphi %s7374_s23, %s28_s23  }
   0x4   : > { %p464_p1 = scmp.lt.s32.totalorder %s7279_s23, 3 }
   0x6   : > { %p465_p2 = pnand %p5496_p0, %p464_p1 }
   0x7   : > { %v7385_v1 = vld [vmem:[%s8924_s1] sm:$0xff] (!%p465_p2)   ;;  %v7281_v2 = vmov (!%p465_p2), 0.0   ;;  %v7191_v3 = vld [vmem:[%s8924_s1 + $0x8] sm:$0x1f] (!%p465_p2)   ;;  %vm666_vm0 = vcmask (!%p465_p2), 1043456   ;;  %vm667_vm1 = vcmask (!%p465_p2), 1044480  }
   0x8   : > { %468 = sbr.rel (%p465_p2) target bundleno = 2776 (0xad8), region = 84  ;;  %6019 = vmatprep.subr.bf16.mxu1 (!%p465_p2), %v7281_v2  ;;  %6289 = vmatprep.subr.bf16.mxu0 (!%p465_p2), %v7281_v2  ;;  %p512_p3 = scmp.lt.s32.totalorder (!%p465_p2), %s5492_s24, 1  ;;  %v7282_v4 = vmov (!%p465_p2), 65535   ;;  %vm7283_vm2 = vmmov (!%p465_p2), 0   ;;  %vm626_vm3 = vcmask (!%p465_p2), 203776   ;;  %vm984_vm4 = vcmask (!%p465_p2), 1045504  }
   0x9   : > { %6020 = vmatpush3.bf16.msra.mxu1 (!%p465_p2), %v7385_v1  ;;  %v668_v5 = vsel (!%p465_p2), %vm666_vm0, 4294967295, %v7282_v4  ;;  %6023 = vmatprep.mubr.msk.bf16.mxu1 (!%p465_p2), %vm7283_vm2, %v7281_v2  ;;  %s8941_s0 = sld [smem:[#allocation5_spill]] (!%p465_p2)  ;;  %vm2036_vm5 = vcmask (!%p465_p2), 60416   ;;  %vm2038_vm6 = vcmask (!%p465_p2), 64512   ;;  %vm4017_vm7 = vcmask (!%p465_p2), 1046528  }
   0xa   : > { %6021 = vmatprep.subr.bf16.mxu1 (!%p465_p2), %v7281_v2  ;;  %v669_v6 = vsel (!%p465_p2), %vm667_vm1, %v668_v5, 0  ;;  %6291 = vmatprep.mubr.msk.bf16.mxu0 (!%p465_p2), %vm7283_vm2, %v7281_v2  ;;  %2037 = vst.msk [vmem:[#allocation2 + $0xc4] sm:$0xf] (!%p465_p2), %vm2036_vm5, %v7281_v2  ;;  %vm4124_vm8 = vcmask (!%p465_p2), 1041408   ;;  %vm4229_vm9 = vcmask (!%p465_p2), 1040384   ;;  %vm7285_vm10 = vmmov (!%p465_p2), 1  }
   0xb   : > { %v7401_v7 = vand.u32 (!%p465_p2), %v7191_v3, %v669_v6  ;;  %vm6797_vm11 = vmpackc.low (!%p465_p2), %vm4229_vm9, %vm7285_vm10  ;;  %vm4323_vm12 = vcmask (!%p465_p2), 125952   ;;  %vm4325_vm13 = vcmask (!%p465_p2), 130048   ;;  %vm5015_vm14 = vcmask (!%p465_p2), 138240  }
   0xc   : > { %4324 = vst.msk [vmem:[#allocation3 + $0x24] sm:$0xf] (!%p465_p2), %vm4323_vm12, %v7281_v2  ;;  %vm5110_vm15 = vcmask (!%p465_p2), 261120   ;;  %vm5443_vm1 = vcmask (!%p465_p2), 0  }
   0xd   : > { %6022 = vmatpush3.bf16.msra.mxu1 (!%p465_p2), %v7401_v7 }
   0xe   : > { %6075 = vmatprep.subr.bf16.mxu1 (!%p465_p2), %v7281_v2 }
   0xf   : > { %s8943_s24 = smov (!%p512_p3, %s5492_s24), 1 }
  0x10   : > { %s7176_s28 = smul.u32 392, %s8943_s24  ;;  %s519_s27 = scalar_lea.vmem %s8939_s16, %s8943_s24 }
  0x12   : > { %s7408_s17 = scalar_lea.vmem %s8941_s0, %s7176_s28 }
  0x13   : > { %v7192_v8 = vld [vmem:[%s7408_s17] sm:$0xff]   ;;  %v7193_v9 = vld [vmem:[%s7408_s17 + $0x8] sm:$0xff]   ;;  %v7194_v10 = vld [vmem:[%s7408_s17 + $0x10] sm:$0xff]  }
  0x14   : > { %6024 = vmatmul.mubr.msk.bf16.vlgmr.msra.gmra.mrb[0].mxu1 %vm626_vm3, %v7192_v8  ;;  %v7195_v11 = vld [vmem:[%s7408_s17 + $0x18] sm:$0xff]   ;;  %v7196_v12 = vld [vmem:[%s7408_s17 + $0x20] sm:$0xff]   ;;  %v7197_v13 = vld [vmem:[%s7408_s17 + $0x28] sm:$0xff]  }
  0x15   : > { %6027 = vmatprep.mubr.msk.bf16.mxu1 %vm7283_vm2, %v7281_v2  ;;  %6076 = vmatpush3.bf16.msra.mxu1 %v7385_v1  ;;  %v7198_v14 = vld [vmem:[%s7408_s17 + $0x30] sm:$0xff]   ;;  %v7199_v15 = vld [vmem:[%s7408_s17 + $0x38] sm:$0xff]   ;;  %v7200_v16 = vld [vmem:[%s7408_s17 + $0x40] sm:$0xff]  }
  0x16   : > { %6077 = vmatprep.subr.bf16.mxu1 %v7281_v2  ;;  %v7201_v17 = vld [vmem:[%s7408_s17 + $0x48] sm:$0xff]   ;;  %v7202_v18 = vld [vmem:[%s7408_s17 + $0x50] sm:$0xff]   ;;  %v7203_v19 = vld [vmem:[%s7408_s17 + $0x58] sm:$0xff]  }
  0x17   : > { %v7204_v20 = vld [vmem:[%s7408_s17 + $0x60] ss:$0 sps:$4 sm:$0x33]   ;;  %v7205_v21 = vld [vmem:[%s7408_s17 + $0x60] sm:$0xfc]   ;;  %v7206_v22 = vld [vmem:[%s7408_s17 + $0x68] sm:$0xff]  }
  0x18   : > { %v985_v23 = vrot.slane %v7205_v21, 2  ;;  %v986_v24 = vrot.slane %v7206_v22, 2  ;;  %v7207_v26 = vld [vmem:[%s7408_s17 + $0x70] sm:$0xff]   ;;  %v7208_v29 = vld [vmem:[%s7408_s17 + $0x78] sm:$0xff]   ;;  %v7209_v32 = vld [vmem:[%s7408_s17 + $0x80] sm:$0xff]  }
  0x19   : > { %6078 = vmatpush3.bf16.msra.mxu1 %v7401_v7  ;;  %v988_v27 = vrot.slane %v7207_v26, 2  ;;  %v990_v30 = vrot.slane %v7208_v29, 2  ;;  %v992_v33 = vrot.slane %v7209_v32, 2  ;;  %v7210_v35 = vld [vmem:[%s7408_s17 + $0x88] sm:$0xff]   ;;  %v7211_v38 = vld [vmem:[%s7408_s17 + $0x90] sm:$0xff]   ;;  %v7212_v41 = vld [vmem:[%s7408_s17 + $0x98] sm:$0xff]  }
  0x1a   : > { %6131 = vmatprep.subr.bf16.mxu1 %v7281_v2  ;;  %v987_v25 = vsel %vm984_vm4, %v985_v23, %v986_v24  ;;  %v994_v36 = vrot.slane %v7210_v35, 2  ;;  %v996_v39 = vrot.slane %v7211_v38, 2  ;;  %v998_v42 = vrot.slane %v7212_v41, 2  ;;  %v7213_v44 = vld [vmem:[%s7408_s17 + $0xa0] sm:$0xff]   ;;  %v7214_v47 = vld [vmem:[%s7408_s17 + $0xa8] sm:$0xff]   ;;  %v7215_v50 = vld [vmem:[%s7408_s17 + $0xb0] sm:$0xff]  }
  0x1b   : > { %v989_v28 = vsel %vm984_vm4, %v986_v24, %v988_v27  ;;  %v991_v31 = vsel %vm984_vm4, %v988_v27, %v990_v30  ;;  %v993_v34 = vsel %vm984_vm4, %v990_v30, %v992_v33  ;;  %v1000_v45 = vrot.slane %v7213_v44, 2  ;;  %v7216_v53 = vld [vmem:[%s7408_s17 + $0xb8] sm:$0xff]   ;;  %v7217_v56 = vld [vmem:[%s7408_s17 + $0xc0] ss:$0 sps:$4 sm:$0xff]   ;;  %v7218_v59 = vld [vmem:[%s7408_s17 + $0xc4] sm:$0xff]  }
  0x1c   : > { %6028 = vmatmul.mubr.msk.bf16.gmra.mrb[4].mxu1 %vm626_vm3, %v7193_v9  ;;  %v995_v37 = vsel %vm984_vm4, %v992_v33, %v994_v36  ;;  %v997_v40 = vsel %vm984_vm4, %v994_v36, %v996_v39  ;;  %v999_v43 = vsel %vm984_vm4, %v996_v39, %v998_v42  ;;  %v1002_v48 = vrot.slane %v7214_v47, 2  ;;  %v7219_v62 = vld [vmem:[%s7408_s17 + $0xcc] sm:$0xff]   ;;  %v7220_v4 = vld [vmem:[%s7408_s17 + $0xd4] sm:$0xff]   ;;  %v7221_v9 = vld [vmem:[%s7408_s17 + $0xdc] sm:$0xff]  }
  0x1d   : > { %6031 = vmatprep.mubr.msk.bf16.mxu1 %vm7283_vm2, %v7281_v2  ;;  %v1001_v46 = vsel %vm984_vm4, %v998_v42, %v1000_v45  ;;  %v1004_v51 = vrot.slane %v7215_v50, 2  ;;  %v1006_v54 = vrot.slane %v7216_v53, 2  ;;  %v1008_v57 = vrot.slane %v7217_v56, 2  ;;  %v7224_v24 = vld [vmem:[%s7408_s17 + $0xf4] sm:$0xff]   ;;  %v7225_v29 = vld [vmem:[%s7408_s17 + $0xfc] sm:$0xff]   ;;  %v7227_v39 = vld [vmem:[%s7408_s17 + $0x10c] sm:$0xff]  }
  0x1e   : > { %v1003_v49 = vsel %vm984_vm4, %v1000_v45, %v1002_v48  ;;  %v7228_v44 = vld [vmem:[%s7408_s17 + $0x114] sm:$0xff]   ;;  %v7231_v56 = vld [vmem:[%s7408_s17 + $0x124] sm:$0xfc]  }
  0x1f   : > { %v1005_v52 = vsel %vm984_vm4, %v1002_v48, %v1004_v51  ;;  %v1007_v55 = vsel %vm984_vm4, %v1004_v51, %v1006_v54  ;;  %v1009_v58 = vsel %vm984_vm4, %v1006_v54, %v1008_v57  ;;  %v7230_v54 = vld [vmem:[%s7408_s17 + $0x124] ss:$0 sps:$4 sm:$0x33]  }
  0x24   : > { %6032 = vmatmul.mubr.msk.bf16.gmra.mrb[8].mxu1 %vm626_vm3, %v7194_v10 }
  0x25   : > { %6035 = vmatprep.mubr.msk.bf16.mxu1 %vm7283_vm2, %v7281_v2 }
  0x2c   : > { %6036 = vmatmul.mubr.msk.bf16.gmra.mrb[12].mxu1 %vm626_vm3, %v7195_v11 }
  0x2d   : > { %6039 = vmatprep.mubr.msk.bf16.mxu1 %vm7283_vm2, %v7281_v2 }
  0x34   : > { %6040 = vmatmul.mubr.msk.bf16.gmra.mrb[16].mxu1 %vm626_vm3, %v7196_v12 }
  0x35   : > { %6043 = vmatprep.mubr.msk.bf16.mxu1 %vm7283_vm2, %v7281_v2 }
  0x3c   : > { %6044 = vmatmul.mubr.msk.bf16.gmra.mrb[20].mxu1 %vm626_vm3, %v7197_v13 }
  0x3d   : > { %6047 = vmatprep.mubr.msk.bf16.mxu1 %vm7283_vm2, %v7281_v2 }
  0x44   : > { %6048 = vmatmul.mubr.msk.bf16.gmra.mrb[24].mxu1 %vm626_vm3, %v7198_v14  ;;  %v7222_v14 = vld [vmem:[%s7408_s17 + $0xe4] sm:$0xff]  }
  0x45   : > { %6051 = vmatprep.mubr.msk.bf16.mxu1 %vm7283_vm2, %v7281_v2 }
  0x4c   : > { %6052 = vmatmul.mubr.msk.bf16.gmra.mrb[28].mxu1 %vm626_vm3, %v7199_v15 }
  0x4d   : > { %6055 = vmatprep.mubr.msk.bf16.mxu1 %vm7283_vm2, %v7281_v2 }
  0x54   : > { %6056 = vmatmul.mubr.msk.bf16.gmra.mrb[32].mxu1 %vm626_vm3, %v7200_v16 }
  0x55   : > { %6059 = vmatprep.mubr.msk.bf16.mxu1 %vm7283_vm2, %v7281_v2 }
  0x5c   : > { %6060 = vmatmul.mubr.msk.bf16.gmra.mrb[36].mxu1 %vm626_vm3, %v7201_v17 }
  0x5d   : > { %6063 = vmatprep.mubr.msk.bf16.mxu1 %vm7283_vm2, %v7281_v2 }
  0x64   : > { %6064 = vmatmul.mubr.msk.bf16.gmra.mrb[40].mxu1 %vm626_vm3, %v7202_v18 }
  0x65   : > { %6067 = vmatprep.mubr.msk.bf16.mxu1 %vm7283_vm2, %v7281_v2 }
  0x6c   : > { %6068 = vmatmul.mubr.msk.bf16.gmra.mrb[44].mxu1 %vm626_vm3, %v7203_v19  ;;  %v7223_v19 = vld [vmem:[%s7408_s17 + $0xec] sm:$0xff]  }
  0x6d   : > { %6071 = vmatprep.mubr.msk.bf16.mxu1 %vm7283_vm2, %v7281_v2 }
  0x74   : > { %6072 = vmatmul.mubr.msk.bf16.gmra.mrb[48].mxu1 %vm626_vm3, %v7204_v20 }
  0x75   : > { %6079 = vmatprep.mubr.msk.bf16.mxu1 %vm7283_vm2, %v7281_v2 }
  0x7c   : > { %6080 = vmatmul.mubr.msk.bf16.vlgmr.msra.gmra.mrb[52].mxu1 %vm626_vm3, %v987_v25 }
  0x7d   : > { %6083 = vmatprep.mubr.msk.bf16.mxu1 %vm7283_vm2, %v7281_v2  ;;  %6132 = vmatpush3.bf16.msra.mxu1 %v7385_v1 }
  0x7e   : > { %6133 = vmatprep.subr.bf16.mxu1 %v7281_v2 }
  0x81   : > { %6134 = vmatpush3.bf16.msra.mxu1 %v7401_v7 }
  0x82   : > { %6187 = vmatprep.subr.bf16.mxu1 %v7281_v2 }
  0x84   : > { %6084 = vmatmul.mubr.msk.bf16.gmra.mrb[56].mxu1 %vm626_vm3, %v989_v28 }
  0x85   : > { %6087 = vmatprep.mubr.msk.bf16.mxu1 %vm7283_vm2, %v7281_v2 }
  0x8c   : > { %6088 = vmatmul.mubr.msk.bf16.gmra.mrb[60].mxu1 %vm626_vm3, %v991_v31 }
  0x8d   : > { %6091 = vmatprep.mubr.msk.bf16.mxu1 %vm7283_vm2, %v7281_v2 }
  0x94   : > { %6092 = vmatmul.mubr.msk.bf16.gmra.mrb[64].mxu1 %vm626_vm3, %v993_v34  ;;  %v7226_v34 = vld [vmem:[%s7408_s17 + $0x104] sm:$0xff]  }
  0x95   : > { %6095 = vmatprep.mubr.msk.bf16.mxu1 %vm7283_vm2, %v7281_v2 }
  0x9c   : > { %6096 = vmatmul.mubr.msk.bf16.gmra.mrb[68].mxu1 %vm626_vm3, %v995_v37 }
  0x9d   : > { %6099 = vmatprep.mubr.msk.bf16.mxu1 %vm7283_vm2, %v7281_v2 }
  0xa4   : > { %6100 = vmatmul.mubr.msk.bf16.gmra.mrb[72].mxu1 %vm626_vm3, %v997_v40 }
  0xa5   : > { %6103 = vmatprep.mubr.msk.bf16.mxu1 %vm7283_vm2, %v7281_v2 }
  0xac   : > { %6104 = vmatmul.mubr.msk.bf16.gmra.mrb[76].mxu1 %vm626_vm3, %v999_v43 }
  0xad   : > { %6107 = vmatprep.mubr.msk.bf16.mxu1 %vm7283_vm2, %v7281_v2 }
  0xb4   : > { %6108 = vmatmul.mubr.msk.bf16.gmra.mrb[80].mxu1 %vm626_vm3, %v1001_v46 }
  0xb5   : > { %6111 = vmatprep.mubr.msk.bf16.mxu1 %vm7283_vm2, %v7281_v2 }
  0xbc   : > { %6112 = vmatmul.mubr.msk.bf16.gmra.mrb[84].mxu1 %vm626_vm3, %v1003_v49  ;;  %v7229_v49 = vld [vmem:[%s7408_s17 + $0x11c] sm:$0xff]  }
  0xbd   : > { %6115 = vmatprep.mubr.msk.bf16.mxu1 %vm7283_vm2, %v7281_v2 }
  0xc4   : > { %6116 = vmatmul.mubr.msk.bf16.gmra.mrb[88].mxu1 %vm626_vm3, %v1005_v52 }
  0xc5   : > { %6119 = vmatprep.mubr.msk.bf16.mxu1 %vm7283_vm2, %v7281_v2 }
  0xcc   : > { %6120 = vmatmul.mubr.msk.bf16.gmra.mrb[92].mxu1 %vm626_vm3, %v1007_v55 }
  0xcd   : > { %6123 = vmatprep.mubr.msk.bf16.mxu1 %vm7283_vm2, %v7281_v2 }
  0xd4   : > { %6124 = vmatmul.mubr.msk.bf16.gmra.mrb[96].mxu1 %vm626_vm3, %v1009_v58 }
  0xd5   : > { %6127 = vmatprep.mubr.msk.bf16.mxu1 %vm7283_vm2, %v7281_v2 }
  0xdc   : > { %6128 = vmatmul.mubr.msk.bf16.gmra.mrb[100].mxu1 %vm626_vm3, %v1008_v57  ;;  %v7232_v57 = vld [vmem:[%s7408_s17 + $0x12c] sm:$0xff]  }
  0xdd   : > { %6135 = vmatprep.mubr.msk.bf16.mxu1 %vm7283_vm2, %v7281_v2 }
  0xe4   : > { %6136 = vmatmul.mubr.msk.bf16.vlgmr.msra.gmra.mrb[104].mxu1 %vm626_vm3, %v7218_v59  ;;  %v1736_v59 = vrot.slane %v7231_v56, 2 }
  0xe5   : > { %6139 = vmatprep.mubr.msk.bf16.mxu1 %vm7283_vm2, %v7281_v2  ;;  %6188 = vmatpush3.bf16.msra.mxu1 %v7385_v1 }
  0xe6   : > { %6189 = vmatprep.subr.bf16.mxu1 %v7281_v2 }
  0xe7   : > { %v7541_v60 = vpop.f32.mrb[0].mxu1 }
  0xe8   : > { %v6025_v61 = vpop.f32.mrb[1].mxu1 }
  0xe9   : > { %v7544_v63 = vpop.f32.mrb[2].mxu1  ;;  %6190 = vmatpush3.bf16.msra.mxu1 %v7401_v7  ;;  %v1737_v61 = vrot.slane %v7232_v57, 2  ;;  %v7235_v57 = vld [vmem:[%s7408_s17 + $0x144] sm:$0xff]  }
  0xea   : > { %v6026_v0 = vpop.f32.mrb[3].mxu1  ;;  %6243 = vmatprep.subr.bf16.mxu1 %v7281_v2 }
  0xec   : > { %6140 = vmatmul.mubr.msk.bf16.gmra.mrb[108].mxu1 %vm626_vm3, %v7219_v62 }
  0xed   : > { %6143 = vmatprep.mubr.msk.bf16.mxu1 %vm7283_vm2, %v7281_v2 }
  0xef   : > { %v7551_v1 = vpop.f32.mrb[4].mxu1 }
  0xf0   : > { %v6029_v3 = vpop.f32.mrb[5].mxu1 }
  0xf1   : > { %v7554_v5 = vpop.f32.mrb[6].mxu1  ;;  %v7646_v3 = vld [vmem:[%s8925_s2] ss:$0 sm:$0xff] }
  0xf2   : > { %v6030_v6 = vpop.f32.mrb[7].mxu1 }
  0xf3   : > { %v1738_v6 = vsel %vm984_vm4, %v1736_v59, %v1737_v61 }
  0xf4   : > { %6144 = vmatmul.mubr.msk.bf16.gmra.mrb[112].mxu1 %vm626_vm3, %v7220_v4 }
  0xf5   : > { %6147 = vmatprep.mubr.msk.bf16.mxu1 %vm7283_vm2, %v7281_v2 }
  0xf7   : > { %v7559_v7 = vpop.f32.mrb[8].mxu1 }
  0xf8   : > { %v6033_v8 = vpop.f32.mrb[9].mxu1 }
  0xf9   : > { %v7562_v10 = vpop.f32.mrb[10].mxu1  ;;  %v7233_v8 = vld [vmem:[%s7408_s17 + $0x134] sm:$0xff]  }
  0xfa   : > { %v6034_v11 = vpop.f32.mrb[11].mxu1 }
  0xfb   : > { %v815_v11 = vmul.f32 %v7646_v3, %v7541_v60 }
  0xfc   : > { %6148 = vmatmul.mubr.msk.bf16.gmra.mrb[116].mxu1 %vm626_vm3, %v7221_v9 }
  0xfd   : > { %6151 = vmatprep.mubr.msk.bf16.mxu1 %vm7283_vm2, %v7281_v2 }
  0xff   : > { %v7567_v12 = vpop.f32.mrb[12].mxu1 }
 0x100   : > { %v6037_v13 = vpop.f32.mrb[13].mxu1 }
 0x101   : > { %v7570_v15 = vpop.f32.mrb[14].mxu1  ;;  %v7656_v13 = vld [vmem:[%s8926_s3] ss:$0 sm:$0xff] }
 0x102   : > { %v6038_v16 = vpop.f32.mrb[15].mxu1 }
 0x103   : > { %v816_v16 = vmul.f32 %v7646_v3, %v7544_v63  ;;  %v817_v63 = vmul.f32 %v7646_v3, %v7551_v1 }
 0x104   : > { %6152 = vmatmul.mubr.msk.bf16.gmra.mrb[120].mxu1 %vm626_vm3, %v7222_v14  ;;  %v1739_v14 = vrot.slane %v7233_v8, 2  ;;  %v819_v8 = vmul.f32 %v7646_v3, %v7559_v7 }
 0x105   : > { %6155 = vmatprep.mubr.msk.bf16.mxu1 %vm7283_vm2, %v7281_v2  ;;  %v848_v1 = vadd.f32 %v7656_v13, %v817_v63 }
 0x107   : > { %v7575_v17 = vpop.f32.mrb[16].mxu1 }
 0x108   : > { %v6041_v18 = vpop.f32.mrb[17].mxu1 }
 0x109   : > { %v7578_v20 = vpop.f32.mrb[18].mxu1 }
 0x10a   : > { %v6042_v21 = vpop.f32.mrb[19].mxu1 }
 0x10c   : > { %6156 = vmatmul.mubr.msk.bf16.gmra.mrb[124].mxu1 %vm626_vm3, %v7223_v19  ;;  %v846_v19 = vadd.f32 %v7656_v13, %v815_v11 }
 0x10d   : > { %6159 = vmatprep.mubr.msk.bf16.mxu1 %vm7283_vm2, %v7281_v2 }
 0x10f   : > { %v7583_v22 = vpop.f32.mrb[20].mxu1 }
 0x110   : > { %v6045_v23 = vpop.f32.mrb[21].mxu1 }
 0x111   : > { %v7586_v25 = vpop.f32.mrb[22].mxu1 }
 0x112   : > { %v6046_v26 = vpop.f32.mrb[23].mxu1 }
 0x113   : > { %v7234_v26 = vld [vmem:[%s7408_s17 + $0x13c] sm:$0xff]  }
 0x114   : > { %6160 = vmatmul.mubr.msk.bf16.gmra.mrb[128].mxu1 %vm626_vm3, %v7224_v24  ;;  %v1740_v24 = vsel %vm984_vm4, %v1737_v61, %v1739_v14 }
 0x115   : > { %6163 = vmatprep.mubr.msk.bf16.mxu1 %vm7283_vm2, %v7281_v2 }
 0x117   : > { %v7591_v27 = vpop.f32.mrb[24].mxu1 }
 0x118   : > { %v6049_v28 = vpop.f32.mrb[25].mxu1 }
 0x119   : > { %v7594_v30 = vpop.f32.mrb[26].mxu1  ;;  %v847_v28 = vadd.f32 %v7656_v13, %v816_v16 }
 0x11a   : > { %v6050_v31 = vpop.f32.mrb[27].mxu1 }
 0x11c   : > { %6164 = vmatmul.mubr.msk.bf16.gmra.mrb[132].mxu1 %vm626_vm3, %v7225_v29 }
 0x11d   : > { %6167 = vmatprep.mubr.msk.bf16.mxu1 %vm7283_vm2, %v7281_v2 }
 0x11f   : > { %v7599_v32 = vpop.f32.mrb[28].mxu1 }
 0x120   : > { %v6053_v33 = vpop.f32.mrb[29].mxu1 }
 0x121   : > { %v7602_v35 = vpop.f32.mrb[30].mxu1 }
 0x122   : > { %v6054_v36 = vpop.f32.mrb[31].mxu1 }
 0x124   : > { %6168 = vmatmul.mubr.msk.bf16.gmra.mrb[136].mxu1 %vm626_vm3, %v7226_v34  ;;  %v871_v34 = vmax.f32 %v846_v19, 0.0 }
 0x125   : > { %6171 = vmatprep.mubr.msk.bf16.mxu1 %vm7283_vm2, %v7281_v2 }
 0x127   : > { %v7607_v37 = vpop.f32.mrb[32].mxu1 }
 0x128   : > { %v6057_v38 = vpop.f32.mrb[33].mxu1 }
 0x129   : > { %v7610_v40 = vpop.f32.mrb[34].mxu1 }
 0x12a   : > { %v6058_v41 = vpop.f32.mrb[35].mxu1 }
 0x12b   : > { %v872_v41 = vmax.f32 %v847_v28, 0.0  ;;  %v7236_v28 = vld [vmem:[%s7408_s17 + $0x14c] sm:$0xff]  }
 0x12c   : > { %6172 = vmatmul.mubr.msk.bf16.gmra.mrb[140].mxu1 %vm626_vm3, %v7227_v39  ;;  %v1741_v39 = vrot.slane %v7234_v26, 2 }
 0x12d   : > { %6175 = vmatprep.mubr.msk.bf16.mxu1 %vm7283_vm2, %v7281_v2 }
 0x12e   : > { %v1742_v56 = vsel %vm984_vm4, %v1739_v14, %v1741_v39 }
 0x12f   : > { %v7615_v42 = vpop.f32.mrb[36].mxu1 }
 0x130   : > { %v6061_v43 = vpop.f32.mrb[37].mxu1 }
 0x131   : > { %v7618_v45 = vpop.f32.mrb[38].mxu1  ;;  %v818_v43 = vmul.f32 %v7646_v3, %v7554_v5 }
 0x132   : > { %v6062_v46 = vpop.f32.mrb[39].mxu1 }
 0x134   : > { %6176 = vmatmul.mubr.msk.bf16.gmra.mrb[144].mxu1 %vm626_vm3, %v7228_v44 }
 0x135   : > { %6179 = vmatprep.mubr.msk.bf16.mxu1 %vm7283_vm2, %v7281_v2 }
 0x137   : > { %v7623_v47 = vpop.f32.mrb[40].mxu1 }
 0x138   : > { %v6065_v48 = vpop.f32.mrb[41].mxu1 }
 0x139   : > { %v7626_v50 = vpop.f32.mrb[42].mxu1 }
 0x13a   : > { %v6066_v51 = vpop.f32.mrb[43].mxu1 }
 0x13c   : > { %6180 = vmatmul.mubr.msk.bf16.gmra.mrb[148].mxu1 %vm626_vm3, %v7229_v49 }
 0x13d   : > { %6183 = vmatprep.mubr.msk.bf16.mxu1 %vm7283_vm2, %v7281_v2 }
 0x13f   : > { %v7631_v52 = vpop.f32.mrb[44].mxu1 }
 0x140   : > { %v6069_v53 = vpop.f32.mrb[45].mxu1 }
 0x141   : > { %v7634_v55 = vpop.f32.mrb[46].mxu1 }
 0x142   : > { %v6070_v58 = vpop.f32.mrb[47].mxu1 }
 0x143   : > { %v849_v58 = vadd.f32 %v7656_v13, %v818_v43 }
 0x144   : > { %6184 = vmatmul.mubr.msk.bf16.gmra.mrb[152].mxu1 %vm626_vm3, %v7230_v54 }
 0x145   : > { %6191 = vmatprep.mubr.msk.bf16.mxu1 %vm7283_vm2, %v7281_v2  ;;  %v874_v11 = vmax.f32 %v849_v58, 0.0  ;;  %v7237_v58 = vld [vmem:[%s7408_s17 + $0x154] sm:$0xff]  }
 0x147   : > { %v7641_v62 = vpop.f32.mrb[48].mxu1 }
 0x148   : > { %v6073_v0 = vpop.f32.mrb[49].mxu1 }
 0x149   : > { %v806_v4 = vpop.f32.mrb[50].mxu1  ;;  %v873_v0 = vmax.f32 %v848_v1, 0.0 }
 0x14a   : > { %v6074_v9 = vpop.f32.mrb[51].mxu1 }
 0x14b   : > { %v1743_v9 = vrot.slane %v7235_v57, 2 }
 0x14c   : > { %6192 = vmatmul.mubr.msk.bf16.vlgmr.msra.gmra.mrb[156].mxu1 %vm626_vm3, %v1738_v6 }
 0x14d   : > { %6195 = vmatprep.mubr.msk.bf16.mxu1 %vm7283_vm2, %v7281_v2  ;;  %v1744_v26 = vsel %vm984_vm4, %v1741_v39, %v1743_v9  ;;  %v1745_v39 = vrot.slane %v7236_v28, 2 }
 0x14f   : > { %v1083_v18 = vpop.f32.mrb[52].mxu1  ;;  %v1746_v57 = vsel %vm984_vm4, %v1743_v9, %v1745_v39  ;;  %v1747_v9 = vrot.slane %v7237_v58, 2 }
 0x150   : > { %v1185_v21 = vmul.f32 %v7646_v3, %v1083_v18  ;;  %v6081_v60 = vpop.f32.mrb[53].mxu1  ;;  %v820_v18 = vmul.f32 %v7646_v3, %v7562_v10 }
 0x151   : > { %v1086_v23 = vpop.f32.mrb[54].mxu1  ;;  %v850_v60 = vadd.f32 %v7656_v13, %v819_v8  ;;  %v1748_v28 = vsel %vm984_vm4, %v1745_v39, %v1747_v9 }
 0x152   : > { %v1210_v29 = vadd.f32 %v7656_v13, %v1185_v21  ;;  %v1186_v31 = vmul.f32 %v7646_v3, %v1086_v23  ;;  %v6082_v33 = vpop.f32.mrb[55].mxu1 }
 0x153   : > { %v875_v10 = vmax.f32 %v850_v60, 0.0 }
 0x154   : > { %v1235_v36 = vmax.f32 %v1210_v29, 0.0  ;;  %v1211_v38 = vadd.f32 %v7656_v13, %v1186_v31  ;;  %6196 = vmatmul.mubr.msk.bf16.gmra.mrb[160].mxu1 %vm626_vm3, %v1740_v24  ;;  %v851_v31 = vadd.f32 %v7656_v13, %v820_v18 }
 0x155   : > { %6199 = vmatprep.mubr.msk.bf16.mxu1 %vm7283_vm2, %v7281_v2 }
 0x156   : > { %v7677_v44 = vmax.f32 %v871_v34, %v1235_v36  ;;  %v1236_v46 = vmax.f32 %v1211_v38, 0.0  ;;  %v821_v38 = vmul.f32 %v7646_v3, %v7567_v12  ;;  %v876_v43 = vmax.f32 %v851_v31, 0.0 }
 0x157   : > { %v1091_v48 = vpop.f32.mrb[56].mxu1 }
 0x158   : > { %v7680_v49 = vmax.f32 %v872_v41, %v1236_v46  ;;  %v1187_v51 = vmul.f32 %v7646_v3, %v1091_v48  ;;  %v6085_v53 = vpop.f32.mrb[57].mxu1  ;;  %v822_v48 = vmul.f32 %v7646_v3, %v7570_v15  ;;  %v823_v15 = vmul.f32 %v7646_v3, %v7575_v17 }
 0x159   : > { %v1094_v54 = vpop.f32.mrb[58].mxu1  ;;  %v852_v53 = vadd.f32 %v7656_v13, %v821_v38 }
 0x15a   : > { %v1212_v59 = vadd.f32 %v7656_v13, %v1187_v51  ;;  %v1188_v5 = vmul.f32 %v7646_v3, %v1094_v54  ;;  %v6086_v61 = vpop.f32.mrb[59].mxu1  ;;  %v854_v17 = vadd.f32 %v7656_v13, %v823_v15 }
 0x15c   : > { %v1237_v4 = vmax.f32 %v1212_v59, 0.0  ;;  %v1213_v6 = vadd.f32 %v7656_v13, %v1188_v5  ;;  %6200 = vmatmul.mubr.msk.bf16.gmra.mrb[164].mxu1 %vm626_vm3, %v1742_v56  ;;  %v853_v5 = vadd.f32 %v7656_v13, %v822_v48 }
 0x15d   : > { %6203 = vmatprep.mubr.msk.bf16.mxu1 %vm7283_vm2, %v7281_v2 }
 0x15e   : > { %v7694_v14 = vmax.f32 %v873_v0, %v1237_v4  ;;  %v1238_v16 = vmax.f32 %v1213_v6, 0.0  ;;  %v877_v4 = vmax.f32 %v852_v53, 0.0  ;;  %v878_v18 = vmax.f32 %v853_v5, 0.0 }
 0x15f   : > { %v1099_v19 = vpop.f32.mrb[60].mxu1 }
 0x160   : > { %v7698_v21 = vmax.f32 %v874_v11, %v1238_v16  ;;  %v1189_v23 = vmul.f32 %v7646_v3, %v1099_v19  ;;  %v6089_v24 = vpop.f32.mrb[61].mxu1  ;;  %v824_v11 = vmul.f32 %v7646_v3, %v7578_v20 }
 0x161   : > { %v1102_v7 = vpop.f32.mrb[62].mxu1 }
 0x162   : > { %v1214_v29 = vadd.f32 %v7656_v13, %v1189_v23  ;;  %v1190_v33 = vmul.f32 %v7646_v3, %v1102_v7  ;;  %v6090_v34 = vpop.f32.mrb[63].mxu1  ;;  %v855_v31 = vadd.f32 %v7656_v13, %v824_v11 }
 0x164   : > { %v1239_v63 = vmax.f32 %v1214_v29, 0.0  ;;  %v1215_v36 = vadd.f32 %v7656_v13, %v1190_v33  ;;  %6204 = vmatmul.mubr.msk.bf16.gmra.mrb[168].mxu1 %vm626_vm3, %v1744_v26  ;;  %v7238_v29 = vld [vmem:[%s7408_s17 + $0x15c] sm:$0xff]  }
 0x165   : > { %6207 = vmatprep.mubr.msk.bf16.mxu1 %vm7283_vm2, %v7281_v2  ;;  %v1749_v39 = vrot.slane %v7238_v29, 2 }
 0x166   : > { %v7713_v41 = vmax.f32 %v875_v10, %v1239_v63  ;;  %v1240_v46 = vmax.f32 %v1215_v36, 0.0  ;;  %v879_v10 = vmax.f32 %v854_v17, 0.0  ;;  %v825_v63 = vmul.f32 %v7646_v3, %v7583_v22 }
 0x167   : > { %v1107_v1 = vpop.f32.mrb[64].mxu1  ;;  %v1750_v58 = vsel %vm984_vm4, %v1747_v9, %v1749_v39 }
 0x168   : > { %v7717_v51 = vmax.f32 %v876_v43, %v1240_v46  ;;  %v1191_v54 = vmul.f32 %v7646_v3, %v1107_v1  ;;  %v6093_v56 = vpop.f32.mrb[65].mxu1  ;;  %v880_v43 = vmax.f32 %v855_v31, 0.0  ;;  %v826_v46 = vmul.f32 %v7646_v3, %v7586_v25  ;;  %v7240_v31 = vld [vmem:[%s7408_s17 + $0x16c] sm:$0xff]  }
 0x169   : > { %v1110_v12 = vpop.f32.mrb[66].mxu1  ;;  %v856_v22 = vadd.f32 %v7656_v13, %v825_v63  ;;  %v829_v63 = vmul.f32 %v7646_v3, %v7599_v32 }
 0x16a   : > { %v1216_v59 = vadd.f32 %v7656_v13, %v1191_v54  ;;  %v1192_v61 = vmul.f32 %v7646_v3, %v1110_v12  ;;  %v6094_v0 = vpop.f32.mrb[67].mxu1  ;;  %v857_v5 = vadd.f32 %v7656_v13, %v826_v46  ;;  %v830_v46 = vmul.f32 %v7646_v3, %v7602_v35 }
 0x16b   : > { %v881_v15 = vmax.f32 %v856_v22, 0.0  ;;  %v860_v32 = vadd.f32 %v7656_v13, %v829_v63  ;;  %v833_v63 = vmul.f32 %v7646_v3, %v7615_v42 }
 0x16c   : > { %v1241_v6 = vmax.f32 %v1216_v59, 0.0  ;;  %v1217_v8 = vadd.f32 %v7656_v13, %v1192_v61  ;;  %6208 = vmatmul.mubr.msk.bf16.gmra.mrb[172].mxu1 %vm626_vm3, %v1746_v57  ;;  %v7239_v59 = vld [vmem:[%s7408_s17 + $0x164] sm:$0xff]   ;;  %v882_v11 = vmax.f32 %v857_v5, 0.0  ;;  %v7241_v5 = vld [vmem:[%s7408_s17 + $0x174] sm:$0xff]  }
 0x16d   : > { %6211 = vmatprep.mubr.msk.bf16.mxu1 %vm7283_vm2, %v7281_v2  ;;  %v1751_v9 = vrot.slane %v7239_v59, 2  ;;  %v864_v42 = vadd.f32 %v7656_v13, %v833_v63 }
 0x16e   : > { %v7734_v16 = vmax.f32 %v877_v4, %v1241_v6  ;;  %v1242_v19 = vmax.f32 %v1217_v8, 0.0  ;;  %v827_v4 = vmul.f32 %v7646_v3, %v7591_v27 }
 0x16f   : > { %v1115_v60 = vpop.f32.mrb[68].mxu1  ;;  %v1752_v29 = vsel %vm984_vm4, %v1749_v39, %v1751_v9  ;;  %v1753_v39 = vrot.slane %v7240_v31, 2 }
 0x170   : > { %v7737_v23 = vmax.f32 %v878_v18, %v1242_v19  ;;  %v1193_v24 = vmul.f32 %v7646_v3, %v1115_v60  ;;  %v6097_v7 = vpop.f32.mrb[69].mxu1  ;;  %v828_v18 = vmul.f32 %v7646_v3, %v7594_v30  ;;  %v858_v27 = vadd.f32 %v7656_v13, %v827_v4 }
 0x171   : > { %v1118_v26 = vpop.f32.mrb[70].mxu1  ;;  %v1754_v59 = vsel %vm984_vm4, %v1751_v9, %v1753_v39  ;;  %v831_v4 = vmul.f32 %v7646_v3, %v7607_v37  ;;  %v1755_v9 = vrot.slane %v7241_v5, 2 }
 0x172   : > { %v1218_v20 = vadd.f32 %v7656_v13, %v1193_v24  ;;  %v1194_v33 = vmul.f32 %v7646_v3, %v1118_v26  ;;  %v6098_v34 = vpop.f32.mrb[71].mxu1 }
 0x173   : > { %v862_v37 = vadd.f32 %v7656_v13, %v831_v4  ;;  %v1756_v31 = vsel %vm984_vm4, %v1753_v39, %v1755_v9  ;;  %v835_v4 = vmul.f32 %v7646_v3, %v7623_v47 }
 0x174   : > { %v1243_v36 = vmax.f32 %v1218_v20, 0.0  ;;  %v1219_v38 = vadd.f32 %v7656_v13, %v1194_v33  ;;  %6212 = vmatmul.mubr.msk.bf16.gmra.mrb[176].mxu1 %vm626_vm3, %v1748_v28  ;;  %v859_v20 = vadd.f32 %v7656_v13, %v828_v18  ;;  %v832_v18 = vmul.f32 %v7646_v3, %v7610_v40 }
 0x175   : > { %6215 = vmatprep.mubr.msk.bf16.mxu1 %vm7283_vm2, %v7281_v2 }
 0x176   : > { %v7753_v48 = vmax.f32 %v879_v10, %v1243_v36  ;;  %v1244_v1 = vmax.f32 %v1219_v38, 0.0  ;;  %v883_v10 = vmax.f32 %v858_v27, 0.0 }
 0x177   : > { %v1123_v53 = vpop.f32.mrb[72].mxu1 }
 0x178   : > { %v7756_v54 = vmax.f32 %v880_v43, %v1244_v1  ;;  %v1195_v56 = vmul.f32 %v7646_v3, %v1123_v53  ;;  %v6101_v12 = vpop.f32.mrb[73].mxu1  ;;  %v884_v43 = vmax.f32 %v859_v20, 0.0  ;;  %v7242_v20 = vld [vmem:[%s7408_s17 + $0x17c] sm:$0xff]  }
 0x179   : > { %v1126_v57 = vpop.f32.mrb[74].mxu1  ;;  %v1757_v39 = vrot.slane %v7242_v20, 2 }
 0x17a   : > { %v1220_v61 = vadd.f32 %v7656_v13, %v1195_v56  ;;  %v1196_v25 = vmul.f32 %v7646_v3, %v1126_v57  ;;  %v6102_v0 = vpop.f32.mrb[75].mxu1 }
 0x17b   : > { %v1758_v5 = vsel %vm984_vm4, %v1755_v9, %v1757_v39 }
 0x17c   : > { %v1245_v6 = vmax.f32 %v1220_v61, 0.0  ;;  %v1221_v8 = vadd.f32 %v7656_v13, %v1196_v25  ;;  %6216 = vmatmul.mubr.msk.bf16.gmra.mrb[180].mxu1 %vm626_vm3, %v1750_v58  ;;  %v861_v61 = vadd.f32 %v7656_v13, %v830_v46  ;;  %v834_v46 = vmul.f32 %v7646_v3, %v7618_v45 }
 0x17d   : > { %6219 = vmatprep.mubr.msk.bf16.mxu1 %vm7283_vm2, %v7281_v2 }
 0x17e   : > { %v7772_v19 = vmax.f32 %v881_v15, %v1245_v6  ;;  %v1246_v60 = vmax.f32 %v1221_v8, 0.0  ;;  %v885_v15 = vmax.f32 %v860_v32, 0.0 }
 0x17f   : > { %v1131_v17 = vpop.f32.mrb[76].mxu1 }
 0x180   : > { %v7775_v24 = vmax.f32 %v882_v11, %v1246_v60  ;;  %v1197_v7 = vmul.f32 %v7646_v3, %v1131_v17  ;;  %v6105_v26 = vpop.f32.mrb[77].mxu1  ;;  %v886_v11 = vmax.f32 %v861_v61, 0.0  ;;  %v7243_v61 = vld [vmem:[%s7408_s17 + $0x184] ss:$0 sps:$4 sm:$0xff]  }
 0x181   : > { %v1134_v28 = vpop.f32.mrb[78].mxu1  ;;  %v1759_v9 = vrot.slane %v7243_v61, 2 }
 0x182   : > { %v1222_v33 = vadd.f32 %v7656_v13, %v1197_v7  ;;  %v1198_v30 = vmul.f32 %v7646_v3, %v1134_v28  ;;  %v6106_v34 = vpop.f32.mrb[79].mxu1 }
 0x183   : > { %v1760_v20 = vsel %vm984_vm4, %v1757_v39, %v1759_v9  ;;  %v838_v39 = vmul.f32 %v7646_v3, %v7634_v55 }
 0x184   : > { %v1247_v36 = vmax.f32 %v1222_v33, 0.0  ;;  %v1223_v38 = vadd.f32 %v7656_v13, %v1198_v30  ;;  %6220 = vmatmul.mubr.msk.bf16.gmra.mrb[184].mxu1 %vm626_vm3, %v1752_v29  ;;  %v863_v33 = vadd.f32 %v7656_v13, %v832_v18  ;;  %v836_v18 = vmul.f32 %v7646_v3, %v7626_v50 }
 0x185   : > { %6223 = vmatprep.mubr.msk.bf16.mxu1 %vm7283_vm2, %v7281_v2 }
 0x186   : > { %v7791_v1 = vmax.f32 %v883_v10, %v1247_v36  ;;  %v1248_v53 = vmax.f32 %v1223_v38, 0.0  ;;  %v887_v10 = vmax.f32 %v862_v37, 0.0 }
 0x187   : > { %v1139_v22 = vpop.f32.mrb[80].mxu1 }
 0x188   : > { %v7794_v56 = vmax.f32 %v884_v43, %v1248_v53  ;;  %v1199_v12 = vmul.f32 %v7646_v3, %v1139_v22  ;;  %v6109_v57 = vpop.f32.mrb[81].mxu1  ;;  %v888_v43 = vmax.f32 %v863_v33, 0.0  ;;  %v867_v33 = vadd.f32 %v7656_v13, %v836_v18 }
 0x189   : > { %v1142_v58 = vpop.f32.mrb[82].mxu1 }
 0x18a   : > { %v1224_v25 = vadd.f32 %v7656_v13, %v1199_v12  ;;  %v1200_v35 = vmul.f32 %v7646_v3, %v1142_v58  ;;  %v6110_v0 = vpop.f32.mrb[83].mxu1 }
 0x18c   : > { %v1249_v6 = vmax.f32 %v1224_v25, 0.0  ;;  %v1225_v8 = vadd.f32 %v7656_v13, %v1200_v35  ;;  %6224 = vmatmul.mubr.msk.bf16.gmra.mrb[188].mxu1 %vm626_vm3, %v1754_v59  ;;  %v865_v25 = vadd.f32 %v7656_v13, %v834_v46 }
 0x18d   : > { %6227 = vmatprep.mubr.msk.bf16.mxu1 %vm7283_vm2, %v7281_v2 }
 0x18e   : > { %v7810_v60 = vmax.f32 %v885_v15, %v1249_v6  ;;  %v1250_v17 = vmax.f32 %v1225_v8, 0.0  ;;  %v889_v15 = vmax.f32 %v864_v42, 0.0 }
 0x18f   : > { %v1147_v27 = vpop.f32.mrb[84].mxu1 }
 0x190   : > { %v7813_v7 = vmax.f32 %v886_v11, %v1250_v17  ;;  %v1201_v26 = vmul.f32 %v7646_v3, %v1147_v27  ;;  %v6113_v28 = vpop.f32.mrb[85].mxu1  ;;  %v890_v11 = vmax.f32 %v865_v25, 0.0 }
 0x191   : > { %v1150_v29 = vpop.f32.mrb[86].mxu1 }
 0x192   : > { %v1226_v30 = vadd.f32 %v7656_v13, %v1201_v26  ;;  %v1202_v40 = vmul.f32 %v7646_v3, %v1150_v29  ;;  %v6114_v34 = vpop.f32.mrb[87].mxu1  ;;  %v866_v26 = vadd.f32 %v7656_v13, %v835_v4 }
 0x194   : > { %v1251_v36 = vmax.f32 %v1226_v30, 0.0  ;;  %v1227_v38 = vadd.f32 %v7656_v13, %v1202_v40  ;;  %6228 = vmatmul.mubr.msk.bf16.gmra.mrb[192].mxu1 %vm626_vm3, %v1756_v31  ;;  %v891_v34 = vmax.f32 %v866_v26, 0.0 }
 0x195   : > { %6231 = vmatprep.mubr.msk.bf16.mxu1 %vm7283_vm2, %v7281_v2 }
 0x196   : > { %v7829_v53 = vmax.f32 %v887_v10, %v1251_v36  ;;  %v1252_v22 = vmax.f32 %v1227_v38, 0.0  ;;  %v837_v10 = vmul.f32 %v7646_v3, %v7631_v52  ;;  %v892_v38 = vmax.f32 %v867_v33, 0.0  ;;  %v5606_v33 = vld [vmem:[%s8927_s4 + $0x4] sm:$0xf] }
 0x197   : > { %v1155_v32 = vpop.f32.mrb[88].mxu1 }
 0x198   : > { %v7832_v12 = vmax.f32 %v888_v43, %v1252_v22  ;;  %v1203_v57 = vmul.f32 %v7646_v3, %v1155_v32  ;;  %v6117_v58 = vpop.f32.mrb[89].mxu1  ;;  %v868_v32 = vadd.f32 %v7656_v13, %v837_v10 }
 0x199   : > { %v1158_v59 = vpop.f32.mrb[90].mxu1 }
 0x19a   : > { %v1228_v35 = vadd.f32 %v7656_v13, %v1203_v57  ;;  %v1204_v45 = vmul.f32 %v7646_v3, %v1158_v59  ;;  %v6118_v0 = vpop.f32.mrb[91].mxu1  ;;  %v869_v59 = vadd.f32 %v7656_v13, %v838_v39  ;;  %v893_v55 = vmax.f32 %v868_v32, 0.0 }
 0x19c   : > { %v1253_v6 = vmax.f32 %v1228_v35, 0.0  ;;  %v1229_v8 = vadd.f32 %v7656_v13, %v1204_v45  ;;  %6232 = vmatmul.mubr.msk.bf16.gmra.mrb[196].mxu1 %vm626_vm3, %v1758_v5  ;;  %v839_v35 = vmul.f32 %v7646_v3, %v7641_v62 }
 0x19d   : > { %6235 = vmatprep.mubr.msk.bf16.mxu1 %vm7283_vm2, %v7281_v2 }
 0x19e   : > { %v7848_v17 = vmax.f32 %v889_v15, %v1253_v6  ;;  %v1254_v27 = vmax.f32 %v1229_v8, 0.0  ;;  %v894_v15 = vmax.f32 %v869_v59, 0.0  ;;  %v870_v18 = vadd.f32 %v7656_v13, %v839_v35 }
 0x19f   : > { %v1163_v37 = vpop.f32.mrb[92].mxu1 }
 0x1a0   : > { %v7851_v47 = vmax.f32 %v890_v11, %v1254_v27  ;;  %v1205_v28 = vmul.f32 %v7646_v3, %v1163_v37  ;;  %v6121_v29 = vpop.f32.mrb[93].mxu1  ;;  %v2096_v11 = vld [vmem:[%s8927_s4] sm:$0xf] }
 0x1a1   : > { %v1166_v31 = vpop.f32.mrb[94].mxu1 }
 0x1a2   : > { %v1230_v30 = vadd.f32 %v7656_v13, %v1205_v28  ;;  %v1206_v50 = vmul.f32 %v7646_v3, %v1166_v31  ;;  %v6122_v40 = vpop.f32.mrb[95].mxu1  ;;  %v895_v31 = vmax.f32 %v870_v18, 0.0 }
 0x1a4   : > { %v1255_v63 = vmax.f32 %v1230_v30, 0.0  ;;  %v1231_v36 = vadd.f32 %v7656_v13, %v1206_v50  ;;  %6236 = vmatmul.mubr.msk.bf16.gmra.mrb[200].mxu1 %vm626_vm3, %v1760_v20  ;;  %v2165_v50 = vsel %vm666_vm0, %v5606_v33, 0 }
 0x1a5   : > { %6239 = vmatprep.mubr.msk.bf16.mxu1 %vm7283_vm2, %v7281_v2  ;;  %6244 = vmatpush3.bf16.msra.mxu1 %v2165_v50 }
 0x1a6   : > { %v7866_v43 = vmax.f32 %v891_v34, %v1255_v63  ;;  %v1256_v46 = vmax.f32 %v1231_v36, 0.0 }
 0x1a7   : > { %v1171_v22 = vpop.f32.mrb[96].mxu1 }
 0x1a8   : > { %v7869_v42 = vmax.f32 %v892_v38, %v1256_v46  ;;  %v1207_v52 = vmul.f32 %v7646_v3, %v1171_v22  ;;  %v6125_v57 = vpop.f32.mrb[97].mxu1 }
 0x1a9   : > { %v1174_v58 = vpop.f32.mrb[98].mxu1 }
 0x1aa   : > { %v1232_v5 = vadd.f32 %v7656_v13, %v1207_v52  ;;  %v1208_v61 = vmul.f32 %v7646_v3, %v1174_v58  ;;  %v6126_v25 = vpop.f32.mrb[99].mxu1 }
 0x1ac   : > { %v1257_v45 = vmax.f32 %v1232_v5, 0.0  ;;  %v1233_v0 = vadd.f32 %v7656_v13, %v1208_v61  ;;  %6240 = vmatmul.mubr.msk.bf16.gmra.mrb[204].mxu1 %vm626_vm3, %v1759_v9  ;;  %v2321_v9 = vsel %vm666_vm0, %v2096_v11, 0 }
 0x1ad   : > { %6245 = vmatprep.mubr.msk.bf16.mxu1 %vm7283_vm2, %v7281_v2  ;;  %6290 = vmatpush3.bf16.msra.mxu0 %v2321_v9 }
 0x1ae   : > { %v7881_v4 = vmax.f32 %v893_v55, %v1257_v45  ;;  %v1258_v6 = vmax.f32 %v1233_v0, 0.0  ;;  %6335 = vmatprep.subr.bf16.mxu0 %v7281_v2 }
 0x1af   : > { %v1179_v8 = vpop.f32.mrb[100].mxu1 }
 0x1b0   : > { %v7887_v62 = vmax.f32 %v894_v15, %v1258_v6  ;;  %v1209_v27 = vmul.f32 %v7646_v3, %v1179_v8  ;;  %v6129_v37 = vpop.f32.mrb[101].mxu1 }
 0x1b1   : > { %v1182_v26 = vpop.f32.mrb[102].mxu1 }
 0x1b2   : > { %v1234_v28 = vadd.f32 %v7656_v13, %v1209_v27  ;;  %v6130_v29 = vpop.f32.mrb[103].mxu1 }
 0x1b4   : > { %v1259_v20 = vmax.f32 %v1234_v28, 0.0 }
 0x1b6   : > { %v7896_v30 = vmax.f32 %v895_v31, %v1259_v20 }
 0x1b7   : > { %v1446_v40 = vpop.f32.mrb[104].mxu1 }
 0x1b8   : > { %v1548_v34 = vmul.f32 %v7646_v3, %v1446_v40  ;;  %v6137_v10 = vpop.f32.mrb[105].mxu1 }
 0x1b9   : > { %v1449_v63 = vpop.f32.mrb[106].mxu1 }
 0x1ba   : > { %v1573_v36 = vadd.f32 %v7656_v13, %v1548_v34  ;;  %v1549_v38 = vmul.f32 %v7646_v3, %v1449_v63  ;;  %v6138_v39 = vpop.f32.mrb[107].mxu1 }
 0x1bc   : > { %v1598_v46 = vmax.f32 %v1573_v36, 0.0  ;;  %v1574_v22 = vadd.f32 %v7656_v13, %v1549_v38 }
 0x1be   : > { %v7904_v32 = vmax.f32 %v7677_v44, %v1598_v46  ;;  %v1599_v52 = vmax.f32 %v1574_v22, 0.0 }
 0x1bf   : > { %v1454_v57 = vpop.f32.mrb[108].mxu1 }
 0x1c0   : > { %v7907_v58 = vmax.f32 %v7680_v49, %v1599_v52  ;;  %v1550_v59 = vmul.f32 %v7646_v3, %v1454_v57  ;;  %v6141_v5 = vpop.f32.mrb[109].mxu1 }
 0x1c1   : > { %v1457_v61 = vpop.f32.mrb[110].mxu1 }
 0x1c2   : > { %v1575_v25 = vadd.f32 %v7656_v13, %v1550_v59  ;;  %v1551_v55 = vmul.f32 %v7646_v3, %v1457_v61  ;;  %v6142_v35 = vpop.f32.mrb[111].mxu1 }
 0x1c4   : > { %v1600_v45 = vmax.f32 %v1575_v25, 0.0  ;;  %v1576_v0 = vadd.f32 %v7656_v13, %v1551_v55 }
 0x1c6   : > { %v7914_v44 = vmax.f32 %v7694_v14, %v1600_v45  ;;  %v1601_v15 = vmax.f32 %v1576_v0, 0.0 }
 0x1c7   : > { %v1462_v6 = vpop.f32.mrb[112].mxu1 }
 0x1c8   : > { %v7917_v49 = vmax.f32 %v7698_v21, %v1601_v15  ;;  %v1552_v8 = vmul.f32 %v7646_v3, %v1462_v6  ;;  %v6145_v11 = vpop.f32.mrb[113].mxu1 }
 0x1c9   : > { %v1465_v18 = vpop.f32.mrb[114].mxu1 }
 0x1ca   : > { %v1577_v27 = vadd.f32 %v7656_v13, %v1552_v8  ;;  %v1553_v37 = vmul.f32 %v7646_v3, %v1465_v18  ;;  %v6146_v9 = vpop.f32.mrb[115].mxu1 }
 0x1cc   : > { %v1602_v26 = vmax.f32 %v1577_v27, 0.0  ;;  %v1578_v28 = vadd.f32 %v7656_v13, %v1553_v37 }
 0x1ce   : > { %v7924_v14 = vmax.f32 %v7713_v41, %v1602_v26  ;;  %v1603_v29 = vmax.f32 %v1578_v28, 0.0 }
 0x1cf   : > { %v1470_v31 = vpop.f32.mrb[116].mxu1 }
 0x1d0   : > { %v7927_v21 = vmax.f32 %v7717_v51, %v1603_v29  ;;  %v1554_v20 = vmul.f32 %v7646_v3, %v1470_v31  ;;  %v6149_v33 = vpop.f32.mrb[117].mxu1 }
 0x1d1   : > { %v1473_v50 = vpop.f32.mrb[118].mxu1 }
 0x1d2   : > { %v1579_v40 = vadd.f32 %v7656_v13, %v1554_v20  ;;  %v1555_v34 = vmul.f32 %v7646_v3, %v1473_v50  ;;  %v6150_v10 = vpop.f32.mrb[119].mxu1 }
 0x1d4   : > { %v1604_v63 = vmax.f32 %v1579_v40, 0.0  ;;  %v1580_v36 = vadd.f32 %v7656_v13, %v1555_v34 }
 0x1d6   : > { %v7934_v41 = vmax.f32 %v7734_v16, %v1604_v63  ;;  %v1605_v38 = vmax.f32 %v1580_v36, 0.0 }
 0x1d7   : > { %v1478_v39 = vpop.f32.mrb[120].mxu1 }
 0x1d8   : > { %v7937_v51 = vmax.f32 %v7737_v23, %v1605_v38  ;;  %v1556_v46 = vmul.f32 %v7646_v3, %v1478_v39  ;;  %v6153_v22 = vpop.f32.mrb[121].mxu1 }
 0x1d9   : > { %v1481_v52 = vpop.f32.mrb[122].mxu1 }
 0x1da   : > { %v1581_v57 = vadd.f32 %v7656_v13, %v1556_v46  ;;  %v1557_v59 = vmul.f32 %v7646_v3, %v1481_v52  ;;  %v6154_v5 = vpop.f32.mrb[123].mxu1 }
 0x1dc   : > { %v1606_v61 = vmax.f32 %v1581_v57, 0.0  ;;  %v1582_v25 = vadd.f32 %v7656_v13, %v1557_v59 }
 0x1de   : > { %v7944_v16 = vmax.f32 %v7753_v48, %v1606_v61  ;;  %v1607_v55 = vmax.f32 %v1582_v25, 0.0 }
 0x1df   : > { %v1486_v35 = vpop.f32.mrb[124].mxu1 }
 0x1e0   : > { %v7947_v23 = vmax.f32 %v7756_v54, %v1607_v55  ;;  %v1558_v45 = vmul.f32 %v7646_v3, %v1486_v35  ;;  %v6157_v0 = vpop.f32.mrb[125].mxu1 }
 0x1e1   : > { %v1489_v15 = vpop.f32.mrb[126].mxu1 }
 0x1e2   : > { %v1583_v6 = vadd.f32 %v7656_v13, %v1558_v45  ;;  %v1559_v8 = vmul.f32 %v7646_v3, %v1489_v15  ;;  %v6158_v11 = vpop.f32.mrb[127].mxu1 }
 0x1e4   : > { %v1608_v18 = vmax.f32 %v1583_v6, 0.0  ;;  %v1584_v27 = vadd.f32 %v7656_v13, %v1559_v8 }
 0x1e6   : > { %v7954_v48 = vmax.f32 %v7772_v19, %v1608_v18  ;;  %v1609_v37 = vmax.f32 %v1584_v27, 0.0 }
 0x1e7   : > { %v1494_v9 = vpop.f32.mrb[128].mxu1 }
 0x1e8   : > { %v7957_v54 = vmax.f32 %v7775_v24, %v1609_v37  ;;  %v1560_v26 = vmul.f32 %v7646_v3, %v1494_v9  ;;  %v6161_v28 = vpop.f32.mrb[129].mxu1 }
 0x1e9   : > { %v1497_v29 = vpop.f32.mrb[130].mxu1 }
 0x1ea   : > { %v1585_v31 = vadd.f32 %v7656_v13, %v1560_v26  ;;  %v1561_v20 = vmul.f32 %v7646_v3, %v1497_v29  ;;  %v6162_v33 = vpop.f32.mrb[131].mxu1 }
 0x1ec   : > { %v1610_v50 = vmax.f32 %v1585_v31, 0.0  ;;  %v1586_v40 = vadd.f32 %v7656_v13, %v1561_v20 }
 0x1ee   : > { %v7964_v19 = vmax.f32 %v7791_v1, %v1610_v50  ;;  %v1611_v34 = vmax.f32 %v1586_v40, 0.0 }
 0x1ef   : > { %v1502_v10 = vpop.f32.mrb[132].mxu1 }
 0x1f0   : > { %v7967_v24 = vmax.f32 %v7794_v56, %v1611_v34  ;;  %v1562_v63 = vmul.f32 %v7646_v3, %v1502_v10  ;;  %v6165_v36 = vpop.f32.mrb[133].mxu1 }
 0x1f1   : > { %v1505_v38 = vpop.f32.mrb[134].mxu1 }
 0x1f2   : > { %v1587_v39 = vadd.f32 %v7656_v13, %v1562_v63  ;;  %v1563_v46 = vmul.f32 %v7646_v3, %v1505_v38  ;;  %v6166_v22 = vpop.f32.mrb[135].mxu1 }
 0x1f4   : > { %v1612_v52 = vmax.f32 %v1587_v39, 0.0  ;;  %v1588_v57 = vadd.f32 %v7656_v13, %v1563_v46 }
 0x1f6   : > { %v7974_v1 = vmax.f32 %v7810_v60, %v1612_v52  ;;  %v1613_v59 = vmax.f32 %v1588_v57, 0.0 }
 0x1f7   : > { %v1510_v5 = vpop.f32.mrb[136].mxu1 }
 0x1f8   : > { %v7977_v56 = vmax.f32 %v7813_v7, %v1613_v59  ;;  %v1564_v61 = vmul.f32 %v7646_v3, %v1510_v5  ;;  %v6169_v25 = vpop.f32.mrb[137].mxu1 }
 0x1f9   : > { %v1513_v55 = vpop.f32.mrb[138].mxu1 }
 0x1fa   : > { %v1589_v35 = vadd.f32 %v7656_v13, %v1564_v61  ;;  %v1565_v45 = vmul.f32 %v7646_v3, %v1513_v55  ;;  %v6170_v0 = vpop.f32.mrb[139].mxu1 }
 0x1fc   : > { %v1614_v15 = vmax.f32 %v1589_v35, 0.0  ;;  %v1590_v6 = vadd.f32 %v7656_v13, %v1565_v45 }
 0x1fe   : > { %v7984_v60 = vmax.f32 %v7829_v53, %v1614_v15  ;;  %v1615_v8 = vmax.f32 %v1590_v6, 0.0 }
 0x1ff   : > { %v1518_v11 = vpop.f32.mrb[140].mxu1 }
 0x200   : > { %v7987_v7 = vmax.f32 %v7832_v12, %v1615_v8  ;;  %v1566_v18 = vmul.f32 %v7646_v3, %v1518_v11  ;;  %v6173_v27 = vpop.f32.mrb[141].mxu1 }
 0x201   : > { %v1521_v37 = vpop.f32.mrb[142].mxu1 }
 0x202   : > { %v1591_v9 = vadd.f32 %v7656_v13, %v1566_v18  ;;  %v1567_v26 = vmul.f32 %v7646_v3, %v1521_v37  ;;  %v6174_v28 = vpop.f32.mrb[143].mxu1 }
 0x204   : > { %v1616_v29 = vmax.f32 %v1591_v9, 0.0  ;;  %v1592_v31 = vadd.f32 %v7656_v13, %v1567_v26 }
 0x206   : > { %v7994_v53 = vmax.f32 %v7848_v17, %v1616_v29  ;;  %v1617_v20 = vmax.f32 %v1592_v31, 0.0 }
 0x207   : > { %v1526_v33 = vpop.f32.mrb[144].mxu1 }
 0x208   : > { %v7999_v12 = vmax.f32 %v7851_v47, %v1617_v20  ;;  %v1568_v50 = vmul.f32 %v7646_v3, %v1526_v33  ;;  %v6177_v40 = vpop.f32.mrb[145].mxu1 }
 0x209   : > { %v1529_v34 = vpop.f32.mrb[146].mxu1 }
 0x20a   : > { %v1593_v10 = vadd.f32 %v7656_v13, %v1568_v50  ;;  %v1569_v63 = vmul.f32 %v7646_v3, %v1529_v34  ;;  %v6178_v36 = vpop.f32.mrb[147].mxu1 }
 0x20c   : > { %v1618_v17 = vmax.f32 %v1593_v10, 0.0  ;;  %v1594_v38 = vadd.f32 %v7656_v13, %v1569_v63 }
 0x20e   : > { %v8006_v39 = vmax.f32 %v7866_v43, %v1618_v17  ;;  %v1619_v46 = vmax.f32 %v1594_v38, 0.0 }
 0x20f   : > { %v1534_v22 = vpop.f32.mrb[148].mxu1 }
 0x210   : > { %v8009_v47 = vmax.f32 %v7869_v42, %v1619_v46  ;;  %v1570_v52 = vmul.f32 %v7646_v3, %v1534_v22  ;;  %v6181_v57 = vpop.f32.mrb[149].mxu1 }
 0x211   : > { %v1537_v59 = vpop.f32.mrb[150].mxu1 }
 0x212   : > { %v1595_v5 = vadd.f32 %v7656_v13, %v1570_v52  ;;  %v1571_v61 = vmul.f32 %v7646_v3, %v1537_v59  ;;  %v6182_v25 = vpop.f32.mrb[151].mxu1 }
 0x214   : > { %v1620_v55 = vmax.f32 %v1595_v5, 0.0  ;;  %v1596_v35 = vadd.f32 %v7656_v13, %v1571_v61 }
 0x216   : > { %v8016_v43 = vmax.f32 %v7881_v4, %v1620_v55  ;;  %v1621_v45 = vmax.f32 %v1596_v35, 0.0 }
 0x217   : > { %v1542_v0 = vpop.f32.mrb[152].mxu1 }
 0x218   : > { %v8019_v42 = vmax.f32 %v7887_v62, %v1621_v45  ;;  %v1572_v15 = vmul.f32 %v7646_v3, %v1542_v0  ;;  %v6185_v6 = vpop.f32.mrb[153].mxu1 }
 0x219   : > { %v1545_v8 = vpop.f32.mrb[154].mxu1 }
 0x21a   : > { %v1597_v11 = vadd.f32 %v7656_v13, %v1572_v15  ;;  %v6186_v18 = vpop.f32.mrb[155].mxu1 }
 0x21c   : > { %v1622_v27 = vmax.f32 %v1597_v11, 0.0 }
 0x21e   : > { %v8024_v37 = vmax.f32 %v7896_v30, %v1622_v27 }
 0x21f   : > { %v1834_v9 = vpop.f32.mrb[156].mxu1 }
 0x220   : > { %v1936_v4 = vmul.f32 %v7646_v3, %v1834_v9  ;;  %v6193_v26 = vpop.f32.mrb[157].mxu1 }
 0x221   : > { %v1837_v28 = vpop.f32.mrb[158].mxu1 }
 0x222   : > { %v1961_v29 = vadd.f32 %v7656_v13, %v1936_v4  ;;  %v1937_v62 = vmul.f32 %v7646_v3, %v1837_v28  ;;  %v6194_v31 = vpop.f32.mrb[159].mxu1 }
 0x224   : > { %v1986_v20 = vmax.f32 %v1961_v29, 0.0  ;;  %v1962_v33 = vadd.f32 %v7656_v13, %v1937_v62 }
 0x226   : > { %v2011_v50 = vmax.f32 %v7904_v32, %v1986_v20  ;;  %v1987_v40 = vmax.f32 %v1962_v33, 0.0 }
 0x227   : > { %v1842_v34 = vpop.f32.mrb[160].mxu1 }
 0x228   : > { %2039 = vst.msk [vmem:[#allocation2] sm:$0xff] %vm2038_vm6, %v2011_v50  ;;  %v2012_v30 = vmax.f32 %v7907_v58, %v1987_v40  ;;  %v1938_v10 = vmul.f32 %v7646_v3, %v1842_v34  ;;  %v6197_v63 = vpop.f32.mrb[161].mxu1  ;;  %v5629_v58 = vld [vmem:[%s8927_s4 + $0x8] sm:$0xf]  ;;  %v8063_v40 = vld [vmem:[%s8925_s2] ss:$0 sm:$0xff] }
 0x229   : > { %v1845_v36 = vpop.f32.mrb[162].mxu1  ;;  %v2511_v8 = vsel %vm666_vm0, %v5629_v58, 0 }
 0x22a   : > { %2040 = vst.msk [vmem:[#allocation2 + $0x8] sm:$0xff] %vm2038_vm6, %v2012_v30  ;;  %v1963_v17 = vadd.f32 %v7656_v13, %v1938_v10  ;;  %v1939_v38 = vmul.f32 %v7646_v3, %v1845_v36  ;;  %v6198_v46 = vpop.f32.mrb[163].mxu1 }
 0x22c   : > { %v1988_v22 = vmax.f32 %v1963_v17, 0.0  ;;  %v1964_v32 = vadd.f32 %v7656_v13, %v1939_v38 }
 0x22e   : > { %v2013_v52 = vmax.f32 %v7914_v44, %v1988_v22  ;;  %v1989_v57 = vmax.f32 %v1964_v32, 0.0 }
 0x22f   : > { %v1850_v59 = vpop.f32.mrb[164].mxu1  ;;  %v2064_v35 = vld [vmem:[#allocation2] sm:$0xff] }
 0x230   : > { %2041 = vst.msk [vmem:[#allocation2 + $0x10] sm:$0xff] %vm2038_vm6, %v2013_v52  ;;  %v2014_v5 = vmax.f32 %v7917_v49, %v1989_v57  ;;  %v1940_v61 = vmul.f32 %v7646_v3, %v1850_v59  ;;  %v6201_v25 = vpop.f32.mrb[165].mxu1 }
 0x231   : > { %v1853_v55 = vpop.f32.mrb[166].mxu1  ;;  %v2065_v45 = vld [vmem:[#allocation2 + $0x8] sm:$0xff] }
 0x232   : > { %2042 = vst.msk [vmem:[#allocation2 + $0x18] sm:$0xff] %vm2038_vm6, %v2014_v5  ;;  %v1965_v44 = vadd.f32 %v7656_v13, %v1940_v61  ;;  %v1941_v0 = vmul.f32 %v7646_v3, %v1853_v55  ;;  %v6202_v15 = vpop.f32.mrb[167].mxu1  ;;  %v2085_v6 = vpack.c.bf16 %v2065_v45, %v2064_v35  ;;  %v2097_v4 = vld [vmem:[#allocation2 + $0x1] sm:$0xff] }
 0x234   : > { %v1990_v11 = vmax.f32 %v1965_v44, 0.0  ;;  %v1966_v18 = vadd.f32 %v7656_v13, %v1941_v0  ;;  %6292 = vmatmul.mubr.msk.bf16.vlgmr.msra.gmra.mrb[0].mxu0 %vm2038_vm6, %v2085_v6 }
 0x235   : > { %6295 = vmatprep.mubr.msk.bf16.mxu0 %vm7283_vm2, %v7281_v2  ;;  %6336 = vmatpush3.bf16.msra.mxu0 %v2511_v8 }
 0x236   : > { %v2015_v49 = vmax.f32 %v7924_v14, %v1990_v11  ;;  %v1991_v27 = vmax.f32 %v1966_v18, 0.0  ;;  %6381 = vmatprep.subr.bf16.mxu0 %v7281_v2 }
 0x237   : > { %v1858_v9 = vpop.f32.mrb[168].mxu1  ;;  %v2098_v26 = vld [vmem:[#allocation2 + $0x9] sm:$0xff] }
 0x238   : > { %2043 = vst.msk [vmem:[#allocation2 + $0x20] sm:$0xff] %vm2038_vm6, %v2015_v49  ;;  %v2016_v28 = vmax.f32 %v7927_v21, %v1991_v27  ;;  %v1942_v29 = vmul.f32 %v7646_v3, %v1858_v9  ;;  %v6205_v62 = vpop.f32.mrb[169].mxu1  ;;  %v2118_v31 = vpack.c.bf16 %v2098_v26, %v2097_v4  ;;  %v2066_v33 = vld [vmem:[#allocation2 + $0x10] sm:$0xff] }
 0x239   : > { %v1861_v20 = vpop.f32.mrb[170].mxu1  ;;  %v2067_v50 = vld [vmem:[#allocation2 + $0x18] sm:$0xff] }
 0x23a   : > { %2044 = vst.msk [vmem:[#allocation2 + $0x28] sm:$0xff] %vm2038_vm6, %v2016_v28  ;;  %v1967_v14 = vadd.f32 %v7656_v13, %v1942_v29  ;;  %v1943_v34 = vmul.f32 %v8063_v40, %v1861_v20  ;;  %v6206_v30 = vpop.f32.mrb[171].mxu1  ;;  %6246 = vmatmul.mubr.msk.bf16.vlgmr.msra.gmra.mrb[208].mxu1 %vm2038_vm6, %v2118_v31  ;;  %v8067_v3 = vpack.c.bf16 %v2067_v50, %v2066_v33  ;;  %v8074_v13 = vld [vmem:[%s8926_s3] ss:$0 sm:$0xff]  ;;  %v2099_v38 = vld [vmem:[#allocation2 + $0x11] sm:$0xff] }
 0x23b   : > { %6249 = vmatprep.mubr.msk.bf16.mxu1 %vm7283_vm2, %v7281_v2 }
 0x23c   : > { %v1992_v21 = vmax.f32 %v1967_v14, 0.0  ;;  %v1968_v10 = vadd.f32 %v8074_v13, %v1943_v34  ;;  %6296 = vmatmul.mubr.msk.bf16.gmra.mrb[4].mxu0 %vm2038_vm6, %v8067_v3 }
 0x23d   : > { %6299 = vmatprep.mubr.msk.bf16.mxu0 %vm7283_vm2, %v7281_v2 }
 0x23e   : > { %v2017_v63 = vmax.f32 %v7934_v41, %v1992_v21  ;;  %v1993_v36 = vmax.f32 %v1968_v10, 0.0 }
 0x23f   : > { %v1866_v17 = vpop.f32.mrb[172].mxu1  ;;  %v2100_v46 = vld [vmem:[#allocation2 + $0x19] sm:$0xff] }
 0x240   : > { %2045 = vst.msk [vmem:[#allocation2 + $0x30] sm:$0xff] %vm2038_vm6, %v2017_v63  ;;  %v2018_v22 = vmax.f32 %v7937_v51, %v1993_v36  ;;  %v1944_v32 = vmul.f32 %v8063_v40, %v1866_v17  ;;  %v6209_v52 = vpop.f32.mrb[173].mxu1  ;;  %v2119_v57 = vpack.c.bf16 %v2100_v46, %v2099_v38  ;;  %v2068_v58 = vld [vmem:[#allocation2 + $0x20] sm:$0xff] }
 0x241   : > { %v1869_v59 = vpop.f32.mrb[174].mxu1  ;;  %v2069_v5 = vld [vmem:[#allocation2 + $0x28] sm:$0xff] }
 0x242   : > { %2046 = vst.msk [vmem:[#allocation2 + $0x38] sm:$0xff] %vm2038_vm6, %v2018_v22  ;;  %v1969_v61 = vadd.f32 %v8074_v13, %v1944_v32  ;;  %v1945_v41 = vmul.f32 %v8063_v40, %v1869_v59  ;;  %v6210_v25 = vpop.f32.mrb[175].mxu1  ;;  %6250 = vmatmul.mubr.msk.bf16.gmra.mrb[212].mxu1 %vm2038_vm6, %v2119_v57  ;;  %v8089_v55 = vpack.c.bf16 %v2069_v5, %v2068_v58  ;;  %v2101_v15 = vld [vmem:[#allocation2 + $0x21] sm:$0xff] }
 0x243   : > { %6253 = vmatprep.mubr.msk.bf16.mxu1 %vm7283_vm2, %v7281_v2 }
 0x244   : > { %v1994_v51 = vmax.f32 %v1969_v61, 0.0  ;;  %v1970_v35 = vadd.f32 %v8074_v13, %v1945_v41  ;;  %6300 = vmatmul.mubr.msk.bf16.gmra.mrb[8].mxu0 %vm2038_vm6, %v8089_v55 }
 0x245   : > { %6303 = vmatprep.mubr.msk.bf16.mxu0 %vm7283_vm2, %v7281_v2 }
 0x246   : > { %v2019_v45 = vmax.f32 %v7944_v16, %v1994_v51  ;;  %v1995_v44 = vmax.f32 %v1970_v35, 0.0 }
 0x247   : > { %v1874_v0 = vpop.f32.mrb[176].mxu1  ;;  %v2102_v6 = vld [vmem:[#allocation2 + $0x29] sm:$0xff] }
 0x248   : > { %2047 = vst.msk [vmem:[#allocation2 + $0x40] sm:$0xff] %vm2038_vm6, %v2019_v45  ;;  %v2020_v8 = vmax.f32 %v7947_v23, %v1995_v44  ;;  %v1946_v11 = vmul.f32 %v8063_v40, %v1874_v0  ;;  %v6213_v18 = vpop.f32.mrb[177].mxu1  ;;  %v2120_v49 = vpack.c.bf16 %v2102_v6, %v2101_v15  ;;  %v2070_v9 = vld [vmem:[#allocation2 + $0x30] sm:$0xff] }
 0x249   : > { %v1877_v27 = vpop.f32.mrb[178].mxu1  ;;  %v2071_v4 = vld [vmem:[#allocation2 + $0x38] sm:$0xff] }
 0x24a   : > { %2048 = vst.msk [vmem:[#allocation2 + $0x48] sm:$0xff] %vm2038_vm6, %v2020_v8  ;;  %v1971_v26 = vadd.f32 %v8074_v13, %v1946_v11  ;;  %v1947_v16 = vmul.f32 %v8063_v40, %v1877_v27  ;;  %v6214_v28 = vpop.f32.mrb[179].mxu1  ;;  %6254 = vmatmul.mubr.msk.bf16.gmra.mrb[216].mxu1 %vm2038_vm6, %v2120_v49  ;;  %v8106_v29 = vpack.c.bf16 %v2071_v4, %v2070_v9  ;;  %v2103_v50 = vld [vmem:[#allocation2 + $0x31] sm:$0xff] }
 0x24b   : > { %6257 = vmatprep.mubr.msk.bf16.mxu1 %vm7283_vm2, %v7281_v2 }
 0x24c   : > { %v1996_v23 = vmax.f32 %v1971_v26, 0.0  ;;  %v1972_v62 = vadd.f32 %v8074_v13, %v1947_v16  ;;  %6304 = vmatmul.mubr.msk.bf16.gmra.mrb[12].mxu0 %vm2038_vm6, %v8106_v29 }
 0x24d   : > { %6307 = vmatprep.mubr.msk.bf16.mxu0 %vm7283_vm2, %v7281_v2 }
 0x24e   : > { %v2021_v31 = vmax.f32 %v7954_v48, %v1996_v23  ;;  %v1997_v20 = vmax.f32 %v1972_v62, 0.0 }
 0x24f   : > { %v1882_v33 = vpop.f32.mrb[180].mxu1  ;;  %v2104_v14 = vld [vmem:[#allocation2 + $0x39] sm:$0xff] }
 0x250   : > { %2049 = vst.msk [vmem:[#allocation2 + $0x50] sm:$0xff] %vm2038_vm6, %v2021_v31  ;;  %v2022_v34 = vmax.f32 %v7957_v54, %v1997_v20  ;;  %v1948_v30 = vmul.f32 %v8063_v40, %v1882_v33  ;;  %v6217_v21 = vpop.f32.mrb[181].mxu1  ;;  %v2121_v10 = vpack.c.bf16 %v2104_v14, %v2103_v50  ;;  %v2072_v36 = vld [vmem:[#allocation2 + $0x40] sm:$0xff] }
 0x251   : > { %v1885_v63 = vpop.f32.mrb[182].mxu1  ;;  %v2073_v17 = vld [vmem:[#allocation2 + $0x48] sm:$0xff] }
 0x252   : > { %2050 = vst.msk [vmem:[#allocation2 + $0x58] sm:$0xff] %vm2038_vm6, %v2022_v34  ;;  %v1973_v38 = vadd.f32 %v8074_v13, %v1948_v30  ;;  %v1949_v48 = vmul.f32 %v8063_v40, %v1885_v63  ;;  %v6218_v46 = vpop.f32.mrb[183].mxu1  ;;  %6258 = vmatmul.mubr.msk.bf16.gmra.mrb[220].mxu1 %vm2038_vm6, %v2121_v10  ;;  %v8123_v22 = vpack.c.bf16 %v2073_v17, %v2072_v36  ;;  %v2105_v58 = vld [vmem:[#allocation2 + $0x41] sm:$0xff] }
 0x253   : > { %6261 = vmatprep.mubr.msk.bf16.mxu1 %vm7283_vm2, %v7281_v2 }
 0x254   : > { %v1998_v54 = vmax.f32 %v1973_v38, 0.0  ;;  %v1974_v32 = vadd.f32 %v8074_v13, %v1949_v48  ;;  %6308 = vmatmul.mubr.msk.bf16.gmra.mrb[16].mxu0 %vm2038_vm6, %v8123_v22 }
 0x255   : > { %6311 = vmatprep.mubr.msk.bf16.mxu0 %vm7283_vm2, %v7281_v2 }
 0x256   : > { %v2023_v52 = vmax.f32 %v7964_v19, %v1998_v54  ;;  %v1999_v57 = vmax.f32 %v1974_v32, 0.0 }
 0x257   : > { %v1890_v59 = vpop.f32.mrb[184].mxu1  ;;  %v2106_v5 = vld [vmem:[#allocation2 + $0x49] sm:$0xff] }
 0x258   : > { %2051 = vst.msk [vmem:[#allocation2 + $0x60] sm:$0xff] %vm2038_vm6, %v2023_v52  ;;  %v2024_v61 = vmax.f32 %v7967_v24, %v1999_v57  ;;  %v1950_v41 = vmul.f32 %v8063_v40, %v1890_v59  ;;  %v6221_v25 = vpop.f32.mrb[185].mxu1  ;;  %v2122_v51 = vpack.c.bf16 %v2106_v5, %v2105_v58  ;;  %v2074_v45 = vld [vmem:[#allocation2 + $0x50] sm:$0xff] }
 0x259   : > { %v1893_v35 = vpop.f32.mrb[186].mxu1  ;;  %v2075_v44 = vld [vmem:[#allocation2 + $0x58] sm:$0xff] }
 0x25a   : > { %2052 = vst.msk [vmem:[#allocation2 + $0x68] sm:$0xff] %vm2038_vm6, %v2024_v61  ;;  %v1975_v0 = vadd.f32 %v8074_v13, %v1950_v41  ;;  %v1951_v19 = vmul.f32 %v8063_v40, %v1893_v35  ;;  %v6222_v15 = vpop.f32.mrb[187].mxu1  ;;  %6262 = vmatmul.mubr.msk.bf16.gmra.mrb[224].mxu1 %vm2038_vm6, %v2122_v51  ;;  %v8140_v6 = vpack.c.bf16 %v2075_v44, %v2074_v45  ;;  %v2107_v27 = vld [vmem:[#allocation2 + $0x51] sm:$0xff] }
 0x25b   : > { %6265 = vmatprep.mubr.msk.bf16.mxu1 %vm7283_vm2, %v7281_v2 }
 0x25c   : > { %v2000_v24 = vmax.f32 %v1975_v0, 0.0  ;;  %v1976_v8 = vadd.f32 %v8074_v13, %v1951_v19  ;;  %6312 = vmatmul.mubr.msk.bf16.gmra.mrb[20].mxu0 %vm2038_vm6, %v8140_v6 }
 0x25d   : > { %6315 = vmatprep.mubr.msk.bf16.mxu0 %vm7283_vm2, %v7281_v2 }
 0x25e   : > { %v2025_v11 = vmax.f32 %v7974_v1, %v2000_v24  ;;  %v2001_v18 = vmax.f32 %v1976_v8, 0.0 }
 0x25f   : > { %v1898_v49 = vpop.f32.mrb[188].mxu1  ;;  %v2108_v9 = vld [vmem:[#allocation2 + $0x59] sm:$0xff] }
 0x260   : > { %2053 = vst.msk [vmem:[#allocation2 + $0x70] sm:$0xff] %vm2038_vm6, %v2025_v11  ;;  %v2026_v4 = vmax.f32 %v7977_v56, %v2001_v18  ;;  %v1952_v26 = vmul.f32 %v8063_v40, %v1898_v49  ;;  %v6225_v16 = vpop.f32.mrb[189].mxu1  ;;  %v2123_v28 = vpack.c.bf16 %v2108_v9, %v2107_v27  ;;  %v2076_v62 = vld [vmem:[#allocation2 + $0x60] sm:$0xff] }
 0x261   : > { %v1901_v23 = vpop.f32.mrb[190].mxu1  ;;  %v2077_v31 = vld [vmem:[#allocation2 + $0x68] sm:$0xff] }
 0x262   : > { %2054 = vst.msk [vmem:[#allocation2 + $0x78] sm:$0xff] %vm2038_vm6, %v2026_v4  ;;  %v1977_v20 = vadd.f32 %v8074_v13, %v1952_v26  ;;  %v1953_v1 = vmul.f32 %v8063_v40, %v1901_v23  ;;  %v6226_v33 = vpop.f32.mrb[191].mxu1  ;;  %6266 = vmatmul.mubr.msk.bf16.gmra.mrb[228].mxu1 %vm2038_vm6, %v2123_v28  ;;  %v8157_v50 = vpack.c.bf16 %v2077_v31, %v2076_v62  ;;  %v2109_v10 = vld [vmem:[#allocation2 + $0x61] sm:$0xff] }
 0x263   : > { %6269 = vmatprep.mubr.msk.bf16.mxu1 %vm7283_vm2, %v7281_v2 }
 0x264   : > { %v2002_v56 = vmax.f32 %v1977_v20, 0.0  ;;  %v1978_v14 = vadd.f32 %v8074_v13, %v1953_v1  ;;  %6316 = vmatmul.mubr.msk.bf16.gmra.mrb[24].mxu0 %vm2038_vm6, %v8157_v50 }
 0x265   : > { %6319 = vmatprep.mubr.msk.bf16.mxu0 %vm7283_vm2, %v7281_v2 }
 0x266   : > { %v2027_v34 = vmax.f32 %v7984_v60, %v2002_v56  ;;  %v2003_v30 = vmax.f32 %v1978_v14, 0.0 }
 0x267   : > { %v1906_v21 = vpop.f32.mrb[192].mxu1  ;;  %v2110_v63 = vld [vmem:[#allocation2 + $0x69] sm:$0xff] }
 0x268   : > { %2055 = vst.msk [vmem:[#allocation2 + $0x80] sm:$0xff] %vm2038_vm6, %v2027_v34  ;;  %v2028_v36 = vmax.f32 %v7987_v7, %v2003_v30  ;;  %v1954_v17 = vmul.f32 %v8063_v40, %v1906_v21  ;;  %v6229_v38 = vpop.f32.mrb[193].mxu1  ;;  %v2124_v48 = vpack.c.bf16 %v2110_v63, %v2109_v10  ;;  %v2078_v54 = vld [vmem:[#allocation2 + $0x70] sm:$0xff] }
 0x269   : > { %v1909_v46 = vpop.f32.mrb[194].mxu1  ;;  %v2079_v32 = vld [vmem:[#allocation2 + $0x78] sm:$0xff] }
 0x26a   : > { %2056 = vst.msk [vmem:[#allocation2 + $0x88] sm:$0xff] %vm2038_vm6, %v2028_v36  ;;  %v1979_v52 = vadd.f32 %v8074_v13, %v1954_v17  ;;  %v1955_v60 = vmul.f32 %v8063_v40, %v1909_v46  ;;  %v6230_v57 = vpop.f32.mrb[195].mxu1  ;;  %6270 = vmatmul.mubr.msk.bf16.gmra.mrb[232].mxu1 %vm2038_vm6, %v2124_v48  ;;  %v8174_v59 = vpack.c.bf16 %v2079_v32, %v2078_v54  ;;  %v2111_v25 = vld [vmem:[#allocation2 + $0x71] sm:$0xff] }
 0x26b   : > { %6273 = vmatprep.mubr.msk.bf16.mxu1 %vm7283_vm2, %v7281_v2 }
 0x26c   : > { %v2004_v7 = vmax.f32 %v1979_v52, 0.0  ;;  %v1980_v58 = vadd.f32 %v8074_v13, %v1955_v60  ;;  %6320 = vmatmul.mubr.msk.bf16.gmra.mrb[28].mxu0 %vm2038_vm6, %v8174_v59 }
 0x26d   : > { %6323 = vmatprep.mubr.msk.bf16.mxu0 %vm7283_vm2, %v7281_v2 }
 0x26e   : > { %v2029_v5 = vmax.f32 %v7994_v53, %v2004_v7  ;;  %v2005_v61 = vmax.f32 %v1980_v58, 0.0  ;;  %v2444_v58 = vld [vmem:[#allocation2 + $0xa] sm:$0xff] }
 0x26f   : > { %v1914_v41 = vpop.f32.mrb[196].mxu1  ;;  %v2112_v51 = vld [vmem:[#allocation2 + $0x79] sm:$0xff] }
 0x270   : > { %2057 = vst.msk [vmem:[#allocation2 + $0x90] sm:$0xff] %vm2038_vm6, %v2029_v5  ;;  %v2030_v35 = vmax.f32 %v7999_v12, %v2005_v61  ;;  %v1956_v45 = vmul.f32 %v8063_v40, %v1914_v41  ;;  %v6233_v44 = vpop.f32.mrb[197].mxu1  ;;  %v2125_v0 = vpack.c.bf16 %v2112_v51, %v2111_v25  ;;  %v2080_v15 = vld [vmem:[#allocation2 + $0x80] sm:$0xff]  ;;  %v2445_v51 = vld [vmem:[#allocation2 + $0x12] sm:$0xff] }
 0x271   : > { %v1917_v19 = vpop.f32.mrb[198].mxu1  ;;  %v2081_v24 = vld [vmem:[#allocation2 + $0x88] sm:$0xff] }
 0x272   : > { %2058 = vst.msk [vmem:[#allocation2 + $0x98] sm:$0xff] %vm2038_vm6, %v2030_v35  ;;  %v1981_v8 = vadd.f32 %v8074_v13, %v1956_v45  ;;  %v1957_v53 = vmul.f32 %v8063_v40, %v1917_v19  ;;  %v6234_v11 = vpop.f32.mrb[199].mxu1  ;;  %6274 = vmatmul.mubr.msk.bf16.gmra.mrb[236].mxu1 %vm2038_vm6, %v2125_v0  ;;  %v8191_v18 = vpack.c.bf16 %v2081_v24, %v2080_v15  ;;  %v2113_v26 = vld [vmem:[#allocation2 + $0x81] sm:$0xff]  ;;  %v2448_v45 = vld [vmem:[#allocation2 + $0x2a] sm:$0xff]  ;;  %v2449_v15 = vld [vmem:[#allocation2 + $0x32] sm:$0xff] }
 0x273   : > { %6277 = vmatprep.mubr.msk.bf16.mxu1 %vm7283_vm2, %v7281_v2  ;;  %v2443_v61 = vld [vmem:[#allocation2 + $0x2] sm:$0xff]  ;;  %v2450_v19 = vld [vmem:[#allocation2 + $0x3a] sm:$0xff] }
 0x274   : > { %v2006_v12 = vmax.f32 %v1981_v8, 0.0  ;;  %v1982_v49 = vadd.f32 %v8074_v13, %v1957_v53  ;;  %6324 = vmatmul.mubr.msk.bf16.gmra.mrb[32].mxu0 %vm2038_vm6, %v8191_v18  ;;  %v2464_v41 = vpack.c.bf16 %v2444_v58, %v2443_v61  ;;  %v2447_v44 = vld [vmem:[#allocation2 + $0x22] sm:$0xff]  ;;  %v2467_v24 = vpack.c.bf16 %v2450_v19, %v2449_v15  ;;  %v2452_v8 = vld [vmem:[#allocation2 + $0x4a] sm:$0xff] }
 0x275   : > { %6327 = vmatprep.mubr.msk.bf16.mxu0 %vm7283_vm2, %v7281_v2  ;;  %v2466_v0 = vpack.c.bf16 %v2448_v45, %v2447_v44  ;;  %v2451_v53 = vld [vmem:[#allocation2 + $0x42] sm:$0xff] }
 0x276   : > { %v2031_v27 = vmax.f32 %v8006_v39, %v2006_v12  ;;  %v2007_v9 = vmax.f32 %v1982_v49, 0.0  ;;  %v2468_v11 = vpack.c.bf16 %v2452_v8, %v2451_v53  ;;  %v2454_v12 = vld [vmem:[#allocation2 + $0x5a] sm:$0xff]  ;;  %v2453_v49 = vld [vmem:[#allocation2 + $0x52] sm:$0xff]  ;;  %v2669_v19 = vld [vmem:[#allocation2 + $0x86] sm:$0xff] }
 0x277   : > { %v1922_v4 = vpop.f32.mrb[200].mxu1  ;;  %v2114_v16 = vld [vmem:[#allocation2 + $0x89] sm:$0xff]  ;;  %v2664_v58 = vld [vmem:[#allocation2 + $0x5e] sm:$0xff] }
 0x278   : > { %2059 = vst.msk [vmem:[#allocation2 + $0xa0] sm:$0xff] %vm2038_vm6, %v2031_v27  ;;  %v2032_v28 = vmax.f32 %v8009_v47, %v2007_v9  ;;  %v1958_v23 = vmul.f32 %v8063_v40, %v1922_v4  ;;  %v6237_v62 = vpop.f32.mrb[201].mxu1  ;;  %v2126_v31 = vpack.c.bf16 %v2114_v16, %v2113_v26  ;;  %v2082_v1 = vld [vmem:[#allocation2 + $0x90] sm:$0xff]  ;;  %v2469_v27 = vpack.c.bf16 %v2454_v12, %v2453_v49  ;;  %v2455_v4 = vld [vmem:[#allocation2 + $0x62] sm:$0xff]  ;;  %v2458_v16 = vld [vmem:[#allocation2 + $0x7a] sm:$0xff] }
 0x279   : > { %v1925_v20 = vpop.f32.mrb[202].mxu1  ;;  %v2083_v33 = vld [vmem:[#allocation2 + $0x98] sm:$0xff]  ;;  %v2456_v9 = vld [vmem:[#allocation2 + $0x6a] sm:$0xff] }
 0x27a   : > { %2060 = vst.msk [vmem:[#allocation2 + $0xa8] sm:$0xff] %vm2038_vm6, %v2032_v28  ;;  %v1983_v56 = vadd.f32 %v8074_v13, %v1958_v23  ;;  %v1959_v39 = vmul.f32 %v8063_v40, %v1925_v20  ;;  %6278 = vmatmul.mubr.msk.bf16.gmra.mrb[240].mxu1 %vm2038_vm6, %v2126_v31  ;;  %v8208_v14 = vpack.c.bf16 %v2083_v33, %v2082_v1  ;;  %v6238_v34 = vpop.f32.mrb[203].mxu1  ;;  %v2115_v36 = vld [vmem:[#allocation2 + $0x91] sm:$0xff]  ;;  %v2459_v31 = vld [vmem:[#allocation2 + $0x82] sm:$0xff] }
 0x27b   : > { %6281 = vmatprep.mubr.msk.bf16.mxu1 %vm7283_vm2, %v7281_v2  ;;  %v2470_v26 = vpack.c.bf16 %v2456_v9, %v2455_v4  ;;  %v2457_v28 = vld [vmem:[#allocation2 + $0x72] sm:$0xff]  ;;  %v2460_v62 = vld [vmem:[#allocation2 + $0x8a] sm:$0xff] }
 0x27c   : > { %v2008_v47 = vmax.f32 %v1983_v56, 0.0  ;;  %v1984_v30 = vadd.f32 %v8074_v13, %v1959_v39  ;;  %6328 = vmatmul.mubr.msk.bf16.gmra.mrb[36].mxu0 %vm2038_vm6, %v8208_v14  ;;  %v2471_v23 = vpack.c.bf16 %v2458_v16, %v2457_v28  ;;  %v2472_v20 = vpack.c.bf16 %v2460_v62, %v2459_v31  ;;  %v2461_v33 = vld [vmem:[#allocation2 + $0x92] sm:$0xff] }
 0x27d   : > { %6331 = vmatprep.mubr.msk.bf16.mxu0 %vm7283_vm2, %v7281_v2  ;;  %v2671_v49 = vld [vmem:[#allocation2 + $0x96] sm:$0xff]  ;;  %v2670_v9 = vld [vmem:[#allocation2 + $0x8e] sm:$0xff] }
 0x27e   : > { %v2033_v21 = vmax.f32 %v8016_v43, %v2008_v47  ;;  %v2009_v10 = vmax.f32 %v1984_v30, 0.0  ;;  %v2655_v47 = vld [vmem:[#allocation2 + $0x16] sm:$0xff]  ;;  %v5653_v30 = vld [vmem:[%s8927_s4 + $0x10] sm:$0xf]  ;;  %v8336_v4 = vpack.c.bf16 %v2671_v49, %v2670_v9 }
 0x27f   : > { %v1930_v63 = vpop.f32.mrb[204].mxu1  ;;  %v2116_v17 = vld [vmem:[#allocation2 + $0x99] sm:$0xff] }
 0x280   : > { %v8218_v38 = vld [vmem:[#allocation2 + $0xa0] sm:$0xff]  ;;  %2061 = vst.msk [vmem:[#allocation2 + $0xb0] sm:$0xff] %vm2038_vm6, %v2033_v21  ;;  %v2034_v48 = vmax.f32 %v8019_v42, %v2009_v10  ;;  %v1960_v46 = vmul.f32 %v8063_v40, %v1930_v63  ;;  %v2127_v54 = vpack.c.bf16 %v2116_v17, %v2115_v36  ;;  %v6241_v32 = vpop.f32.mrb[205].mxu1  ;;  %v2654_v21 = vld [vmem:[#allocation2 + $0xe] sm:$0xff]  ;;  %v2933_v63 = vsel %vm666_vm0, %v5653_v30, 0 }
 0x281   : > { %v1933_v52 = vpop.f32.mrb[206].mxu1  ;;  %v2095_v43 = vpack.c.bf16 %v8218_v38, %v8218_v38  ;;  %v2117_v42 = vld [vmem:[#allocation2 + $0xa1] sm:$0xff]  ;;  %v2675_v10 = vpack.c.bf16 %v2655_v47, %v2654_v21 }
 0x282   : > { %2062 = vst.msk [vmem:[#allocation2 + $0xb8] sm:$0xff] %vm2038_vm6, %v2034_v48  ;;  %v1985_v60 = vadd.f32 %v8074_v13, %v1960_v46  ;;  %6282 = vmatmul.mubr.msk.bf16.gmra.mrb[244].mxu1 %vm2038_vm6, %v2127_v54  ;;  %v6242_v57 = vpop.f32.mrb[207].mxu1  ;;  %v5641_v13 = vld [vmem:[%s8927_s4 + $0xc] sm:$0xf]  ;;  %v2128_v5 = vpack.c.bf16 %v2117_v42, %v2117_v42  ;;  %v2462_v1 = vld [vmem:[#allocation2 + $0x9a] sm:$0xff]  ;;  %v2463_v39 = vld [vmem:[#allocation2 + $0xa2] sm:$0xff] }
 0x283   : > { %6285 = vmatprep.mubr.msk.bf16.mxu1 %vm7283_vm2, %v7281_v2  ;;  %v2722_v25 = vsel %vm666_vm0, %v5641_v13, 0  ;;  %v2473_v56 = vpack.c.bf16 %v2462_v1, %v2461_v33  ;;  %v2474_v34 = vpack.c.bf16 %v2463_v39, %v2463_v39  ;;  %v2657_v36 = vld [vmem:[#allocation2 + $0x26] sm:$0xff]  ;;  %v2656_v17 = vld [vmem:[#allocation2 + $0x1e] sm:$0xff]  ;;  %v2659_v46 = vld [vmem:[#allocation2 + $0x36] sm:$0xff] }
 0x284   : > { %v2010_v7 = vmax.f32 %v1985_v60, 0.0  ;;  %6332 = vmatmul.mubr.msk.bf16.gmra.mrb[40].mxu0 %vm2038_vm6, %v2095_v43  ;;  %v8282_v48 = vpack.c.bf16 %v2657_v36, %v2656_v17  ;;  %v2658_v54 = vld [vmem:[#allocation2 + $0x2e] sm:$0xff]  ;;  %v2661_v52 = vld [vmem:[#allocation2 + $0x46] sm:$0xff]  ;;  %v2660_v60 = vld [vmem:[#allocation2 + $0x3e] sm:$0xff] }
 0x285   : > { %6337 = vmatprep.mubr.msk.bf16.mxu0 %vm7283_vm2, %v7281_v2  ;;  %v8288_v32 = vpack.c.bf16 %v2659_v46, %v2658_v54  ;;  %v8294_v43 = vpack.c.bf16 %v2661_v52, %v2660_v60  ;;  %v2663_v57 = vld [vmem:[#allocation2 + $0x56] sm:$0xff]  ;;  %v2672_v31 = vld [vmem:[#allocation2 + $0x9e] sm:$0xff] }
 0x286   : > { %v2035_v40 = vmax.f32 %v8024_v37, %v2010_v7  ;;  %v2446_v37 = vld [vmem:[#allocation2 + $0x1a] sm:$0xff]  ;;  %v2662_v7 = vld [vmem:[#allocation2 + $0x4e] sm:$0xff] }
 0x287   : > { %v2465_v35 = vpack.c.bf16 %v2446_v37, %v2445_v51  ;;  %v8300_v42 = vpack.c.bf16 %v2663_v57, %v2662_v7  ;;  %v2666_v51 = vld [vmem:[#allocation2 + $0x6e] sm:$0xff] }
 0x288   : > { %2063 = vst.msk [vmem:[#allocation2 + $0xc0] sm:$0xf] %vm2036_vm5, %v2035_v40  ;;  %v2665_v40 = vld [vmem:[#allocation2 + $0x66] sm:$0xff]  ;;  %v8356_v39 = vld [vmem:[#allocation2 + $0xae] sm:$0xff] }
 0x289   : > { %v8306_v13 = vpack.c.bf16 %v2665_v40, %v2664_v58  ;;  %v2685_v47 = vpack.c.bf16 %v8356_v39, %v8356_v39  ;;  %v5665_v36 = vld [vmem:[%s8927_s4 + $0x14] sm:$0xf]  ;;  %v2868_v40 = vld [vmem:[#allocation2 + $0x27] sm:$0xff] }
 0x28a   : > { %6286 = vmatmul.mubr.msk.bf16.gmra.mrb[248].mxu1 %vm2038_vm6, %v2128_v5  ;;  %v2865_v46 = vld [vmem:[#allocation2 + $0xf] sm:$0xff]  ;;  %v3144_v52 = vsel %vm666_vm0, %v5665_v36, 0 }
 0x28b   : > { %v2873_v36 = vld [vmem:[#allocation2 + $0x4f] sm:$0xff] }
 0x28c   : > { %6338 = vmatmul.mubr.msk.bf16.vlgmr.msra.gmra.mrb[0].mxu0 %vm2038_vm6, %v2464_v41 }
 0x28d   : > { %6341 = vmatprep.mubr.msk.bf16.mxu0 %vm7283_vm2, %v7281_v2  ;;  %6382 = vmatpush3.bf16.msra.mxu0 %v2722_v25  ;;  %v2667_v25 = vld [vmem:[#allocation2 + $0x76] sm:$0xff] }
 0x28e   : > { %6427 = vmatprep.subr.bf16.mxu0 %v7281_v2 }
 0x294   : > { %6342 = vmatmul.mubr.msk.bf16.gmra.mrb[4].mxu0 %vm2038_vm6, %v2465_v35  ;;  %v8316_v35 = vpack.c.bf16 %v2667_v25, %v2666_v51 }
 0x295   : > { %6345 = vmatprep.mubr.msk.bf16.mxu0 %vm7283_vm2, %v7281_v2 }
 0x29c   : > { %6346 = vmatmul.mubr.msk.bf16.gmra.mrb[8].mxu0 %vm2038_vm6, %v2466_v0 }
 0x29d   : > { %6349 = vmatprep.mubr.msk.bf16.mxu0 %vm7283_vm2, %v7281_v2 }
 0x2a4   : > { %6350 = vmatmul.mubr.msk.bf16.gmra.mrb[12].mxu0 %vm2038_vm6, %v2467_v24  ;;  %v2668_v24 = vld [vmem:[#allocation2 + $0x7e] sm:$0xff] }
 0x2a5   : > { %6353 = vmatprep.mubr.msk.bf16.mxu0 %vm7283_vm2, %v7281_v2  ;;  %v8326_v8 = vpack.c.bf16 %v2669_v19, %v2668_v24  ;;  %v2870_v19 = vld [vmem:[#allocation2 + $0x37] sm:$0xff]  ;;  %v2869_v24 = vld [vmem:[#allocation2 + $0x2f] sm:$0xff] }
 0x2ac   : > { %6354 = vmatmul.mubr.msk.bf16.gmra.mrb[16].mxu0 %vm2038_vm6, %v2468_v11 }
 0x2ad   : > { %6357 = vmatprep.mubr.msk.bf16.mxu0 %vm7283_vm2, %v7281_v2 }
 0x2b4   : > { %6358 = vmatmul.mubr.msk.bf16.gmra.mrb[20].mxu0 %vm2038_vm6, %v2469_v27 }
 0x2b5   : > { %6361 = vmatprep.mubr.msk.bf16.mxu0 %vm7283_vm2, %v7281_v2 }
 0x2bc   : > { %6362 = vmatmul.mubr.msk.bf16.gmra.mrb[24].mxu0 %vm2038_vm6, %v2470_v26 }
 0x2bd   : > { %6365 = vmatprep.mubr.msk.bf16.mxu0 %vm7283_vm2, %v7281_v2 }
 0x2c4   : > { %6366 = vmatmul.mubr.msk.bf16.gmra.mrb[28].mxu0 %vm2038_vm6, %v2471_v23  ;;  %v2673_v23 = vld [vmem:[#allocation2 + $0xa6] sm:$0xff] }
 0x2c5   : > { %6369 = vmatprep.mubr.msk.bf16.mxu0 %vm7283_vm2, %v7281_v2 }
 0x2cc   : > { %6370 = vmatmul.mubr.msk.bf16.gmra.mrb[32].mxu0 %vm2038_vm6, %v2472_v20  ;;  %v8346_v20 = vpack.c.bf16 %v2673_v23, %v2672_v31 }
 0x2cd   : > { %6373 = vmatprep.mubr.msk.bf16.mxu0 %vm7283_vm2, %v7281_v2 }
 0x2d4   : > { %6374 = vmatmul.mubr.msk.bf16.gmra.mrb[36].mxu0 %vm2038_vm6, %v2473_v56 }
 0x2d5   : > { %6377 = vmatprep.mubr.msk.bf16.mxu0 %vm7283_vm2, %v7281_v2 }
 0x2dc   : > { %6378 = vmatmul.mubr.msk.bf16.gmra.mrb[40].mxu0 %vm2038_vm6, %v2474_v34 }
 0x2dd   : > { %6383 = vmatprep.mubr.msk.bf16.mxu0 %vm7283_vm2, %v7281_v2 }
 0x2e4   : > { %6384 = vmatmul.mubr.msk.bf16.vlgmr.msra.gmra.mrb[0].mxu0 %vm2038_vm6, %v2675_v10 }
 0x2e5   : > { %6387 = vmatprep.mubr.msk.bf16.mxu0 %vm7283_vm2, %v7281_v2  ;;  %6428 = vmatpush3.bf16.msra.mxu0 %v2933_v63  ;;  %v2866_v63 = vld [vmem:[#allocation2 + $0x17] sm:$0xff] }
 0x2e6   : > { %6473 = vmatprep.subr.bf16.mxu0 %v7281_v2  ;;  %v2886_v54 = vpack.c.bf16 %v2866_v63, %v2865_v46 }
 0x2ec   : > { %6388 = vmatmul.mubr.msk.bf16.gmra.mrb[4].mxu0 %vm2038_vm6, %v8282_v48 }
 0x2ed   : > { %6391 = vmatprep.mubr.msk.bf16.mxu0 %vm7283_vm2, %v7281_v2 }
 0x2f4   : > { %6392 = vmatmul.mubr.msk.bf16.gmra.mrb[8].mxu0 %vm2038_vm6, %v8288_v32 }
 0x2f5   : > { %6395 = vmatprep.mubr.msk.bf16.mxu0 %vm7283_vm2, %v7281_v2 }
 0x2fc   : > { %6396 = vmatmul.mubr.msk.bf16.gmra.mrb[12].mxu0 %vm2038_vm6, %v8294_v43 }
 0x2fd   : > { %6399 = vmatprep.mubr.msk.bf16.mxu0 %vm7283_vm2, %v7281_v2 }
 0x304   : > { %6400 = vmatmul.mubr.msk.bf16.gmra.mrb[16].mxu0 %vm2038_vm6, %v8300_v42 }
 0x305   : > { %6403 = vmatprep.mubr.msk.bf16.mxu0 %vm7283_vm2, %v7281_v2 }
 0x30c   : > { %6404 = vmatmul.mubr.msk.bf16.gmra.mrb[20].mxu0 %vm2038_vm6, %v8306_v13 }
 0x30d   : > { %v8310_v5 = vpop.f32.mrb[208].mxu1  ;;  %6407 = vmatprep.mubr.msk.bf16.mxu0 %vm7283_vm2, %v7281_v2 }
 0x30e   : > { %v6247_v61 = vpop.f32.mrb[209].mxu1 }
 0x30f   : > { %v8314_v41 = vpop.f32.mrb[210].mxu1  ;;  %v2867_v61 = vld [vmem:[#allocation2 + $0x1f] sm:$0xff] }
 0x310   : > { %v6248_v37 = vpop.f32.mrb[211].mxu1  ;;  %v2887_v25 = vpack.c.bf16 %v2868_v40, %v2867_v61 }
 0x314   : > { %6408 = vmatmul.mubr.msk.bf16.gmra.mrb[24].mxu0 %vm2038_vm6, %v8316_v35 }
 0x315   : > { %v8320_v45 = vpop.f32.mrb[212].mxu1  ;;  %6411 = vmatprep.mubr.msk.bf16.mxu0 %vm7283_vm2, %v7281_v2 }
 0x316   : > { %v6251_v44 = vpop.f32.mrb[213].mxu1 }
 0x317   : > { %v8324_v0 = vpop.f32.mrb[214].mxu1 }
 0x318   : > { %v6252_v15 = vpop.f32.mrb[215].mxu1 }
 0x31c   : > { %6412 = vmatmul.mubr.msk.bf16.gmra.mrb[28].mxu0 %vm2038_vm6, %v8326_v8 }
 0x31d   : > { %v8330_v53 = vpop.f32.mrb[216].mxu1  ;;  %6415 = vmatprep.mubr.msk.bf16.mxu0 %vm7283_vm2, %v7281_v2 }
 0x31e   : > { %v6255_v11 = vpop.f32.mrb[217].mxu1 }
 0x31f   : > { %v8334_v12 = vpop.f32.mrb[218].mxu1  ;;  %v2888_v11 = vpack.c.bf16 %v2870_v19, %v2869_v24  ;;  %v2879_v24 = vld [vmem:[#allocation2 + $0x7f] sm:$0xff] }
 0x320   : > { %v6256_v27 = vpop.f32.mrb[219].mxu1 }
 0x324   : > { %6416 = vmatmul.mubr.msk.bf16.gmra.mrb[32].mxu0 %vm2038_vm6, %v8336_v4 }
 0x325   : > { %v8340_v26 = vpop.f32.mrb[220].mxu1  ;;  %6419 = vmatprep.mubr.msk.bf16.mxu0 %vm7283_vm2, %v7281_v2 }
 0x326   : > { %v6259_v16 = vpop.f32.mrb[221].mxu1 }
 0x327   : > { %v8344_v28 = vpop.f32.mrb[222].mxu1  ;;  %v2872_v16 = vld [vmem:[#allocation2 + $0x47] sm:$0xff] }
 0x328   : > { %v6260_v62 = vpop.f32.mrb[223].mxu1 }
 0x329   : > { %v2871_v62 = vld [vmem:[#allocation2 + $0x3f] sm:$0xff] }
 0x32a   : > { %v2889_v31 = vpack.c.bf16 %v2872_v16, %v2871_v62  ;;  %v2881_v16 = vld [vmem:[#allocation2 + $0x8f] sm:$0xff]  ;;  %v2884_v62 = vld [vmem:[#allocation2 + $0xa7] sm:$0xff] }
 0x32c   : > { %6420 = vmatmul.mubr.msk.bf16.gmra.mrb[36].mxu0 %vm2038_vm6, %v8346_v20 }
 0x32d   : > { %v8350_v1 = vpop.f32.mrb[224].mxu1  ;;  %6423 = vmatprep.mubr.msk.bf16.mxu0 %vm7283_vm2, %v7281_v2 }
 0x32e   : > { %v6263_v33 = vpop.f32.mrb[225].mxu1 }
 0x32f   : > { %v8354_v56 = vpop.f32.mrb[226].mxu1 }
 0x330   : > { %v6264_v34 = vpop.f32.mrb[227].mxu1 }
 0x334   : > { %6424 = vmatmul.mubr.msk.bf16.gmra.mrb[40].mxu0 %vm2038_vm6, %v2685_v47 }
 0x335   : > { %v8361_v30 = vpop.f32.mrb[228].mxu1  ;;  %6429 = vmatprep.mubr.msk.bf16.mxu0 %vm7283_vm2, %v7281_v2 }
 0x336   : > { %v6267_v21 = vpop.f32.mrb[229].mxu1 }
 0x337   : > { %v8365_v10 = vpop.f32.mrb[230].mxu1  ;;  %v2874_v21 = vld [vmem:[#allocation2 + $0x57] sm:$0xff] }
 0x338   : > { %v6268_v17 = vpop.f32.mrb[231].mxu1 }
 0x339   : > { %v2890_v17 = vpack.c.bf16 %v2874_v21, %v2873_v36  ;;  %v2885_v21 = vld [vmem:[#allocation2 + $0xaf] sm:$0xff]  ;;  %v5677_v36 = vld [vmem:[%s8927_s4 + $0x18] sm:$0xf] }
 0x33c   : > { %6430 = vmatmul.mubr.msk.bf16.vlgmr.msra.gmra.mrb[0].mxu0 %vm2038_vm6, %v2886_v54 }
 0x33d   : > { %v8372_v60 = vpop.f32.mrb[232].mxu1  ;;  %6433 = vmatprep.mubr.msk.bf16.mxu0 %vm7283_vm2, %v7281_v2  ;;  %6474 = vmatpush3.bf16.msra.mxu0 %v3144_v52 }
 0x33e   : > { %v6271_v57 = vpop.f32.mrb[233].mxu1  ;;  %6519 = vmatprep.subr.bf16.mxu0 %v7281_v2 }
 0x33f   : > { %v8377_v7 = vpop.f32.mrb[234].mxu1  ;;  %v2876_v57 = vld [vmem:[#allocation2 + $0x67] sm:$0xff] }
 0x340   : > { %v6272_v58 = vpop.f32.mrb[235].mxu1 }
 0x341   : > { %v2875_v58 = vld [vmem:[#allocation2 + $0x5f] sm:$0xff] }
 0x342   : > { %v2891_v61 = vpack.c.bf16 %v2876_v57, %v2875_v58  ;;  %v3292_v57 = vld [vmem:[#allocation2 + $0x44] sm:$0xff] }
 0x344   : > { %6434 = vmatmul.mubr.msk.bf16.gmra.mrb[4].mxu0 %vm2038_vm6, %v2887_v25  ;;  %v2878_v25 = vld [vmem:[#allocation2 + $0x77] sm:$0xff] }
 0x345   : > { %v8380_v37 = vpop.f32.mrb[236].mxu1  ;;  %6437 = vmatprep.mubr.msk.bf16.mxu0 %vm7283_vm2, %v7281_v2 }
 0x346   : > { %v6275_v51 = vpop.f32.mrb[237].mxu1 }
 0x347   : > { %v8384_v44 = vpop.f32.mrb[238].mxu1  ;;  %v2877_v51 = vld [vmem:[#allocation2 + $0x6f] sm:$0xff] }
 0x348   : > { %v6276_v15 = vpop.f32.mrb[239].mxu1  ;;  %v2892_v19 = vpack.c.bf16 %v2878_v25, %v2877_v51  ;;  %v3293_v25 = vld [vmem:[#allocation2 + $0x4c] sm:$0xff] }
 0x349   : > { %v2880_v15 = vld [vmem:[#allocation2 + $0x87] sm:$0xff] }
 0x34c   : > { %6438 = vmatmul.mubr.msk.bf16.gmra.mrb[8].mxu0 %vm2038_vm6, %v2888_v11  ;;  %v2893_v11 = vpack.c.bf16 %v2880_v15, %v2879_v24  ;;  %v3295_v15 = vld [vmem:[#allocation2 + $0x5c] sm:$0xff] }
 0x34d   : > { %v8387_v49 = vpop.f32.mrb[240].mxu1  ;;  %6441 = vmatprep.mubr.msk.bf16.mxu0 %vm7283_vm2, %v7281_v2 }
 0x34e   : > { %v6279_v27 = vpop.f32.mrb[241].mxu1 }
 0x34f   : > { %v8391_v9 = vpop.f32.mrb[242].mxu1  ;;  %v2882_v27 = vld [vmem:[#allocation2 + $0x97] sm:$0xff] }
 0x350   : > { %v6280_v23 = vpop.f32.mrb[243].mxu1 }
 0x351   : > { %v2894_v23 = vpack.c.bf16 %v2882_v27, %v2881_v16  ;;  %v3297_v27 = vld [vmem:[#allocation2 + $0x6c] sm:$0xff] }
 0x354   : > { %6442 = vmatmul.mubr.msk.bf16.gmra.mrb[12].mxu0 %vm2038_vm6, %v2889_v31  ;;  %v2883_v31 = vld [vmem:[#allocation2 + $0x9f] sm:$0xff] }
 0x355   : > { %v8394_v33 = vpop.f32.mrb[244].mxu1  ;;  %6445 = vmatprep.mubr.msk.bf16.mxu0 %vm7283_vm2, %v7281_v2 }
 0x356   : > { %v6283_v34 = vpop.f32.mrb[245].mxu1 }
 0x357   : > { %v8398_v47 = vpop.f32.mrb[246].mxu1  ;;  %v2895_v34 = vpack.c.bf16 %v2884_v62, %v2883_v31  ;;  %v3299_v62 = vld [vmem:[#allocation2 + $0x7c] sm:$0xff] }
 0x358   : > { %v6284_v63 = vpop.f32.mrb[247].mxu1 }
 0x359   : > { %v2896_v63 = vpack.c.bf16 %v2885_v21, %v2885_v21  ;;  %v3301_v21 = vld [vmem:[#allocation2 + $0x8c] sm:$0xff] }
 0x35c   : > { %6446 = vmatmul.mubr.msk.bf16.gmra.mrb[16].mxu0 %vm2038_vm6, %v2890_v17  ;;  %v3355_v17 = vsel %vm666_vm0, %v5677_v36, 0  ;;  %v3304_v36 = vld [vmem:[#allocation2 + $0xa4] sm:$0xff] }
 0x35d   : > { %v8401_v46 = vpop.f32.mrb[248].mxu1  ;;  %6449 = vmatprep.mubr.msk.bf16.mxu0 %vm7283_vm2, %v7281_v2 }
 0x35e   : > { %v6287_v54 = vpop.f32.mrb[249].mxu1 }
 0x35f   : > { %v2284_v52 = vpop.f32.mrb[250].mxu1  ;;  %v3289_v54 = vld [vmem:[#allocation2 + $0x2c] sm:$0xff] }
 0x360   : > { %v6288_v40 = vpop.f32.mrb[251].mxu1 }
 0x361   : > { %v3291_v40 = vld [vmem:[#allocation2 + $0x3c] sm:$0xff] }
 0x362   : > { %v3310_v58 = vpack.c.bf16 %v3292_v57, %v3291_v40  ;;  %v3500_v57 = vld [vmem:[#allocation2 + $0x2d] sm:$0xff] }
 0x364   : > { %6450 = vmatmul.mubr.msk.bf16.gmra.mrb[20].mxu0 %vm2038_vm6, %v2891_v61  ;;  %v3294_v61 = vld [vmem:[#allocation2 + $0x54] sm:$0xff] }
 0x365   : > { %6453 = vmatprep.mubr.msk.bf16.mxu0 %vm7283_vm2, %v7281_v2  ;;  %v3311_v51 = vpack.c.bf16 %v3294_v61, %v3293_v25  ;;  %v3502_v61 = vld [vmem:[#allocation2 + $0x3d] sm:$0xff] }
 0x36c   : > { %6454 = vmatmul.mubr.msk.bf16.gmra.mrb[24].mxu0 %vm2038_vm6, %v2892_v19  ;;  %v3296_v19 = vld [vmem:[#allocation2 + $0x64] sm:$0xff] }
 0x36d   : > { %6457 = vmatprep.mubr.msk.bf16.mxu0 %vm7283_vm2, %v7281_v2  ;;  %v3312_v24 = vpack.c.bf16 %v3296_v19, %v3295_v15  ;;  %v3504_v19 = vld [vmem:[#allocation2 + $0x4d] sm:$0xff] }
 0x374   : > { %6458 = vmatmul.mubr.msk.bf16.gmra.mrb[28].mxu0 %vm2038_vm6, %v2893_v11  ;;  %v3298_v11 = vld [vmem:[#allocation2 + $0x74] sm:$0xff] }
 0x375   : > { %6461 = vmatprep.mubr.msk.bf16.mxu0 %vm7283_vm2, %v7281_v2  ;;  %v3313_v16 = vpack.c.bf16 %v3298_v11, %v3297_v27  ;;  %v3506_v11 = vld [vmem:[#allocation2 + $0x5d] sm:$0xff] }
 0x37c   : > { %6462 = vmatmul.mubr.msk.bf16.gmra.mrb[32].mxu0 %vm2038_vm6, %v2894_v23  ;;  %v3300_v23 = vld [vmem:[#allocation2 + $0x84] sm:$0xff] }
 0x37d   : > { %6465 = vmatprep.mubr.msk.bf16.mxu0 %vm7283_vm2, %v7281_v2  ;;  %v3314_v31 = vpack.c.bf16 %v3300_v23, %v3299_v62  ;;  %v3508_v23 = vld [vmem:[#allocation2 + $0x6d] sm:$0xff] }
 0x384   : > { %6466 = vmatmul.mubr.msk.bf16.gmra.mrb[36].mxu0 %vm2038_vm6, %v2895_v34  ;;  %v3302_v34 = vld [vmem:[#allocation2 + $0x94] sm:$0xff] }
 0x385   : > { %6469 = vmatprep.mubr.msk.bf16.mxu0 %vm7283_vm2, %v7281_v2 }
 0x38c   : > { %6470 = vmatmul.mubr.msk.bf16.gmra.mrb[40].mxu0 %vm2038_vm6, %v2896_v63  ;;  %v3315_v63 = vpack.c.bf16 %v3302_v34, %v3301_v21  ;;  %v3510_v34 = vld [vmem:[#allocation2 + $0x7d] sm:$0xff] }
 0x38d   : > { %6475 = vmatprep.mubr.msk.bf16.mxu0 %vm7283_vm2, %v7281_v2 }
 0x394   : > { %6476 = vmatmul.mubr.msk.bf16.vlgmr.msra.gmra.mrb[0].mxu0 %vm2038_vm6, %v8067_v3  ;;  %v3095_v3 = vld [vmem:[#allocation2 + $0xa8] sm:$0xff] }
 0x395   : > { %6479 = vmatprep.mubr.msk.bf16.mxu0 %vm7283_vm2, %v7281_v2  ;;  %6520 = vmatpush3.bf16.msra.mxu0 %v3355_v17  ;;  %v3303_v17 = vld [vmem:[#allocation2 + $0x9c] sm:$0xff] }
 0x396   : > { %6565 = vmatprep.subr.bf16.mxu0 %v7281_v2 }
 0x39c   : > { %6480 = vmatmul.mubr.msk.bf16.gmra.mrb[4].mxu0 %vm2038_vm6, %v8089_v55  ;;  %v3106_v55 = vpack.c.bf16 %v3095_v3, %v8218_v38  ;;  %v3290_v38 = vld [vmem:[#allocation2 + $0x34] sm:$0xff]  ;;  %v3316_v3 = vpack.c.bf16 %v3304_v36, %v3303_v17 }
 0x39d   : > { %6483 = vmatprep.mubr.msk.bf16.mxu0 %vm7283_vm2, %v7281_v2  ;;  %v3309_v52 = vpack.c.bf16 %v3290_v38, %v3289_v54  ;;  %v3512_v36 = vld [vmem:[#allocation2 + $0x8d] sm:$0xff] }
 0x3a4   : > { %6484 = vmatmul.mubr.msk.bf16.gmra.mrb[8].mxu0 %vm2038_vm6, %v8106_v29  ;;  %v3096_v29 = vld [vmem:[#allocation2 + $0xb0] sm:$0xff] }
 0x3a5   : > { %6487 = vmatprep.mubr.msk.bf16.mxu0 %vm7283_vm2, %v7281_v2 }
 0x3ac   : > { %6488 = vmatmul.mubr.msk.bf16.gmra.mrb[12].mxu0 %vm2038_vm6, %v8123_v22  ;;  %v3107_v22 = vpack.c.bf16 %v3096_v29, %v3096_v29  ;;  %v3305_v29 = vld [vmem:[#allocation2 + $0xac] sm:$0xff] }
 0x3ad   : > { %6491 = vmatprep.mubr.msk.bf16.mxu0 %vm7283_vm2, %v7281_v2 }
 0x3b4   : > { %6492 = vmatmul.mubr.msk.bf16.gmra.mrb[16].mxu0 %vm2038_vm6, %v8140_v6  ;;  %v3288_v6 = vld [vmem:[#allocation2 + $0x24] sm:$0xff] }
 0x3b5   : > { %6495 = vmatprep.mubr.msk.bf16.mxu0 %vm7283_vm2, %v7281_v2 }
 0x3bc   : > { %6496 = vmatmul.mubr.msk.bf16.gmra.mrb[20].mxu0 %vm2038_vm6, %v8157_v50  ;;  %v5689_v50 = vld [vmem:[%s8927_s4 + $0x1c] sm:$0xf] }
 0x3bd   : > { %6499 = vmatprep.mubr.msk.bf16.mxu0 %vm7283_vm2, %v7281_v2 }
 0x3c4   : > { %6500 = vmatmul.mubr.msk.bf16.gmra.mrb[24].mxu0 %vm2038_vm6, %v8174_v59  ;;  %v3287_v59 = vld [vmem:[#allocation2 + $0x1c] sm:$0xff] }
 0x3c5   : > { %6503 = vmatprep.mubr.msk.bf16.mxu0 %vm7283_vm2, %v7281_v2 }
 0x3cc   : > { %6504 = vmatmul.mubr.msk.bf16.gmra.mrb[28].mxu0 %vm2038_vm6, %v8191_v18  ;;  %v3308_v18 = vpack.c.bf16 %v3288_v6, %v3287_v59  ;;  %v3307_v6 = vld [vmem:[#allocation2 + $0xbc] sm:$0xff]  ;;  %v3499_v59 = vld [vmem:[#allocation2 + $0x25] sm:$0xff] }
 0x3cd   : > { %6507 = vmatprep.mubr.msk.bf16.mxu0 %vm7283_vm2, %v7281_v2 }
 0x3d4   : > { %6508 = vmatmul.mubr.msk.bf16.gmra.mrb[32].mxu0 %vm2038_vm6, %v8208_v14  ;;  %v3566_v14 = vsel %vm666_vm0, %v5689_v50, 0  ;;  %v3318_v50 = vpack.c.bf16 %v3307_v6, %v3307_v6  ;;  %v3516_v6 = vld [vmem:[#allocation2 + $0xad] sm:$0xff] }
 0x3d5   : > { %6511 = vmatprep.mubr.msk.bf16.mxu0 %vm7283_vm2, %v7281_v2 }
 0x3dc   : > { %6512 = vmatmul.mubr.msk.bf16.gmra.mrb[36].mxu0 %vm2038_vm6, %v3106_v55  ;;  %v3306_v55 = vld [vmem:[#allocation2 + $0xb4] sm:$0xff] }
 0x3dd   : > { %6515 = vmatprep.mubr.msk.bf16.mxu0 %vm7283_vm2, %v7281_v2 }
 0x3e4   : > { %6516 = vmatmul.mubr.msk.bf16.gmra.mrb[40].mxu0 %vm2038_vm6, %v3107_v22  ;;  %v3317_v22 = vpack.c.bf16 %v3306_v55, %v3305_v29  ;;  %v3514_v55 = vld [vmem:[#allocation2 + $0x9d] sm:$0xff] }
 0x3e5   : > { %6521 = vmatprep.mubr.msk.bf16.mxu0 %vm7283_vm2, %v7281_v2 }
 0x3ec   : > { %6522 = vmatmul.mubr.msk.bf16.vlgmr.msra.gmra.mrb[0].mxu0 %vm2038_vm6, %v3308_v18  ;;  %v5701_v18 = vld [vmem:[%s8927_s4 + $0x20] sm:$0xf] }
 0x3ed   : > { %6525 = vmatprep.mubr.msk.bf16.mxu0 %vm7283_vm2, %v7281_v2  ;;  %6566 = vmatpush3.bf16.msra.mxu0 %v3566_v14  ;;  %v3498_v14 = vld [vmem:[#allocation2 + $0x1d] sm:$0xff]  ;;  %v3777_v54 = vsel %vm666_vm0, %v5701_v18, 0  ;;  %vm5393_vm0 = vcmask 785408  }
 0x3ee   : > { %6611 = vmatprep.subr.bf16.mxu0 %v7281_v2  ;;  %v3519_v38 = vpack.c.bf16 %v3499_v59, %v3498_v14  ;;  %v3518_v59 = vld [vmem:[#allocation2 + $0xbd] sm:$0xff] }
 0x3ef   : > { %v3529_v18 = vpack.c.bf16 %v3518_v59, %v3518_v59  ;;  %v8601_v14 = vld [vmem:[%s8929_s6] ss:$0 sm:$0xff] }
 0x3f4   : > { %6526 = vmatmul.mubr.msk.bf16.gmra.mrb[4].mxu0 %vm2038_vm6, %v3309_v52  ;;  %v3501_v52 = vld [vmem:[#allocation2 + $0x35] sm:$0xff] }
 0x3f5   : > { %6529 = vmatprep.mubr.msk.bf16.mxu0 %vm7283_vm2, %v7281_v2  ;;  %v3520_v40 = vpack.c.bf16 %v3501_v52, %v3500_v57 }
 0x3fc   : > { %6530 = vmatmul.mubr.msk.bf16.gmra.mrb[8].mxu0 %vm2038_vm6, %v3310_v58  ;;  %v3503_v58 = vld [vmem:[#allocation2 + $0x45] sm:$0xff] }
 0x3fd   : > { %6533 = vmatprep.mubr.msk.bf16.mxu0 %vm7283_vm2, %v7281_v2  ;;  %v3521_v25 = vpack.c.bf16 %v3503_v58, %v3502_v61 }
 0x404   : > { %6534 = vmatmul.mubr.msk.bf16.gmra.mrb[12].mxu0 %vm2038_vm6, %v3311_v51  ;;  %v3505_v51 = vld [vmem:[#allocation2 + $0x55] sm:$0xff] }
 0x405   : > { %6537 = vmatprep.mubr.msk.bf16.mxu0 %vm7283_vm2, %v7281_v2  ;;  %v3522_v15 = vpack.c.bf16 %v3505_v51, %v3504_v19 }
 0x40c   : > { %6538 = vmatmul.mubr.msk.bf16.gmra.mrb[16].mxu0 %vm2038_vm6, %v3312_v24  ;;  %v3507_v24 = vld [vmem:[#allocation2 + $0x65] sm:$0xff] }
 0x40d   : > { %6541 = vmatprep.mubr.msk.bf16.mxu0 %vm7283_vm2, %v7281_v2  ;;  %v3523_v27 = vpack.c.bf16 %v3507_v24, %v3506_v11 }
 0x414   : > { %6542 = vmatmul.mubr.msk.bf16.gmra.mrb[20].mxu0 %vm2038_vm6, %v3313_v16  ;;  %v3509_v16 = vld [vmem:[#allocation2 + $0x75] sm:$0xff] }
 0x415   : > { %6545 = vmatprep.mubr.msk.bf16.mxu0 %vm7283_vm2, %v7281_v2  ;;  %v3524_v62 = vpack.c.bf16 %v3509_v16, %v3508_v23 }
 0x41c   : > { %6546 = vmatmul.mubr.msk.bf16.gmra.mrb[24].mxu0 %vm2038_vm6, %v3314_v31  ;;  %v3511_v31 = vld [vmem:[#allocation2 + $0x85] sm:$0xff] }
 0x41d   : > { %6549 = vmatprep.mubr.msk.bf16.mxu0 %vm7283_vm2, %v7281_v2  ;;  %v3525_v21 = vpack.c.bf16 %v3511_v31, %v3510_v34 }
 0x424   : > { %6550 = vmatmul.mubr.msk.bf16.gmra.mrb[28].mxu0 %vm2038_vm6, %v3315_v63  ;;  %v3513_v63 = vld [vmem:[#allocation2 + $0x95] sm:$0xff] }
 0x425   : > { %6553 = vmatprep.mubr.msk.bf16.mxu0 %vm7283_vm2, %v7281_v2  ;;  %v3526_v17 = vpack.c.bf16 %v3513_v63, %v3512_v36 }
 0x42c   : > { %6554 = vmatmul.mubr.msk.bf16.gmra.mrb[32].mxu0 %vm2038_vm6, %v3316_v3  ;;  %v3515_v3 = vld [vmem:[#allocation2 + $0xa5] sm:$0xff] }
 0x42d   : > { %6557 = vmatprep.mubr.msk.bf16.mxu0 %vm7283_vm2, %v7281_v2  ;;  %v3527_v29 = vpack.c.bf16 %v3515_v3, %v3514_v55 }
 0x434   : > { %6558 = vmatmul.mubr.msk.bf16.gmra.mrb[36].mxu0 %vm2038_vm6, %v3317_v22  ;;  %v3517_v22 = vld [vmem:[#allocation2 + $0xb5] sm:$0xff] }
 0x435   : > { %6561 = vmatprep.mubr.msk.bf16.mxu0 %vm7283_vm2, %v7281_v2 }
 0x43c   : > { %6562 = vmatmul.mubr.msk.bf16.gmra.mrb[40].mxu0 %vm2038_vm6, %v3318_v50  ;;  %v3528_v50 = vpack.c.bf16 %v3517_v22, %v3516_v6 }
 0x43d   : > { %6567 = vmatprep.mubr.msk.bf16.mxu0 %vm7283_vm2, %v7281_v2 }
 0x444   : > { %6568 = vmatmul.mubr.msk.bf16.vlgmr.msra.gmra.mrb[0].mxu0 %vm2038_vm6, %v3519_v38 }
 0x445   : > { %6571 = vmatprep.mubr.msk.bf16.mxu0 %vm7283_vm2, %v7281_v2  ;;  %6612 = vmatpush3.bf16.msra.mxu0 %v3777_v54 }
 0x44c   : > { %6572 = vmatmul.mubr.msk.bf16.gmra.mrb[4].mxu0 %vm2038_vm6, %v3520_v40 }
 0x44d   : > { %6575 = vmatprep.mubr.msk.bf16.mxu0 %vm7283_vm2, %v7281_v2 }
 0x454   : > { %6576 = vmatmul.mubr.msk.bf16.gmra.mrb[8].mxu0 %vm2038_vm6, %v3521_v25 }
 0x455   : > { %6579 = vmatprep.mubr.msk.bf16.mxu0 %vm7283_vm2, %v7281_v2 }
 0x45c   : > { %6580 = vmatmul.mubr.msk.bf16.gmra.mrb[12].mxu0 %vm2038_vm6, %v3522_v15 }
 0x45d   : > { %6583 = vmatprep.mubr.msk.bf16.mxu0 %vm7283_vm2, %v7281_v2 }
 0x464   : > { %6584 = vmatmul.mubr.msk.bf16.gmra.mrb[16].mxu0 %vm2038_vm6, %v3523_v27 }
 0x465   : > { %6587 = vmatprep.mubr.msk.bf16.mxu0 %vm7283_vm2, %v7281_v2 }
 0x46c   : > { %6588 = vmatmul.mubr.msk.bf16.gmra.mrb[20].mxu0 %vm2038_vm6, %v3524_v62 }
 0x46d   : > { %6591 = vmatprep.mubr.msk.bf16.mxu0 %vm7283_vm2, %v7281_v2 }
 0x474   : > { %6592 = vmatmul.mubr.msk.bf16.gmra.mrb[24].mxu0 %vm2038_vm6, %v3525_v21 }
 0x475   : > { %6595 = vmatprep.mubr.msk.bf16.mxu0 %vm7283_vm2, %v7281_v2 }
 0x47c   : > { %6596 = vmatmul.mubr.msk.bf16.gmra.mrb[28].mxu0 %vm2038_vm6, %v3526_v17 }
 0x47d   : > { %6599 = vmatprep.mubr.msk.bf16.mxu0 %vm7283_vm2, %v7281_v2 }
 0x484   : > { %6600 = vmatmul.mubr.msk.bf16.gmra.mrb[32].mxu0 %vm2038_vm6, %v3527_v29 }
 0x485   : > { %6603 = vmatprep.mubr.msk.bf16.mxu0 %vm7283_vm2, %v7281_v2 }
 0x48c   : > { %6604 = vmatmul.mubr.msk.bf16.gmra.mrb[36].mxu0 %vm2038_vm6, %v3528_v50 }
 0x48d   : > { %6607 = vmatprep.mubr.msk.bf16.mxu0 %vm7283_vm2, %v7281_v2 }
 0x494   : > { %6608 = vmatmul.mubr.msk.bf16.gmra.mrb[40].mxu0 %vm2038_vm6, %v3529_v18 }
 0x495   : > { %6613 = vmatprep.mubr.msk.bf16.mxu0 %vm7283_vm2, %v7281_v2 }
 0x49c   : > { %6614 = vmatmul.mubr.msk.bf16.vlgmr.msra.gmra.mrb[0].mxu0 %vm2038_vm6, %v8282_v48  ;;  %v3728_v48 = vld [vmem:[#allocation2 + $0xb6] sm:$0xff] }
 0x49d   : > { %6617 = vmatprep.mubr.msk.bf16.mxu0 %vm7283_vm2, %v7281_v2 }
 0x4a4   : > { %6618 = vmatmul.mubr.msk.bf16.gmra.mrb[4].mxu0 %vm2038_vm6, %v8288_v32  ;;  %v3739_v32 = vpack.c.bf16 %v3728_v48, %v8356_v39 }
 0x4a5   : > { %6621 = vmatprep.mubr.msk.bf16.mxu0 %vm7283_vm2, %v7281_v2 }
 0x4ac   : > { %6622 = vmatmul.mubr.msk.bf16.gmra.mrb[8].mxu0 %vm2038_vm6, %v8294_v43  ;;  %v3729_v43 = vld [vmem:[#allocation2 + $0xbe] sm:$0xff] }
 0x4ad   : > { %6625 = vmatprep.mubr.msk.bf16.mxu0 %vm7283_vm2, %v7281_v2 }
 0x4b4   : > { %6626 = vmatmul.mubr.msk.bf16.gmra.mrb[12].mxu0 %vm2038_vm6, %v8300_v42  ;;  %v3740_v42 = vpack.c.bf16 %v3729_v43, %v3729_v43 }
 0x4b5   : > { %6629 = vmatprep.mubr.msk.bf16.mxu0 %vm7283_vm2, %v7281_v2 }
 0x4bc   : > { %6630 = vmatmul.mubr.msk.bf16.gmra.mrb[16].mxu0 %vm2038_vm6, %v8306_v13  ;;  %v7284_v13 = vmov 0.0|0.0  }
 0x4bd   : > { %6633 = vmatprep.mubr.msk.bf16.mxu0 %vm7283_vm2, %v7281_v2  ;;  %6768 = vmatprep.subr.bf16.mxu1 %v7284_v13 }
 0x4c4   : > { %6634 = vmatmul.mubr.msk.bf16.gmra.mrb[20].mxu0 %vm2038_vm6, %v8316_v35  ;;  %v4205_v35 = vld [vmem:[%s8933_s10 + $0x8] sm:$0xff] }
 0x4c5   : > { %6637 = vmatprep.mubr.msk.bf16.mxu0 %vm7283_vm2, %v7281_v2  ;;  %5716 = vmatprep.mubr.msk.f32.mxu1 %vm626_vm3, %v4205_v35 }
 0x4cc   : > { %6638 = vmatmul.mubr.msk.bf16.gmra.mrb[24].mxu0 %vm2038_vm6, %v8326_v8 }
 0x4cd   : > { %6641 = vmatprep.mubr.msk.bf16.mxu0 %vm7283_vm2, %v7281_v2 }
 0x4d4   : > { %6642 = vmatmul.mubr.msk.bf16.gmra.mrb[28].mxu0 %vm2038_vm6, %v8336_v4  ;;  %v8595_v4 = vld [vmem:[%s8928_s5] ss:$0 sm:$0xff] }
 0x4d5   : > { %6645 = vmatprep.mubr.msk.bf16.mxu0 %vm7283_vm2, %v7281_v2 }
 0x4dc   : > { %6646 = vmatmul.mubr.msk.bf16.gmra.mrb[32].mxu0 %vm2038_vm6, %v8346_v20 }
 0x4dd   : > { %6649 = vmatprep.mubr.msk.bf16.mxu0 %vm7283_vm2, %v7281_v2 }
 0x4e4   : > { %6650 = vmatmul.mubr.msk.bf16.gmra.mrb[36].mxu0 %vm2038_vm6, %v3739_v32 }
 0x4e5   : > { %6653 = vmatprep.mubr.msk.bf16.mxu0 %vm7283_vm2, %v7281_v2 }
 0x4ec   : > { %6654 = vmatmul.mubr.msk.bf16.gmra.mrb[40].mxu0 %vm2038_vm6, %v3740_v42 }
 0x56f   : > { %v3813_v8 = vpop.f32.mrb[0].mxu0 }
 0x570   : > { %v6802_v20 = vadd.f32 %v3813_v8, %v8310_v5  ;;  %v6615_v39 = vpop.f32.mrb[1].mxu0 }
 0x571   : > { %v3816_v38 = vpop.f32.mrb[2].mxu0 }
 0x572   : > { %v3927_v54 = vmul.f32 %v6802_v20, %v8595_v4  ;;  %v6803_v52 = vadd.f32 %v3816_v38, %v8314_v41  ;;  %v6616_v57 = vpop.f32.mrb[3].mxu0 }
 0x574   : > { %v3955_v40 = vadd.f32 %v8601_v14, %v3927_v54  ;;  %v3928_v58 = vmul.f32 %v6803_v52, %v8595_v4 }
 0x576   : > { %v3976_v61 = vmax.f32 %v3955_v40, 0.0  ;;  %v3956_v25 = vadd.f32 %v8601_v14, %v3928_v58 }
 0x577   : > { %v3821_v5 = vpop.f32.mrb[4].mxu0 }
 0x578   : > { %v3977_v51 = vmax.f32 %v3956_v25, 0.0  ;;  %v6804_v19 = vadd.f32 %v3821_v5, %v8320_v45  ;;  %v6619_v15 = vpop.f32.mrb[5].mxu0  ;;  %v4018_v11 = vrot.slane %v3976_v61, 1 }
 0x579   : > { %v3824_v24 = vpop.f32.mrb[6].mxu0 }
 0x57a   : > { %v4019_v27 = vrot.slane %v3977_v51, 1  ;;  %v3929_v16 = vmul.f32 %v6804_v19, %v8595_v4  ;;  %v6805_v41 = vadd.f32 %v3824_v24, %v8324_v0  ;;  %v6620_v23 = vpop.f32.mrb[7].mxu0 }
 0x57c   : > { %v4020_v62 = vsel %vm4017_vm7, %v4018_v11, %v4019_v27  ;;  %v3957_v31 = vadd.f32 %v8601_v14, %v3929_v16  ;;  %v3930_v34 = vmul.f32 %v6805_v41, %v8595_v4 }
 0x57d   : > { %v4077_v21 = vmax.f32 %v3976_v61, %v4020_v62 }
 0x57e   : > { %v3978_v63 = vmax.f32 %v3957_v31, 0.0  ;;  %v3958_v45 = vadd.f32 %v8601_v14, %v3930_v34 }
 0x57f   : > { %v3829_v36 = vpop.f32.mrb[8].mxu0 }
 0x580   : > { %v4021_v17 = vrot.slane %v3978_v63, 1  ;;  %v3979_v3 = vmax.f32 %v3958_v45, 0.0  ;;  %v6806_v55 = vadd.f32 %v3829_v36, %v8330_v53  ;;  %v6623_v29 = vpop.f32.mrb[9].mxu0 }
 0x581   : > { %v3832_v22 = vpop.f32.mrb[10].mxu0 }
 0x582   : > { %v4022_v0 = vsel %vm4017_vm7, %v4019_v27, %v4021_v17  ;;  %v4023_v6 = vrot.slane %v3979_v3, 1  ;;  %v3931_v50 = vmul.f32 %v6806_v55, %v8595_v4  ;;  %v6807_v59 = vadd.f32 %v3832_v22, %v8334_v12  ;;  %v6624_v18 = vpop.f32.mrb[11].mxu0 }
 0x583   : > { %v4078_v48 = vmax.f32 %v3977_v51, %v4022_v0 }
 0x584   : > { %v4024_v32 = vsel %vm4017_vm7, %v4021_v17, %v4023_v6  ;;  %v3959_v43 = vadd.f32 %v8601_v14, %v3931_v50  ;;  %v3932_v42 = vmul.f32 %v6807_v59, %v8595_v4 }
 0x585   : > { %v8622_v35 = vmax.f32 %v3978_v63, %v4024_v32  ;;  %v4125_v38 = vrot.slane %v4078_v48, 6 }
 0x586   : > { %v3980_v53 = vmax.f32 %v3959_v43, 0.0  ;;  %v3960_v8 = vadd.f32 %v8601_v14, %v3932_v42 }
 0x587   : > { %v4126_v20 = vrot.slane %v8622_v35, 6  ;;  %v3837_v39 = vpop.f32.mrb[12].mxu0 }
 0x588   : > { %v4025_v54 = vrot.slane %v3980_v53, 1  ;;  %v3981_v12 = vmax.f32 %v3960_v8, 0.0  ;;  %v6808_v52 = vadd.f32 %v3837_v39, %v8340_v26  ;;  %v6627_v57 = vpop.f32.mrb[13].mxu0 }
 0x589   : > { %v3840_v40 = vpop.f32.mrb[14].mxu0  ;;  %v4127_v58 = vsel %vm4124_vm8, %v4125_v38, %v4126_v20 }
 0x58a   : > { %v4026_v61 = vsel %vm4017_vm7, %v4023_v6, %v4025_v54  ;;  %v4027_v25 = vrot.slane %v3981_v12, 1  ;;  %v3933_v5 = vmul.f32 %v6808_v52, %v8595_v4  ;;  %v6809_v51 = vadd.f32 %v3840_v40, %v8344_v28  ;;  %v6628_v19 = vpop.f32.mrb[15].mxu0 }
 0x58b   : > { %v4080_v15 = vmax.f32 %v3979_v3, %v4026_v61  ;;  %v4184_v24 = vmax.f32 %v4077_v21, %v4127_v58 }
 0x58c   : > { %v4028_v11 = vsel %vm4017_vm7, %v4025_v54, %v4027_v25  ;;  %v3961_v27 = vadd.f32 %v8601_v14, %v3933_v5  ;;  %v3934_v26 = vmul.f32 %v6809_v51, %v8595_v4 }
 0x58d   : > { %v4128_v16 = vrot.slane %v4080_v15, 6  ;;  %v8634_v41 = vmax.f32 %v3980_v53, %v4028_v11 }
 0x58e   : > { %v3982_v23 = vmax.f32 %v3961_v27, 0.0  ;;  %v3962_v62 = vadd.f32 %v8601_v14, %v3934_v26 }
 0x58f   : > { %v4130_v31 = vrot.slane %v8634_v41, 6  ;;  %v3845_v34 = vpop.f32.mrb[16].mxu0  ;;  %v4129_v28 = vsel %vm4124_vm8, %v4126_v20, %v4128_v16 }
 0x590   : > { %v4029_v63 = vrot.slane %v3982_v23, 1  ;;  %v3983_v45 = vmax.f32 %v3962_v62, 0.0  ;;  %v6810_v21 = vadd.f32 %v3845_v34, %v8350_v1  ;;  %v6631_v36 = vpop.f32.mrb[17].mxu0  ;;  %v4185_v17 = vmax.f32 %v4078_v48, %v4129_v28 }
 0x591   : > { %v3848_v3 = vpop.f32.mrb[18].mxu0  ;;  %v4131_v55 = vsel %vm4124_vm8, %v4128_v16, %v4130_v31 }
 0x592   : > { %v4030_v29 = vsel %vm4017_vm7, %v4027_v25, %v4029_v63  ;;  %v4031_v22 = vrot.slane %v3983_v45, 1  ;;  %v3935_v0 = vmul.f32 %v6810_v21, %v8595_v4  ;;  %v6811_v6 = vadd.f32 %v3848_v3, %v8354_v56  ;;  %v6632_v50 = vpop.f32.mrb[19].mxu0 }
 0x593   : > { %v4082_v59 = vmax.f32 %v3981_v12, %v4030_v29  ;;  %v6769_v18 = vpack.c.bf16 %v4185_v17, %v4184_v24  ;;  %v4186_v32 = vmax.f32 %v8622_v35, %v4131_v55 }
 0x594   : > { %v4032_v43 = vsel %vm4017_vm7, %v4029_v63, %v4031_v22  ;;  %v3963_v1 = vadd.f32 %v8601_v14, %v3935_v0  ;;  %v3936_v48 = vmul.f32 %v6811_v6, %v8595_v4 }
 0x595   : > { %v4132_v42 = vrot.slane %v4082_v59, 6  ;;  %v8648_v53 = vmax.f32 %v3982_v23, %v4032_v43  ;;  %6770 = vmatpush1.bf16.msra.mxu1 %v6769_v18 }
 0x596   : > { %v3984_v8 = vmax.f32 %v3963_v1, 0.0  ;;  %v3964_v20 = vadd.f32 %v8601_v14, %v3936_v48  ;;  %6771 = vmatprep.subr.bf16.mxu1 %v7284_v13 }
 0x597   : > { %v4134_v56 = vrot.slane %v8648_v53, 6  ;;  %v3853_v39 = vpop.f32.mrb[20].mxu0  ;;  %v4133_v35 = vsel %vm4124_vm8, %v4130_v31, %v4132_v42 }
 0x598   : > { %v4033_v38 = vrot.slane %v3984_v8, 1  ;;  %v3985_v54 = vmax.f32 %v3964_v20, 0.0  ;;  %v6812_v12 = vadd.f32 %v3853_v39, %v8361_v30  ;;  %v6635_v52 = vpop.f32.mrb[21].mxu0  ;;  %v4187_v57 = vmax.f32 %v4080_v15, %v4133_v35 }
 0x599   : > { %v3856_v40 = vpop.f32.mrb[22].mxu0  ;;  %v4135_v58 = vsel %vm4124_vm8, %v4132_v42, %v4134_v56 }
 0x59a   : > { %v4034_v61 = vsel %vm4017_vm7, %v4031_v22, %v4033_v38  ;;  %v4035_v25 = vrot.slane %v3985_v54, 1  ;;  %v3937_v5 = vmul.f32 %v6812_v12, %v8595_v4  ;;  %v6813_v51 = vadd.f32 %v3856_v40, %v8365_v10  ;;  %v6636_v19 = vpop.f32.mrb[23].mxu0 }
 0x59b   : > { %v4084_v24 = vmax.f32 %v3983_v45, %v4034_v61  ;;  %v6772_v11 = vpack.c.bf16 %v4187_v57, %v4186_v32  ;;  %v4188_v27 = vmax.f32 %v8634_v41, %v4135_v58 }
 0x59c   : > { %v4036_v26 = vsel %vm4017_vm7, %v4033_v38, %v4035_v25  ;;  %v3965_v30 = vadd.f32 %v8601_v14, %v3937_v5  ;;  %v3938_v15 = vmul.f32 %v6813_v51, %v8595_v4 }
 0x59d   : > { %v4136_v16 = vrot.slane %v4084_v24, 6  ;;  %v8663_v23 = vmax.f32 %v3984_v8, %v4036_v26  ;;  %6773 = vmatpush1.bf16.msra.mxu1 %v6772_v11 }
 0x59e   : > { %v3986_v62 = vmax.f32 %v3965_v30, 0.0  ;;  %v3966_v31 = vadd.f32 %v8601_v14, %v3938_v15  ;;  %6774 = vmatprep.subr.bf16.mxu1 %v7284_v13 }
 0x59f   : > { %v4138_v10 = vrot.slane %v8663_v23, 6  ;;  %v3861_v34 = vpop.f32.mrb[24].mxu0  ;;  %v4137_v41 = vsel %vm4124_vm8, %v4134_v56, %v4136_v16 }
 0x5a0   : > { %v4037_v28 = vrot.slane %v3986_v62, 1  ;;  %v3987_v63 = vmax.f32 %v3966_v31, 0.0  ;;  %v6814_v45 = vadd.f32 %v3861_v34, %v8372_v60  ;;  %v6639_v21 = vpop.f32.mrb[25].mxu0  ;;  %v4189_v36 = vmax.f32 %v4082_v59, %v4137_v41 }
 0x5a1   : > { %v3864_v17 = vpop.f32.mrb[26].mxu0  ;;  %v4139_v3 = vsel %vm4124_vm8, %v4136_v16, %v4138_v10 }
 0x5a2   : > { %v4038_v55 = vsel %vm4017_vm7, %v4035_v25, %v4037_v28  ;;  %v4039_v29 = vrot.slane %v3987_v63, 1  ;;  %v3939_v22 = vmul.f32 %v6814_v45, %v8595_v4  ;;  %v6815_v0 = vadd.f32 %v3864_v17, %v8377_v7  ;;  %v6640_v6 = vpop.f32.mrb[27].mxu0 }
 0x5a3   : > { %v4086_v50 = vmax.f32 %v3985_v54, %v4038_v55  ;;  %v6775_v18 = vpack.c.bf16 %v4189_v36, %v4188_v27  ;;  %v4190_v32 = vmax.f32 %v8648_v53, %v4139_v3 }
 0x5a4   : > { %v4040_v43 = vsel %vm4017_vm7, %v4037_v28, %v4039_v29  ;;  %v3967_v60 = vadd.f32 %v8601_v14, %v3939_v22  ;;  %v3940_v59 = vmul.f32 %v6815_v0, %v8595_v4 }
 0x5a5   : > { %v4140_v1 = vrot.slane %v4086_v50, 6  ;;  %v8678_v48 = vmax.f32 %v3986_v62, %v4040_v43  ;;  %6776 = vmatpush1.bf16.msra.mxu1 %v6775_v18 }
 0x5a6   : > { %v3988_v42 = vmax.f32 %v3967_v60, 0.0  ;;  %v3968_v8 = vadd.f32 %v8601_v14, %v3940_v59  ;;  %6777 = vmatprep.subr.bf16.mxu1 %v7284_v13 }
 0x5a7   : > { %v4142_v7 = vrot.slane %v8678_v48, 6  ;;  %v3869_v20 = vpop.f32.mrb[28].mxu0  ;;  %v4141_v53 = vsel %vm4124_vm8, %v4138_v10, %v4140_v1 }
 0x5a8   : > { %v4041_v56 = vrot.slane %v3988_v42, 1  ;;  %v3989_v39 = vmax.f32 %v3968_v8, 0.0  ;;  %v6816_v35 = vadd.f32 %v3869_v20, %v8380_v37  ;;  %v6643_v38 = vpop.f32.mrb[29].mxu0  ;;  %v4191_v54 = vmax.f32 %v4084_v24, %v4141_v53 }
 0x5a9   : > { %v3872_v12 = vpop.f32.mrb[30].mxu0  ;;  %v4143_v52 = vsel %vm4124_vm8, %v4140_v1, %v4142_v7 }
 0x5aa   : > { %v4042_v57 = vsel %vm4017_vm7, %v4039_v29, %v4041_v56  ;;  %v4043_v40 = vrot.slane %v3989_v39, 1  ;;  %v3941_v58 = vmul.f32 %v6816_v35, %v8595_v4  ;;  %v6817_v61 = vadd.f32 %v3872_v12, %v8384_v44  ;;  %v6644_v25 = vpop.f32.mrb[31].mxu0 }
 0x5ab   : > { %v4088_v5 = vmax.f32 %v3987_v63, %v4042_v57  ;;  %v6778_v51 = vpack.c.bf16 %v4191_v54, %v4190_v32  ;;  %v4192_v19 = vmax.f32 %v8663_v23, %v4143_v52 }
 0x5ac   : > { %v4044_v11 = vsel %vm4017_vm7, %v4041_v56, %v4043_v40  ;;  %v3969_v37 = vadd.f32 %v8601_v14, %v3941_v58  ;;  %v3942_v24 = vmul.f32 %v6817_v61, %v8595_v4 }
 0x5ad   : > { %v4144_v27 = vrot.slane %v4088_v5, 6  ;;  %v8693_v26 = vmax.f32 %v3988_v42, %v4044_v11  ;;  %6779 = vmatpush1.bf16.msra.mxu1 %v6778_v51 }
 0x5ae   : > { %v3990_v30 = vmax.f32 %v3969_v37, 0.0  ;;  %v3970_v15 = vadd.f32 %v8601_v14, %v3942_v24  ;;  %6780 = vmatprep.subr.bf16.mxu1 %v7284_v13 }
 0x5af   : > { %v4146_v44 = vrot.slane %v8693_v26, 6  ;;  %v3877_v16 = vpop.f32.mrb[32].mxu0  ;;  %v4145_v23 = vsel %vm4124_vm8, %v4142_v7, %v4144_v27 }
 0x5b0   : > { %v4045_v62 = vrot.slane %v3990_v30, 1  ;;  %v3991_v31 = vmax.f32 %v3970_v15, 0.0  ;;  %v6818_v10 = vadd.f32 %v3877_v16, %v8387_v49  ;;  %v6647_v34 = vpop.f32.mrb[33].mxu0  ;;  %v4193_v41 = vmax.f32 %v4086_v50, %v4145_v23 }
 0x5b1   : > { %v3880_v28 = vpop.f32.mrb[34].mxu0  ;;  %v4147_v63 = vsel %vm4124_vm8, %v4144_v27, %v4146_v44 }
 0x5b2   : > { %v4046_v45 = vsel %vm4017_vm7, %v4043_v40, %v4045_v62  ;;  %v4047_v21 = vrot.slane %v3991_v31, 1  ;;  %v3943_v36 = vmul.f32 %v6818_v10, %v8595_v4  ;;  %v6819_v17 = vadd.f32 %v3880_v28, %v8391_v9  ;;  %v6648_v3 = vpop.f32.mrb[35].mxu0 }
 0x5b3   : > { %v4090_v55 = vmax.f32 %v3989_v39, %v4046_v45  ;;  %v6781_v29 = vpack.c.bf16 %v4193_v41, %v4192_v19  ;;  %v4194_v22 = vmax.f32 %v8678_v48, %v4147_v63 }
 0x5b4   : > { %v4048_v0 = vsel %vm4017_vm7, %v4045_v62, %v4047_v21  ;;  %v3971_v49 = vadd.f32 %v8601_v14, %v3943_v36  ;;  %v3944_v6 = vmul.f32 %v6819_v17, %v8595_v4 }
 0x5b5   : > { %v4148_v50 = vrot.slane %v4090_v55, 6  ;;  %v8708_v18 = vmax.f32 %v3990_v30, %v4048_v0  ;;  %6782 = vmatpush1.bf16.msra.mxu1 %v6781_v29 }
 0x5b6   : > { %v3992_v32 = vmax.f32 %v3971_v49, 0.0  ;;  %v3972_v43 = vadd.f32 %v8601_v14, %v3944_v6  ;;  %6783 = vmatprep.subr.bf16.mxu1 %v7284_v13 }
 0x5b7   : > { %v4150_v9 = vrot.slane %v8708_v18, 6  ;;  %v3885_v60 = vpop.f32.mrb[36].mxu0  ;;  %v4149_v59 = vsel %vm4124_vm8, %v4146_v44, %v4148_v50 }
 0x5b8   : > { %v4049_v1 = vrot.slane %v3992_v32, 1  ;;  %v3993_v48 = vmax.f32 %v3972_v43, 0.0  ;;  %v6820_v42 = vadd.f32 %v3885_v60, %v8394_v33  ;;  %v6651_v8 = vpop.f32.mrb[37].mxu0  ;;  %v4195_v7 = vmax.f32 %v4088_v5, %v4149_v59 }
 0x5b9   : > { %v3888_v20 = vpop.f32.mrb[38].mxu0  ;;  %v4151_v53 = vsel %vm4124_vm8, %v4148_v50, %v4150_v9  ;;  %v4207_v8 = vld [vmem:[%s8933_s10 + $0x18] sm:$0xff] }
 0x5ba   : > { %v4050_v56 = vsel %vm4017_vm7, %v4047_v21, %v4049_v1  ;;  %v4051_v39 = vrot.slane %v3993_v48, 1  ;;  %v3945_v35 = vmul.f32 %v6820_v42, %v8595_v4  ;;  %v6821_v38 = vadd.f32 %v3888_v20, %v8398_v47  ;;  %v6652_v54 = vpop.f32.mrb[39].mxu0  ;;  %v4204_v42 = vld [vmem:[%s8933_s10] sm:$0xff]  ;;  %v4209_v20 = vld [vmem:[%s8933_s10 + $0x28] sm:$0xff] }
 0x5bb   : > { %v4092_v12 = vmax.f32 %v3991_v31, %v4050_v56  ;;  %v6784_v52 = vpack.c.bf16 %v4195_v7, %v4194_v22  ;;  %v4196_v57 = vmax.f32 %v8693_v26, %v4151_v53  ;;  %v4206_v7 = vld [vmem:[%s8933_s10 + $0x10] sm:$0xff]  ;;  %v4208_v53 = vld [vmem:[%s8933_s10 + $0x20] sm:$0xff]  ;;  %v4211_v56 = vld [vmem:[%s8933_s10 + $0x38] sm:$0xff] }
 0x5bc   : > { %v4052_v40 = vsel %vm4017_vm7, %v4049_v1, %v4051_v39  ;;  %v3973_v33 = vadd.f32 %v8601_v14, %v3945_v35  ;;  %v3946_v58 = vmul.f32 %v6821_v38, %v8595_v4  ;;  %v4213_v35 = vld [vmem:[%s8933_s10 + $0x48] sm:$0xf]  ;;  %v4212_v38 = vld [vmem:[%s8933_s10 + $0x40] sm:$0xf] }
 0x5bd   : > { %v4152_v61 = vrot.slane %v4092_v12, 6  ;;  %v4093_v25 = vmax.f32 %v3992_v32, %v4052_v40  ;;  %6785 = vmatpush1.bf16.msra.mxu1 %v6784_v52  ;;  %v7244_v54 = vld [vmem:[%s8930_s7 + $0x8] sm:$0xff]  }
 0x5be   : > { %v3994_v5 = vmax.f32 %v3973_v33, 0.0  ;;  %v3974_v51 = vadd.f32 %v8601_v14, %v3946_v58  ;;  %6786 = vmatprep.subr.bf16.mxu1 %v7284_v13 }
 0x5bf   : > { %v4154_v47 = vrot.slane %v4093_v25, 6  ;;  %v3893_v19 = vpop.f32.mrb[40].mxu0  ;;  %v4153_v11 = vsel %vm4124_vm8, %v4150_v9, %v4152_v61 }
 0x5c0   : > { %v4053_v37 = vrot.slane %v3994_v5, 1  ;;  %v3995_v24 = vmax.f32 %v3974_v51, 0.0  ;;  %v6822_v27 = vadd.f32 %v3893_v19, %v8401_v46  ;;  %v6655_v26 = vpop.f32.mrb[41].mxu0  ;;  %v4197_v30 = vmax.f32 %v4090_v55, %v4153_v11 }
 0x5c1   : > { %v3896_v15 = vpop.f32.mrb[42].mxu0  ;;  %v4155_v44 = vsel %vm4124_vm8, %v4152_v61, %v4154_v47 }
 0x5c2   : > { %v4054_v16 = vsel %vm4017_vm7, %v4051_v39, %v4053_v37  ;;  %v4055_v23 = vrot.slane %v3995_v24, 1  ;;  %v3947_v62 = vmul.f32 %v6822_v27, %v8595_v4  ;;  %v6656_v31 = vpop.f32.mrb[43].mxu0  ;;  %v6787_v10 = vpack.c.bf16 %v4197_v30, %v4196_v57  ;;  %v4210_v39 = vld [vmem:[%s8933_s10 + $0x30] sm:$0xff] }
 0x5c3   : > { %v4094_v34 = vmax.f32 %v3993_v48, %v4054_v16  ;;  %v4198_v41 = vmax.f32 %v8708_v18, %v4155_v44  ;;  %v7246_v15 = vld [vmem:[%s8930_s7 + $0x10] sm:$0xff]  }
 0x5c4   : > { %v4056_v28 = vsel %vm4017_vm7, %v4053_v37, %v4055_v23  ;;  %v3975_v63 = vadd.f32 %v8601_v14, %v3947_v62  ;;  %6788 = vmatpush1.bf16.msra.mxu1 %v6787_v10  ;;  %v4096_v14 = vmax.f32 %v3995_v24, %v4055_v23  ;;  %v7247_v10 = vld [vmem:[%s8930_s7 + $0x18] sm:$0xff]  }
 0x5c5   : > { %v4156_v46 = vrot.slane %v4094_v34, 6  ;;  %v4095_v45 = vmax.f32 %v3994_v5, %v4056_v28  ;;  %6789 = vmatprep.subr.bf16.mxu1 %v7284_v13 }
 0x5c6   : > { %v3996_v21 = vmax.f32 %v3975_v63, 0.0 }
 0x5c7   : > { %v4157_v36 = vsel %vm4124_vm8, %v4154_v47, %v4156_v46  ;;  %v4158_v17 = vrot.slane %v4095_v45, 6 }
 0x5c8   : > { %v4098_v3 = vrot.slane %v3996_v21, 1  ;;  %v4199_v4 = vmax.f32 %v4092_v12, %v4157_v36  ;;  %v7245_v12 = vld [vmem:[%s8930_s7] sm:$0xff]  }
 0x5c9   : > { %v4159_v55 = vsel %vm4124_vm8, %v4156_v46, %v4158_v17 }
 0x5ca   : > { %v4099_v29 = vsel %vm4017_vm7, %v4055_v23, %v4098_v3  ;;  %v4103_v22 = vmax.f32 %v3996_v21, %v4098_v3  ;;  %v6790_v0 = vpack.c.bf16 %v4199_v4, %v4198_v41  ;;  %v4200_v49 = vmax.f32 %v4093_v25, %v4159_v55  ;;  %v7249_v55 = vld [vmem:[%s8930_s7 + $0x28] sm:$0xff]  }
 0x5cb   : > { %v4102_v6 = vmax.f32 %v3995_v24, %v4099_v29 }
 0x5cc   : > { %v4162_v50 = vrot.slane %v4103_v22, 6  ;;  %6791 = vmatpush1.bf16.msra.mxu1 %v6790_v0 }
 0x5cd   : > { %v4160_v18 = vrot.slane %v4102_v6, 6  ;;  %6792 = vmatprep.subr.bf16.mxu1 %v7284_v13 }
 0x5ce   : > { %v4203_v32 = vmax.f32 %v4096_v14, %v4162_v50 }
 0x5cf   : > { %v4163_v43 = vsel %vm4124_vm8, %v4160_v18, %v4162_v50  ;;  %v4161_v9 = vsel %vm4124_vm8, %v4158_v17, %v4160_v18 }
 0x5d0   : > { %v4202_v60 = vmax.f32 %v4095_v45, %v4163_v43  ;;  %v4201_v59 = vmax.f32 %v4094_v34, %v4161_v9  ;;  %v7248_v45 = vld [vmem:[%s8930_s7 + $0x20] sm:$0xff]   ;;  %v7251_v43 = vld [vmem:[%s8930_s7 + $0x38] sm:$0xff]  }
 0x5d2   : > { %v6796_v1 = vpack.c.bf16 %v4203_v32, %v4202_v60  ;;  %v6793_v48 = vpack.c.bf16 %v4201_v59, %v4200_v49  ;;  %v7250_v49 = vld [vmem:[%s8930_s7 + $0x30] sm:$0xff]  }
 0x5d4   : > { %6794 = vmatpush1.bf16.msra.mxu1 %v6793_v48 }
 0x5d5   : > { %6795 = vmatprep.subr.bf16.mxu1 %v7284_v13 }
 0x5d8   : > { %6798 = vmatpush1.bf16.msk.msra.mxu1 %vm6797_vm11, %v6796_v1 }
 0x5d9   : > { %6657 = vmatprep.subr.bf16.mxu1 %v7244_v54 }
 0x5db   : > { %4298 = vmatmul.mubr.f32.vlgmr.msra.gmra.mrb[252].mxu1 %v4204_v42  ;;  %v7252_v42 = vld [vmem:[%s8930_s7 + $0x40] sm:$0xff]  }
 0x5dc   : > { %5717 = vmatprep.mubr.msk.f32.mxu1 %vm626_vm3, %v4207_v8  ;;  %6658 = vmatpush3.bf16.msra.mxu1 %v7244_v54  ;;  %v5765_v54 = vld [vmem:[%s8932_s9] ss:$0 sm:$0xff] }
 0x5dd   : > { %6663 = vmatprep.subr.bf16.mxu1 %v7245_v12 }
 0x5df   : > { %4303 = vmatmul.mubr.f32.gmra.mrb[254].mxu1 %v4206_v7 }
 0x5e0   : > { %5718 = vmatprep.mubr.msk.f32.mxu1 %vm626_vm3, %v4209_v20 }
 0x5e3   : > { %4308 = vmatmul.mubr.f32.gmra.mrb[0].mxu1 %v4208_v53 }
 0x5e4   : > { %5719 = vmatprep.mubr.msk.f32.mxu1 %vm626_vm3, %v4211_v56 }
 0x5e7   : > { %4313 = vmatmul.mubr.f32.gmra.mrb[2].mxu1 %v4210_v39 }
 0x5e8   : > { %5720 = vmatprep.mubr.msk.f32.mxu1 %vm626_vm3, %v4213_v35  ;;  %v5764_v35 = vld [vmem:[%s8931_s8] ss:$0 sm:$0xff] }
 0x5eb   : > { %4318 = vmatmul.mubr.f32.gmra.mrb[4].mxu1 %v4212_v38 }
 0x6ae   : > { %v4299_v52 = vpop.f32.mrb[252].mxu1 }
 0x6af   : > { %4326 = vst.msk [vmem:[#allocation3] sm:$0xff] %vm4325_vm13, %v4299_v52  ;;  %v4301_v57 = vpop.f32.mrb[253].mxu1 }
 0x6b2   : > { %v4304_v40 = vpop.f32.mrb[254].mxu1 }
 0x6b3   : > { %4327 = vst.msk [vmem:[#allocation3 + $0x8] sm:$0xff] %vm4325_vm13, %v4304_v40  ;;  %v4306_v33 = vpop.f32.mrb[255].mxu1 }
 0x6b6   : > { %v4309_v58 = vpop.f32.mrb[0].mxu1  ;;  %v4331_v30 = vld [vmem:[#allocation3] sm:$0xff] }
 0x6b7   : > { %4328 = vst.msk [vmem:[#allocation3 + $0x10] sm:$0xff] %vm4325_vm13, %v4309_v58  ;;  %v4311_v61 = vpop.f32.mrb[1].mxu1 }
 0x6ba   : > { %v4314_v25 = vpop.f32.mrb[2].mxu1  ;;  %v4338_v51 = vld [vmem:[#allocation3 + $0x1] sm:$0xff] }
 0x6bb   : > { %4329 = vst.msk [vmem:[#allocation3 + $0x18] sm:$0xff] %vm4325_vm13, %v4314_v25  ;;  %v4316_v5 = vpop.f32.mrb[3].mxu1  ;;  %v4332_v24 = vld [vmem:[#allocation3 + $0x8] sm:$0xff] }
 0x6bc   : > { %v4334_v44 = vpack.c.bf16 %v4332_v24, %v4331_v30  ;;  %v4466_v31 = vld [vmem:[#allocation3 + $0x2] sm:$0xff] }
 0x6bd   : > { %v4537_v46 = vld [vmem:[#allocation3 + $0x6] sm:$0xff] }
 0x6be   : > { %v4339_v47 = vld [vmem:[#allocation3 + $0x9] sm:$0xff]  ;;  %v4319_v19 = vpop.f32.mrb[4].mxu1 }
 0x6bf   : > { %v4341_v11 = vpack.c.bf16 %v4339_v47, %v4338_v51  ;;  %4330 = vst.msk [vmem:[#allocation3 + $0x20] sm:$0xf] %vm4323_vm12, %v4319_v19  ;;  %v4321_v37 = vpop.f32.mrb[5].mxu1  ;;  %v4333_v16 = vld [vmem:[#allocation3 + $0x10] sm:$0xff]  ;;  %v4608_v4 = vld [vmem:[#allocation3 + $0x7] sm:$0xff] }
 0x6c0   : > { %v4467_v23 = vld [vmem:[#allocation3 + $0xa] sm:$0xff]  ;;  %v4335_v62 = vpack.c.bf16 %v4333_v16, %v4333_v16  ;;  %v4682_v6 = vpack.c.bf16 %v4333_v16, %v4332_v24 }
 0x6c1   : > { %6659 = vmatprep.mubr.msk.bf16.mxu1 %vm4325_vm13, %v4341_v11  ;;  %v4469_v34 = vpack.c.bf16 %v4467_v23, %v4466_v31  ;;  %v4538_v28 = vld [vmem:[#allocation3 + $0xe] sm:$0xff] }
 0x6c2   : > { %v4340_v27 = vld [vmem:[#allocation3 + $0x11] sm:$0xff]  ;;  %v4540_v21 = vpack.c.bf16 %v4538_v28, %v4537_v46 }
 0x6c3   : > { %v4342_v26 = vpack.c.bf16 %v4340_v27, %v4340_v27  ;;  %v4468_v41 = vld [vmem:[#allocation3 + $0x12] sm:$0xff] }
 0x6c4   : > { %v4470_v63 = vpack.c.bf16 %v4468_v41, %v4468_v41  ;;  %v4539_v36 = vld [vmem:[#allocation3 + $0x16] sm:$0xff]  ;;  %v4750_v32 = vld [vmem:[#allocation3 + $0xc] sm:$0xff] }
 0x6c5   : > { %6660 = vmatmul.mubr.msk.bf16.vlgmr.msra.gmra.mrb[8].mxu1 %vm4325_vm13, %v4342_v26  ;;  %v4609_v17 = vld [vmem:[#allocation3 + $0xf] sm:$0xff]  ;;  %v4541_v3 = vpack.c.bf16 %v4539_v36, %v4539_v36  ;;  %v4610_v22 = vld [vmem:[#allocation3 + $0x17] sm:$0xff]  ;;  %v4895_v53 = vpack.c.bf16 %v4539_v36, %v4538_v28 }
 0x6c6   : > { %6665 = vmatprep.mubr.msk.bf16.mxu1 %vm4325_vm13, %v4334_v44  ;;  %6664 = vmatpush3.bf16.msra.mxu1 %v7245_v12  ;;  %v4611_v29 = vpack.c.bf16 %v4609_v17, %v4608_v4  ;;  %v4612_v0 = vpack.c.bf16 %v4610_v22, %v4610_v22  ;;  %v4681_v14 = vld [vmem:[#allocation3 + $0x18] sm:$0xff]  ;;  %v4821_v48 = vld [vmem:[#allocation3 + $0xd] sm:$0xff]  ;;  %v7258_v22 = vld [vmem:[%s8935_s12 + $0x28] sm:$0xff]  }
 0x6c7   : > { %6669 = vmatprep.subr.bf16.mxu1 %v7246_v15  ;;  %v4751_v50 = vld [vmem:[#allocation3 + $0x14] sm:$0xff]  ;;  %v4683_v18 = vpack.c.bf16 %v4681_v14, %v4681_v14  ;;  %v4752_v60 = vld [vmem:[#allocation3 + $0x1c] sm:$0xff]  ;;  %v7255_v36 = vld [vmem:[%s8935_s12 + $0x10] sm:$0xff]  }
 0x6c8   : > { %v4753_v9 = vpack.c.bf16 %v4751_v50, %v4750_v32  ;;  %v4822_v59 = vld [vmem:[#allocation3 + $0x15] sm:$0xff]  ;;  %v4754_v1 = vpack.c.bf16 %v4752_v60, %v4752_v60  ;;  %v4823_v7 = vld [vmem:[#allocation3 + $0x1d] sm:$0xff]  ;;  %v7263_v32 = vld [vmem:[%s8937_s14 + $0x10] sm:$0xff]  }
 0x6c9   : > { %v4824_v8 = vpack.c.bf16 %v4822_v59, %v4821_v48  ;;  %v4825_v20 = vpack.c.bf16 %v4823_v7, %v4823_v7  ;;  %v4894_v56 = vld [vmem:[#allocation3 + $0x1e] sm:$0xff]  ;;  %v7256_v4 = vld [vmem:[%s8935_s12 + $0x18] sm:$0xff]   ;;  %v5092_v59 = vld [vmem:[%s8936_s13] sm:$0x1] }
 0x6ca   : > { %v4896_v39 = vpack.c.bf16 %v4894_v56, %v4894_v56  ;;  %v7253_v46 = vld [vmem:[%s8935_s12] sm:$0xff]   ;;  %v7266_v60 = vld [vmem:[%s8937_s14 + $0x28] sm:$0xff]  }
 0x6cb   : > { %v7261_v14 = vld [vmem:[%s8937_s14] sm:$0xff]  }
 0x6d1   : > { %6666 = vmatmul.mubr.msk.bf16.vlgmr.msra.gmra.mrb[8].mxu1 %vm4325_vm13, %v4335_v62 }
 0x6d2   : > { %6671 = vmatprep.mubr.msk.bf16.mxu1 %vm4325_vm13, %v4469_v34  ;;  %6670 = vmatpush3.bf16.msra.mxu1 %v7246_v15 }
 0x6d3   : > { %6675 = vmatprep.subr.bf16.mxu1 %v7247_v10 }
 0x6dd   : > { %6672 = vmatmul.mubr.msk.bf16.vlgmr.msra.gmra.mrb[8].mxu1 %vm4325_vm13, %v4470_v63  ;;  %v5014_v63 = vld [vmem:[%s8934_s11] sm:$0xf] }
 0x6de   : > { %6677 = vmatprep.mubr.msk.bf16.mxu1 %vm4325_vm13, %v4540_v21  ;;  %6676 = vmatpush3.bf16.msra.mxu1 %v7247_v10 }
 0x6df   : > { %6681 = vmatprep.subr.bf16.mxu1 %v7248_v45 }
 0x6e9   : > { %6678 = vmatmul.mubr.msk.bf16.vlgmr.msra.gmra.mrb[8].mxu1 %vm4325_vm13, %v4541_v3 }
 0x6ea   : > { %6683 = vmatprep.mubr.msk.bf16.mxu1 %vm4325_vm13, %v4611_v29  ;;  %6682 = vmatpush3.bf16.msra.mxu1 %v7248_v45  ;;  %v7254_v45 = vld [vmem:[%s8935_s12 + $0x8] sm:$0xff]  }
 0x6eb   : > { %6687 = vmatprep.subr.bf16.mxu1 %v7249_v55 }
 0x6f5   : > { %6684 = vmatmul.mubr.msk.bf16.vlgmr.msra.gmra.mrb[8].mxu1 %vm4325_vm13, %v4612_v0  ;;  %v7259_v0 = vld [vmem:[%s8935_s12 + $0x30] sm:$0xff]  }
 0x6f6   : > { %6689 = vmatprep.mubr.msk.bf16.mxu1 %vm4325_vm13, %v4682_v6  ;;  %6688 = vmatpush3.bf16.msra.mxu1 %v7249_v55  ;;  %v7257_v55 = vld [vmem:[%s8935_s12 + $0x20] sm:$0xff]   ;;  %v7260_v6 = vld [vmem:[%s8935_s12 + $0x38] sm:$0xff]  }
 0x6f7   : > { %6693 = vmatprep.subr.bf16.mxu1 %v7250_v49 }
 0x701   : > { %6690 = vmatmul.mubr.msk.bf16.vlgmr.msra.gmra.mrb[8].mxu1 %vm4325_vm13, %v4683_v18  ;;  %v7262_v18 = vld [vmem:[%s8937_s14 + $0x8] sm:$0xff]  }
 0x702   : > { %6695 = vmatprep.mubr.msk.bf16.mxu1 %vm4325_vm13, %v4753_v9  ;;  %6694 = vmatpush3.bf16.msra.mxu1 %v7250_v49  ;;  %v7265_v9 = vld [vmem:[%s8937_s14 + $0x20] sm:$0xff]  }
 0x703   : > { %6699 = vmatprep.subr.bf16.mxu1 %v7251_v43 }
 0x70d   : > { %6696 = vmatmul.mubr.msk.bf16.vlgmr.msra.gmra.mrb[8].mxu1 %vm4325_vm13, %v4754_v1 }
 0x70e   : > { %6701 = vmatprep.mubr.msk.bf16.mxu1 %vm4325_vm13, %v4824_v8  ;;  %6700 = vmatpush3.bf16.msra.mxu1 %v7251_v43  ;;  %v7264_v43 = vld [vmem:[%s8937_s14 + $0x18] sm:$0xff]  }
 0x70f   : > { %6705 = vmatprep.subr.bf16.mxu1 %v7252_v42 }
 0x719   : > { %6702 = vmatmul.mubr.msk.bf16.vlgmr.msra.gmra.mrb[8].mxu1 %vm4325_vm13, %v4825_v20 }
 0x71a   : > { %6707 = vmatprep.mubr.msk.bf16.mxu1 %vm4325_vm13, %v4895_v53  ;;  %6706 = vmatpush3.bf16.msra.mxu1 %v7252_v42  ;;  %v5356_v53 = vld [vmem:[#allocation4] sm:$0x1] }
 0x71b   : > { %6799 = vmatprep.subr.bf16.mxu1 %v7284_v13 }
 0x725   : > { %6708 = vmatmul.mubr.msk.bf16.vlgmr.msra.gmra.mrb[8].mxu1 %vm4325_vm13, %v4896_v39 }
 0x726   : > { %6717 = vmatprep.mubr.msk.f32.mxu1 %vm7283_vm2, %v7281_v2 }
 0x7f8   : > { %v6709_v38 = vpop.f32.mrb[8].mxu1 }
 0x7f9   : > { %v4972_v12 = vmul.f32 %v6709_v38, %v5764_v35  ;;  %v4946_v52 = vpop.f32.mrb[9].mxu1 }
 0x7fa   : > { %v4970_v57 = vmul.f32 %v5764_v35, %v4946_v52  ;;  %v6710_v13 = vpop.f32.mrb[10].mxu1 }
 0x7fb   : > { %v4982_v40 = vadd.f32 %v5765_v54, %v4972_v12  ;;  %v4949_v33 = vpop.f32.mrb[11].mxu1 }
 0x7fc   : > { %v4980_v58 = vadd.f32 %v5765_v54, %v4970_v57  ;;  %v4971_v61 = vmul.f32 %v5764_v35, %v4949_v33 }
 0x7fd   : > { %v4985_v25 = vmax.f32 %v4982_v40, 0.0 }
 0x7fe   : > { %v4983_v5 = vmax.f32 %v4980_v58, 0.0  ;;  %v4981_v51 = vadd.f32 %v5765_v54, %v4971_v61 }
 0x7ff   : > { %v4992_v47 = vrot.slane %v4985_v25, 1 }
 0x800   : > { %v4984_v19 = vmax.f32 %v4981_v51, 0.0  ;;  %v4989_v11 = vrot.slane %v4983_v5, 1 }
 0x801   : > { %v4999_v24 = vmax.f32 %v4985_v25, %v4992_v47 }
 0x802   : > { %v4990_v37 = vrot.slane %v4984_v19, 1 }
 0x803   : > { %v5006_v44 = vrot.slane %v4999_v24, 6 }
 0x804   : > { %v4991_v27 = vsel %vm4017_vm7, %v4989_v11, %v4990_v37  ;;  %v4993_v26 = vsel %vm4017_vm7, %v4990_v37, %v4992_v47 }
 0x805   : > { %v4997_v30 = vmax.f32 %v4983_v5, %v4991_v27  ;;  %v4998_v15 = vmax.f32 %v4984_v19, %v4993_v26  ;;  %v5013_v28 = vmax.f32 %v4999_v24, %v5006_v44 }
 0x807   : > { %v5003_v16 = vrot.slane %v4997_v30, 6  ;;  %v5004_v23 = vrot.slane %v4998_v15, 6 }
 0x809   : > { %v5007_v62 = vsel %vm4124_vm8, %v5004_v23, %v5006_v44  ;;  %v5005_v31 = vsel %vm4124_vm8, %v5003_v16, %v5004_v23 }
 0x80a   : > { %v5012_v10 = vmax.f32 %v4998_v15, %v5007_v62  ;;  %v5011_v34 = vmax.f32 %v4997_v30, %v5005_v31 }
 0x80c   : > { %v6800_v41 = vpack.c.bf16 %v5012_v10, %v5011_v34 }
 0x80e   : > { %6801 = vmatpush3.bf16.msra.mxu1 %v6800_v41 }
 0x80f   : > { %6715 = vmatprep.subr.mxu1 %v7281_v2 }
 0x812   : > { %6716 = vmatpush3.msk.msra.mxu1 %vm4229_vm9, %v5013_v28 }
 0x813   : > { %6718 = vmatmul.mubr.msk.f32.vlgmr.msra.gmra.mrb[6].mxu1 %vm5015_vm14, %v5014_v63  ;;  %6720 = vmatprep.subr.bf16.mxu1 %v7281_v2 }
 0x814   : > { %6721 = vmatpush3.bf16.msra.mxu1 %v7253_v46  ;;  %6724 = vmatprep.mubr.msk.bf16.mxu1 %vm7283_vm2, %v7281_v2 }
 0x815   : > { %6722 = vmatprep.subr.bf16.mxu1 %v7281_v2 }
 0x818   : > { %6723 = vmatpush3.bf16.msra.mxu1 %v7254_v45 }
 0x819   : > { %6728 = vmatprep.subr.bf16.mxu1 %v7281_v2 }
 0x8e6   : > { %v5088_v21 = vpop.f32.mrb[6].mxu1 }
 0x8e7   : > { %v5093_v17 = vpack.c.bf16 %v5088_v21, %v5088_v21  ;;  %v6719_v3 = vpop.f32.mrb[7].mxu1 }
 0x8e9   : > { %6725 = vmatmul.mubr.msk.bf16.vlgmr.msra.gmra.mrb[12].mxu1 %vm5110_vm15, %v5093_v17  ;;  %v5160_v29 = vshrl.u32 %v5093_v17, 16  ;;  %v5224_v49 = vrot.slane %v5093_v17, 1 }
 0x8ea   : > { %6729 = vmatpush3.bf16.msra.mxu1 %v7255_v36  ;;  %6732 = vmatprep.mubr.msk.bf16.mxu1 %vm7283_vm2, %v7281_v2 }
 0x8eb   : > { %6730 = vmatprep.subr.bf16.mxu1 %v7281_v2  ;;  %v5286_v50 = vrot.slane %v5160_v29, 1 }
 0x8ee   : > { %6731 = vmatpush3.bf16.msra.mxu1 %v7256_v4 }
 0x8ef   : > { %6736 = vmatprep.subr.bf16.mxu1 %v7281_v2 }
 0x8f5   : > { %6733 = vmatmul.mubr.msk.bf16.vlgmr.msra.gmra.mrb[12].mxu1 %vm5110_vm15, %v5160_v29 }
 0x8f6   : > { %6737 = vmatpush3.bf16.msra.mxu1 %v7257_v55  ;;  %6740 = vmatprep.mubr.msk.bf16.mxu1 %vm7283_vm2, %v7281_v2 }
 0x8f7   : > { %6738 = vmatprep.subr.bf16.mxu1 %v7281_v2 }
 0x8fa   : > { %6739 = vmatpush3.bf16.msra.mxu1 %v7258_v22 }
 0x8fb   : > { %6744 = vmatprep.subr.bf16.mxu1 %v7281_v2 }
 0x901   : > { %6741 = vmatmul.mubr.msk.bf16.vlgmr.msra.gmra.mrb[12].mxu1 %vm5110_vm15, %v5224_v49 }
 0x902   : > { %6745 = vmatpush3.bf16.msra.mxu1 %v7259_v0  ;;  %6748 = vmatprep.mubr.msk.bf16.mxu1 %vm7283_vm2, %v7281_v2 }
 0x903   : > { %6746 = vmatprep.subr.bf16.mxu1 %v7281_v2 }
 0x906   : > { %6747 = vmatpush3.bf16.msra.mxu1 %v7260_v6 }
 0x907   : > { %6752 = vmatprep.subr.bf16.mxu1 %v7281_v2 }
 0x90d   : > { %6749 = vmatmul.mubr.msk.bf16.vlgmr.msra.gmra.mrb[12].mxu1 %vm5110_vm15, %v5286_v50 }
 0x90e   : > { %6753 = vmatpush3.bf16.msra.mxu1 %v7261_v14  ;;  %6764 = vmatprep.mubr.msk.bf16.mxu1 %vm7283_vm2, %v7281_v2 }
 0x90f   : > { %6754 = vmatprep.subr.bf16.mxu1 %v7281_v2 }
 0x912   : > { %6755 = vmatpush3.bf16.msra.mxu1 %v7262_v18 }
 0x913   : > { %6756 = vmatprep.subr.bf16.mxu1 %v7281_v2 }
 0x916   : > { %6757 = vmatpush3.bf16.msra.mxu1 %v7263_v32 }
 0x917   : > { %6758 = vmatprep.subr.bf16.mxu1 %v7281_v2 }
 0x91a   : > { %6759 = vmatpush3.bf16.msra.mxu1 %v7264_v43 }
 0x91b   : > { %6760 = vmatprep.subr.bf16.mxu1 %v7281_v2 }
 0x91e   : > { %6761 = vmatpush3.bf16.msra.mxu1 %v7265_v9 }
 0x91f   : > { %6762 = vmatprep.subr.bf16.mxu1 %v7281_v2 }
 0x922   : > { %6763 = vmatpush3.bf16.msra.mxu1 %v7266_v60 }
 0x9e0   : > { %v5336_v1 = vpop.f32.mrb[12].mxu1 }
 0x9e1   : > { %v6823_v48 = vadd.f32 %v5336_v1, %v5092_v59  ;;  %v6750_v42 = vpop.f32.mrb[13].mxu1 }
 0x9e2   : > { %v5339_v8 = vpop.f32.mrb[14].mxu1 }
 0x9e3   : > { %v5343_v7 = vpack.c.bf16 %v6823_v48, %v6823_v48  ;;  %v6751_v20 = vpop.f32.mrb[15].mxu1 }
 0x9e5   : > { %6765 = vmatmul.mubr.msk.bf16.vlgmr.msra.gmra.mrb[16].mxu1 %vm5393_vm0, %v5343_v7 }
 0xab8   : > { %v5431_v2 = vpop.f32.mrb[16].mxu1 }
 0xab9   : > { %v5432_v56 = vadd.f32 %v5431_v2, %v5356_v53  ;;  %v6766_v39 = vpop.f32.mrb[17].mxu1 }
 0xaba   : > { %v5434_v35 = vpop.f32.mrb[18].mxu1 }
 0xabb   : > { %v5437_v38 = vsub.f32 0.0, %v5432_v56  ;;  %v6767_v54 = vpop.f32.mrb[19].mxu1 }
 0xabd   : > { %v5438_v12 = vmul.f32 1.442695, %v5437_v38 }
 0xabf   : > { %7267 = vpow2.f32 %v5438_v12 }
 0xac9   : > { %v7268_v52 = vpop.eup %7267 }
 0xaca   : > { %v5440_v57 = vadd.f32 1.0, %v7268_v52 }
 0xacc   : > { %7269 = vrcp.f32 %v5440_v57 }
 0xad6   : > { %v7270_v13 = vpop.eup %7269 }
 0xad7   : > { %5444 = vst.msk [vmem:[%s519_s27] sm:$0x1] %vm5443_vm1, %v7270_v13 }
 0xad8 PF: > { %s28_s23 = sadd.s32 1, %s7279_s23  }
 0xad9   : > { %p25_p4 = scmp.ge.s32.totalorder %s28_s23, 4  }
 0xadb   :  { %27 = sbr.rel (!%p25_p4) target bundleno = 3 (0x3), region = 133 }

</bundles_post_ra>
